<compile_context>
chip_gen: v5e
topology: v5e:2x2
jax: 0.10.0
libtpu: 0.0.40
codegen_flags: <defaults>
</compile_context>

<pallas_src>
import functools

import jax
import jax.numpy as jnp
from jax.experimental import pallas as pl
from jax.experimental.pallas import tpu as pltpu

NEG_SLOPE = 0.2  # GAT leaky-relu negative slope


def _elu(x):
    return jnp.where(x > 0, x, jnp.exp(x) - 1.0)


# --------------------------- fused encoder kernel ----------------------------

def _gat_heads(adj_bf, h_in, w_bf, bias, H, D, emit):
    """One GATConv layer (DGL semantics), fully VMEM-resident.

    adj_bf : (N, N)  bf16 multiplicative dst x src mask (with self loops)
    h_in   : (N, Fin) f32
    w_bf   : (Fin, 2*H*D + 2*H) bf16 fused [fc | residual | fc@AL | fc@AR]
    bias   : (1, H*D) f32
    emit(h, out_h) is called once per head with the (N, D) pre-activation output
    (aggregation + residual + bias).
    """
    HD = H * D
    n = h_in.shape[0]
    # ONE MXU pass: features, residual, and both per-head attention scores.
    fr = jnp.dot(h_in.astype(jnp.bfloat16), w_bf, preferred_element_type=jnp.float32)
    feat = fr[:, :HD]                                    # (N, HD)
    res = fr[:, HD:2 * HD] + bias                        # (N, HD) residual + bias
    el_t = jnp.transpose(fr[:, 2 * HD:2 * HD + H])       # (H, N) per-src scores
    er = fr[:, 2 * HD + H:2 * HD + 2 * H]                # (N, H) per-dst scores
    feat_bf = feat.astype(jnp.bfloat16)
    ones_col = jnp.ones((n, 1), jnp.bfloat16)

    for hh in range(H):                                  # H static & small
        sl = slice(hh * D, (hh + 1) * D)
        e = er[:, hh:hh + 1] + el_t[hh:hh + 1, :]        # e[dst, src] = er[dst] + el[src]
        e = jnp.where(e >= 0, e, NEG_SLOPE * e)          # leaky relu
        # shift by the (unmasked) row max: softmax is shift-invariant; non-edges are
        # zeroed by the multiplicative mask after exp (den guard below for safety).
        e = e - jnp.max(e, axis=1, keepdims=True)
        p = jnp.exp(e).astype(jnp.bfloat16) * adj_bf     # masked softmax numerator (bf16)
        # aggregation + row-sum in one MXU pass: p @ [hsrc | 1]
        agg = jnp.dot(p, jnp.concatenate([feat_bf[:, sl], ones_col], axis=1),
                      preferred_element_type=jnp.float32)          # (N, D+1)
        den = jnp.maximum(agg[:, D:D + 1], jnp.float32(1e-20))
        out_h = agg[:, :D] * pl.reciprocal(den, approx=True) + res[:, sl]
        emit(hh, out_h)


def _encoder_kernel(adj0_ref, adj1_ref, x_ref,
                    w0_ref, b0_ref, w1_ref, b1_ref,
                    out_ref, hb0_ref, hb1_ref, *, H0, D0, H1, D1):
    adj0 = adj0_ref[0]                                   # (N, N) bf16
    adj1 = adj1_ref[0]
    x = x_ref[0]                                         # (N, Fin) f32

    # ---- layer 0: GAT -> flatten(1) -> BatchNorm1d (batch stats) -> ELU ----
    def store0(hh, v):
        hb0_ref[:, hh * D0:(hh + 1) * D0] = v            # lane-slice write, no concat

    _gat_heads(adj0, x, w0_ref[...], b0_ref[...], H0, D0, store0)
    h0 = hb0_ref[...]
    mean = jnp.mean(h0, axis=0, keepdims=True)
    var = jnp.mean((h0 - mean) ** 2, axis=0, keepdims=True)
    h = _elu((h0 - mean) * jax.lax.rsqrt(var + 1e-5))    # gamma=1, beta=0 at init

    # ---- layer 1: GAT -> ELU (fused into the per-head store) ----
    # The head-mean is folded into the projection weight in the loss kernel, so the
    # full post-ELU (N, H1*D1) slab is emitted (wider, less-masked output store).
    def store1(hh, v):
        hb1_ref[:, hh * D1:(hh + 1) * D1] = _elu(v)

    _gat_heads(adj1, h, w1_ref[...], b1_ref[...], H1, D1, store1)
    out_ref[0] = hb1_ref[...]


def _prep_gat_weights(p):
    """Fold [fc | residual | fc@AL | fc@AR] into one bf16 MXU operand."""
    H, D = p["H"], p["D"]
    HD = H * D
    fc, res = p["fc_w"], p["res_w"]                      # (Fin, HD)
    al = p["al"].reshape(HD, 1)
    ar = p["ar"].reshape(HD, 1)
    sel = jnp.repeat(jnp.eye(H, dtype=jnp.float32), D, axis=0)   # (HD, H) head selector
    w_el = jnp.dot(fc, sel * al)                         # (Fin, H): el = x @ fc @ AL
    w_er = jnp.dot(fc, sel * ar)                         # (Fin, H): er = x @ fc @ AR
    fused = jnp.concatenate([fc, res, w_el, w_er], axis=1).astype(jnp.bfloat16)
    return fused, p["b"]


def pallas_encoder(adj0, adj1, feats, enc_params):
    """Runs BOTH graph views through the 2-layer encoder in one pallas_call.

    adj0/adj1: (2, N, N) bf16 per-layer adjacency masks, stacked over views.
    feats:     (2, N, in_dim) f32 node features.
    returns    (2, N, H1*D1) f32 post-ELU slab (head-mean folded into the proj kernel).
    """
    l0, l1 = enc_params
    V, N, Fin = feats.shape
    H0, D0 = l0["H"], l0["D"]
    H1, D1 = l1["H"], l1["D"]
    HD0, HD1 = H0 * D0, H1 * D1
    w0, b0 = _prep_gat_weights(l0)
    w1, b1 = _prep_gat_weights(l1)
    C0 = 2 * HD0 + 2 * H0
    C1 = 2 * HD1 + 2 * H1

    kernel = functools.partial(_encoder_kernel, H0=H0, D0=D0, H1=H1, D1=D1)
    view3 = lambda v: (v, 0, 0)
    const2 = lambda v: (0, 0)

    # scoped-VMEM sizing: double-buffered per-view blocks + weights + scratch + temps
    est = (2 * (2 * N * N * 2 + 4 * N * (Fin + HD1))
           + 2 * (Fin * C0 + HD0 * C1) + 4 * (HD0 + HD1)
           + 4 * N * (HD0 + HD1)
           + 4 * (4 * N * N + N * (C0 + C1) + 2 * N * (HD0 + HD1)))
    vmem_limit = int(min(max(2 * est, 16 * 1024 * 1024), 48 * 1024 * 1024))

    flops = (2 * V * N * (Fin * C0 + HD0 * C1)
             + 2 * V * N * N * (H0 * (D0 + 1) + H1 * (D1 + 1)))
    return pl.pallas_call(
        kernel,
        grid=(V,),
        in_specs=[
            pl.BlockSpec((1, N, N), view3),          # layer-0 adjacency mask (bf16)
            pl.BlockSpec((1, N, N), view3),          # layer-1 adjacency mask (bf16)
            pl.BlockSpec((1, N, Fin), view3),        # node features (per view)
            pl.BlockSpec((Fin, C0), const2),         # layer-0 fused weight (bf16)
            pl.BlockSpec((1, HD0), const2),          # layer-0 bias
            pl.BlockSpec((HD0, C1), const2),         # layer-1 fused weight (bf16)
            pl.BlockSpec((1, HD1), const2),          # layer-1 bias
        ],
        out_specs=pl.BlockSpec((1, N, HD1), view3),
        out_shape=jax.ShapeDtypeStruct((V, N, HD1), jnp.float32),
        scratch_shapes=[pltpu.VMEM((N, HD0), jnp.float32),
                        pltpu.VMEM((N, HD1), jnp.float32)],
        compiler_params=pltpu.CompilerParams(
            dimension_semantics=("parallel",),
            vmem_limit_bytes=vmem_limit),
        cost_estimate=pl.CostEstimate(
            flops=int(flops),
            transcendentals=int(V * N * (N * (H0 + H1) + HD0 + HD1)),
            bytes_accessed=int(2 * 2 * V * N * N + 4 * V * N * (Fin + HD1)
                               + 2 * (Fin * C0 + HD0 * C1) + 4 * (HD0 + HD1))),
    )(adj0, adj1, feats, w0, b0, w1, b1)


# ----------------------- fused projection + loss kernel ----------------------

def _proj_loss_kernel(h_ref, pw_ref, pb_ref, pos_ref, feat_ref,
                      alpha_ref, temp_ref, o_ref):
    # h_ref: (2, N, H1*D1) post-ELU slabs; pw already contains the head-mean fold.
    pw = pw_ref[...]                                     # (HD1, out) bf16
    pb = pb_ref[...]                                     # (1, out)  f32
    z1 = jnp.dot(h_ref[0].astype(jnp.bfloat16), pw,
                 preferred_element_type=jnp.float32) + pb            # proj(mean(h1))
    z2 = jnp.dot(h_ref[1].astype(jnp.bfloat16), pw,
                 preferred_element_type=jnp.float32) + pb            # proj(mean(h2))
    # forward(): ret = get_loss(z2, z1, pos_, feat_) -> inside get_loss: z1:=z2, z2:=z1
    za, zb = z2, z1

    p_in = pos_ref[...]
    f_in = feat_ref[...]
    P = jnp.dot(p_in.astype(jnp.bfloat16), jnp.transpose(p_in).astype(jnp.bfloat16),
                preferred_element_type=jnp.float32)
    Fm = jnp.dot(f_in.astype(jnp.bfloat16), jnp.transpose(f_in).astype(jnp.bfloat16),
                 preferred_element_type=jnp.float32)
    a0 = alpha_ref[0]
    s = 1.0 / (1.0 + jnp.exp(jnp.full((1, 1), -a0, dtype=jnp.float32)))   # sigmoid(alpha)
    C = s * P + (1.0 - s) * Fm
    n = C.shape[0]

    # topk(k=1) + scatter_ then * C : `pos` has top^2 at the (first) argmax column only,
    # so it is never materialized.
    top = jnp.max(C, axis=1, keepdims=True)
    col = jax.lax.broadcasted_iota(jnp.int32, (n, n), 1)
    first_idx = jnp.min(jnp.where(C == top, col, n), axis=1, keepdims=True)

    # F.normalize (L2 rows, eps=1e-12) with the temperature folded into the scale.
    t = temp_ref[0]
    inv_sqrt_t = jax.lax.rsqrt(jnp.full((1, 1), t, dtype=jnp.float32))
    sa = jax.lax.rsqrt(jnp.maximum(jnp.sum(za * za, axis=1, keepdims=True), 1e-24))
    sb = jax.lax.rsqrt(jnp.maximum(jnp.sum(zb * zb, axis=1, keepdims=True), 1e-24))
    zan = za * (sa * inv_sqrt_t)
    zbn = zb * (sb * inv_sqrt_t)
    zan_bf = zan.astype(jnp.bfloat16)

    refl = jnp.exp(jnp.dot(zan_bf, jnp.transpose(zan).astype(jnp.bfloat16),
                           preferred_element_type=jnp.float32))
    between = jnp.exp(jnp.dot(zan_bf, jnp.transpose(zbn).astype(jnp.bfloat16),
                              preferred_element_type=jnp.float32))

    den = jnp.sum(refl * (1.0 - C), axis=1, keepdims=True)            # sum(refl * neg)
    num = (top * top) * jnp.sum(jnp.where(col == first_idx, between, 0.0),
                                axis=1, keepdims=True)
    num = jnp.maximum(num, jnp.float32(1e-30))   # guard -log(0) on degenerate rows
    loss = -jnp.log(num / den)
    o_ref[...] = jnp.mean(loss, axis=0, keepdims=True)                # ret.mean() -> (1,1)


def pallas_proj_loss(henc, proj_w, proj_b, pos_, feat_, alpha, temp, heads_out):
    _, n, hd1 = henc.shape
    out_dim = proj_w.shape[1]
    # fold the encoder head-mean into the projection: mean_h(E) @ W == E_slab @ tile(W/H)
    pw = jnp.tile(proj_w / heads_out, (heads_out, 1)).astype(jnp.bfloat16)   # (HD1, out)
    pb = proj_b.reshape(1, out_dim)
    a = jnp.asarray(alpha, jnp.float32).reshape(1)
    t = jnp.asarray(temp, jnp.float32).reshape(1)
    vmem = lambda: pl.BlockSpec(memory_space=pltpu.MemorySpace.VMEM)
    smem = lambda: pl.BlockSpec(memory_space=pltpu.MemorySpace.SMEM)
    est = (4 * (2 * n * hd1 + n * pos_.shape[1] + n * feat_.shape[1] + out_dim)
           + 2 * hd1 * out_dim + 4 * (8 * n * n + 6 * n * out_dim))
    vmem_limit = int(min(max(2 * est, 16 * 1024 * 1024), 48 * 1024 * 1024))
    out = pl.pallas_call(
        _proj_loss_kernel,
        in_specs=[vmem(), vmem(), vmem(), vmem(), vmem(), smem(), smem()],
        out_specs=pl.BlockSpec(memory_space=pltpu.MemorySpace.VMEM),
        out_shape=jax.ShapeDtypeStruct((1, 1), jnp.float32),
        compiler_params=pltpu.CompilerParams(vmem_limit_bytes=vmem_limit),
        cost_estimate=pl.CostEstimate(
            flops=int(2 * n * (2 * hd1 * out_dim
                               + n * (pos_.shape[1] + feat_.shape[1])
                               + 2 * n * out_dim)),
            transcendentals=int(2 * n * n + 2 * n + 2),
            bytes_accessed=int(4 * (2 * n * hd1 + n * pos_.shape[1]
                                    + n * feat_.shape[1] + 3) + 2 * hd1 * out_dim)),
    )(henc, pw, pb, pos_, feat_, a, t)
    return out[0, 0]


# -------------------------------- model glue ---------------------------------

def init_gat_params(key, in_dim, out_dim, heads, scale=0.1):
    k = jax.random.split(key, 4)
    hd = heads * out_dim
    return dict(
        H=heads, D=out_dim,
        fc_w=scale * jax.random.normal(k[0], (in_dim, hd), jnp.float32),
        res_w=scale * jax.random.normal(k[3], (in_dim, hd), jnp.float32),
        al=scale * jax.random.normal(k[1], (1, hd), jnp.float32),   # attn_l
        ar=scale * jax.random.normal(k[2], (1, hd), jnp.float32),   # attn_r
        b=jnp.zeros((1, hd), jnp.float32),                          # GATConv bias init = 0
    )


def graphtl_forward(params, graph1, graph2, feat1, feat2, pos_, feat_):
    # bf16 multiplicative adjacency masks (half the DMA/VMEM of f32)
    adj0 = jnp.stack([graph1[0], graph2[0]]).astype(jnp.bfloat16)   # layer-0 graphs / view
    adj1 = jnp.stack([graph1[1], graph2[1]]).astype(jnp.bfloat16)   # layer-1 graphs / view
    feats = jnp.stack([feat1, feat2]).astype(jnp.float32)           # (2, N, in_dim)
    henc = pallas_encoder(adj0, adj1, feats, params["enc"])         # (2, N, H1*D1)
    # forward(): z1=proj(h1), z2=proj(h2); ret = get_loss(z2, z1, pos_, feat_).mean()
    return pallas_proj_loss(henc, params["proj_w"], params["proj_b"],
                            pos_, feat_, params["alpha"], params["temp"],
                            params["enc"][1]["H"])


# ----------------------------------- main -------------------------------------

if __name__ == "__main__":
    N, in_dim, hid_dim, out_dim, num_layers, temp = 32, 16, 8, 16, 2, 0.5
    heads = [4] * (num_layers - 1) + [6]

    key = jax.random.PRNGKey(0)
    keys = jax.random.split(key, 16)

    # deterministic parameters
    enc = []
    cur_in = in_dim
    for l in range(num_layers):
        out_l = hid_dim if l < num_layers - 1 else out_dim
        enc.append(init_gat_params(keys[l], cur_in, out_l, heads[l]))
        cur_in = out_l * heads[l]
    params = dict(
        enc=enc,
        proj_w=0.1 * jax.random.normal(keys[8], (out_dim, out_dim), jnp.float32),
        proj_b=jnp.zeros((out_dim,), jnp.float32),
        alpha=jnp.zeros((), jnp.float32),     # nn.Parameter(FloatTensor(1)).fill_(0.0)
        temp=jnp.float32(temp),
    )

    # deterministic inputs: per-layer dense adjacency masks with self-loops
    def rand_adj(k):
        a = (jax.random.uniform(k, (N, N)) < 0.2).astype(jnp.float32)
        return jnp.maximum(a, jnp.eye(N, dtype=jnp.float32))

    graph1 = [rand_adj(keys[10]), rand_adj(keys[11])]
    graph2 = [rand_adj(keys[12]), rand_adj(keys[13])]
    feat1 = jax.random.normal(keys[14], (N, in_dim), jnp.float32)
    feat2 = jax.random.normal(keys[15], (N, in_dim), jnp.float32)
    pos_ = 0.1 * jax.random.normal(keys[6], (N, 8), jnp.float32)
    feat_ = 0.1 * jax.random.normal(keys[7], (N, in_dim), jnp.float32)

    loss = graphtl_forward(params, graph1, graph2, feat1, feat2, pos_, feat_)
    jax.block_until_ready(loss)
    print("KERNEL_OK")
</pallas_src>

<mosaic_0001>
module attributes {stable_mosaic.version = 11 : i64} {
  func.func @_encoder_kernel(%arg0: i32, %arg1: memref<1x32x32xbf16, #tpu.memory_space<vmem>>, %arg2: memref<1x32x32xbf16, #tpu.memory_space<vmem>>, %arg3: memref<1x32x16xf32, #tpu.memory_space<vmem>>, %arg4: memref<16x72xbf16, #tpu.memory_space<vmem>>, %arg5: memref<1x32xf32, #tpu.memory_space<vmem>>, %arg6: memref<32x204xbf16, #tpu.memory_space<vmem>>, %arg7: memref<1x96xf32, #tpu.memory_space<vmem>>, %arg8: memref<1x32x96xf32, #tpu.memory_space<vmem>>, %arg9: memref<32x32xf32, #tpu.memory_space<vmem>>, %arg10: memref<32x96xf32, #tpu.memory_space<vmem>>) attributes {dimension_semantics = [#tpu.dimension_semantics<parallel>], iteration_bounds = array<i64: 2>, scalar_prefetch = 0 : i64, scratch_operands = 2 : i64, tpu.core_type = #tpu.core_type<tc>, window_params = [{transform_indices = @transform_0, window_bounds = array<i64: 1, 32, 32>}, {transform_indices = @transform_1, window_bounds = array<i64: 1, 32, 32>}, {transform_indices = @transform_2, window_bounds = array<i64: 1, 32, 16>}, {pipeline_mode = #tpu.pipeline_mode<synchronous>, transform_indices = @transform_3, window_bounds = array<i64: 16, 72>}, {pipeline_mode = #tpu.pipeline_mode<synchronous>, transform_indices = @transform_4, window_bounds = array<i64: 1, 32>}, {pipeline_mode = #tpu.pipeline_mode<synchronous>, transform_indices = @transform_5, window_bounds = array<i64: 32, 204>}, {pipeline_mode = #tpu.pipeline_mode<synchronous>, transform_indices = @transform_6, window_bounds = array<i64: 1, 96>}, {transform_indices = @transform_7, window_bounds = array<i64: 1, 32, 96>}]} {
    %c0 = arith.constant 0 : index
    %c0_0 = arith.constant 0 : index
    %c0_1 = arith.constant 0 : index
    %0 = vector.load %arg1[%c0, %c0_0, %c0_1] : memref<1x32x32xbf16, #tpu.memory_space<vmem>>, vector<1x32x32xbf16>
    %1 = vector.shape_cast %0 : vector<1x32x32xbf16> to vector<32x32xbf16>
    %c0_2 = arith.constant 0 : index
    %c0_3 = arith.constant 0 : index
    %c0_4 = arith.constant 0 : index
    %2 = vector.load %arg2[%c0_2, %c0_3, %c0_4] : memref<1x32x32xbf16, #tpu.memory_space<vmem>>, vector<1x32x32xbf16>
    %3 = vector.shape_cast %2 : vector<1x32x32xbf16> to vector<32x32xbf16>
    %c0_5 = arith.constant 0 : index
    %c0_6 = arith.constant 0 : index
    %c0_7 = arith.constant 0 : index
    %4 = vector.load %arg3[%c0_5, %c0_6, %c0_7] : memref<1x32x16xf32, #tpu.memory_space<vmem>>, vector<1x32x16xf32>
    %5 = vector.shape_cast %4 : vector<1x32x16xf32> to vector<32x16xf32>
    %c0_8 = arith.constant 0 : index
    %c0_9 = arith.constant 0 : index
    %6 = vector.load %arg4[%c0_8, %c0_9] : memref<16x72xbf16, #tpu.memory_space<vmem>>, vector<16x72xbf16>
    %c0_10 = arith.constant 0 : index
    %c0_11 = arith.constant 0 : index
    %7 = vector.load %arg5[%c0_10, %c0_11] : memref<1x32xf32, #tpu.memory_space<vmem>>, vector<1x32xf32>
    %8 = arith.truncf %5 : vector<32x16xf32> to vector<32x16xbf16>
    %cst = arith.constant dense<0.000000e+00> : vector<32x72xf32>
    %9 = tpu.matmul %8, %6, %cst {dimension_numbers = #tpu.dot_dimension_numbers<[1], [0], [0], [1], [0, 0, 1, 1], [], []>} : vector<32x16xbf16>, vector<16x72xbf16>, vector<32x72xf32> -> vector<32x72xf32>
    %10 = vector.extract_strided_slice %9 {offsets = [0, 0], sizes = [32, 32], strides = [1, 1]} : vector<32x72xf32> to vector<32x32xf32>
    %11 = vector.extract_strided_slice %9 {offsets = [0, 32], sizes = [32, 32], strides = [1, 1]} : vector<32x72xf32> to vector<32x32xf32>
    %12 = vector.broadcast %7 : vector<1x32xf32> to vector<32x32xf32>
    %13 = arith.addf %11, %12 : vector<32x32xf32>
    %14 = vector.extract_strided_slice %9 {offsets = [0, 64], sizes = [32, 4], strides = [1, 1]} : vector<32x72xf32> to vector<32x4xf32>
    %15 = tpu.transpose %14, [1, 0] : vector<32x4xf32> -> vector<4x32xf32>
    %16 = vector.extract_strided_slice %9 {offsets = [0, 68], sizes = [32, 4], strides = [1, 1]} : vector<32x72xf32> to vector<32x4xf32>
    %17 = arith.truncf %10 : vector<32x32xf32> to vector<32x32xbf16>
    %cst_12 = arith.constant 1.000000e+00 : bf16
    %18 = vector.broadcast %cst_12 : bf16 to vector<32x1xbf16>
    %19 = vector.extract_strided_slice %16 {offsets = [0, 0], sizes = [32, 1], strides = [1, 1]} : vector<32x4xf32> to vector<32x1xf32>
    %20 = vector.extract_strided_slice %15 {offsets = [0, 0], sizes = [1, 32], strides = [1, 1]} : vector<4x32xf32> to vector<1x32xf32>
    %21 = vector.broadcast %19 : vector<32x1xf32> to vector<32x32xf32>
    %22 = vector.broadcast %20 : vector<1x32xf32> to vector<32x32xf32>
    %23 = arith.addf %21, %22 : vector<32x32xf32>
    %cst_13 = arith.constant 0.000000e+00 : f32
    %24 = vector.broadcast %cst_13 : f32 to vector<32x32xf32>
    %25 = arith.cmpf oge, %23, %24 : vector<32x32xf32>
    %cst_14 = arith.constant 2.000000e-01 : f32
    %26 = vector.broadcast %cst_14 : f32 to vector<32x32xf32>
    %27 = arith.mulf %26, %23 : vector<32x32xf32>
    %28 = arith.select %25, %23, %27 : vector<32x32xi1>, vector<32x32xf32>
    %cst_15 = arith.constant dense<0xFF800000> : vector<32xf32>
    %29 = vector.multi_reduction <maximumf>, %28, %cst_15 [1] : vector<32x32xf32> to vector<32xf32>
    %30 = vector.shape_cast %29 : vector<32xf32> to vector<32x1xf32>
    %31 = vector.broadcast %30 : vector<32x1xf32> to vector<32x32xf32>
    %32 = arith.subf %28, %31 : vector<32x32xf32>
    %33 = math.exp %32 : vector<32x32xf32>
    %34 = arith.truncf %33 : vector<32x32xf32> to vector<32x32xbf16>
    %35 = arith.mulf %34, %1 : vector<32x32xbf16>
    %36 = vector.extract_strided_slice %17 {offsets = [0, 0], sizes = [32, 8], strides = [1, 1]} : vector<32x32xbf16> to vector<32x8xbf16>
    %37 = tpu.concatenate %36, %18 in 1 : vector<32x8xbf16>, vector<32x1xbf16> -> vector<32x9xbf16>
    %cst_16 = arith.constant dense<0.000000e+00> : vector<32x9xf32>
    %38 = tpu.matmul %35, %37, %cst_16 {dimension_numbers = #tpu.dot_dimension_numbers<[1], [0], [0], [1], [0, 0, 1, 1], [], []>} : vector<32x32xbf16>, vector<32x9xbf16>, vector<32x9xf32> -> vector<32x9xf32>
    %39 = vector.extract_strided_slice %38 {offsets = [0, 8], sizes = [32, 1], strides = [1, 1]} : vector<32x9xf32> to vector<32x1xf32>
    %cst_17 = arith.constant 9.99999968E-21 : f32
    %40 = vector.broadcast %cst_17 : f32 to vector<32x1xf32>
    %41 = arith.maximumf %39, %40 : vector<32x1xf32>
    %42 = vector.extract_strided_slice %38 {offsets = [0, 0], sizes = [32, 8], strides = [1, 1]} : vector<32x9xf32> to vector<32x8xf32>
    %43 = tpu.reciprocal %41 {approx = true} : vector<32x1xf32> -> vector<32x1xf32>
    %44 = vector.broadcast %43 : vector<32x1xf32> to vector<32x8xf32>
    %45 = arith.mulf %42, %44 : vector<32x8xf32>
    %46 = vector.extract_strided_slice %13 {offsets = [0, 0], sizes = [32, 8], strides = [1, 1]} : vector<32x32xf32> to vector<32x8xf32>
    %47 = arith.addf %45, %46 : vector<32x8xf32>
    %c0_18 = arith.constant 0 : index
    %c0_19 = arith.constant 0 : index
    %48 = vector.load %arg9[%c0_18, %c0_19] : memref<32x32xf32, #tpu.memory_space<vmem>>, vector<32x8xf32>
    tpu.vector_store %arg9[%c0_18, %c0_19], %47 {strides = array<i32>} : memref<32x32xf32, #tpu.memory_space<vmem>>, vector<32x8xf32>,
    %49 = vector.extract_strided_slice %16 {offsets = [0, 1], sizes = [32, 1], strides = [1, 1]} : vector<32x4xf32> to vector<32x1xf32>
    %50 = vector.extract_strided_slice %15 {offsets = [1, 0], sizes = [1, 32], strides = [1, 1]} : vector<4x32xf32> to vector<1x32xf32>
    %51 = vector.broadcast %49 : vector<32x1xf32> to vector<32x32xf32>
    %52 = vector.broadcast %50 : vector<1x32xf32> to vector<32x32xf32>
    %53 = arith.addf %51, %52 : vector<32x32xf32>
    %cst_20 = arith.constant 0.000000e+00 : f32
    %54 = vector.broadcast %cst_20 : f32 to vector<32x32xf32>
    %55 = arith.cmpf oge, %53, %54 : vector<32x32xf32>
    %cst_21 = arith.constant 2.000000e-01 : f32
    %56 = vector.broadcast %cst_21 : f32 to vector<32x32xf32>
    %57 = arith.mulf %56, %53 : vector<32x32xf32>
    %58 = arith.select %55, %53, %57 : vector<32x32xi1>, vector<32x32xf32>
    %cst_22 = arith.constant dense<0xFF800000> : vector<32xf32>
    %59 = vector.multi_reduction <maximumf>, %58, %cst_22 [1] : vector<32x32xf32> to vector<32xf32>
    %60 = vector.shape_cast %59 : vector<32xf32> to vector<32x1xf32>
    %61 = vector.broadcast %60 : vector<32x1xf32> to vector<32x32xf32>
    %62 = arith.subf %58, %61 : vector<32x32xf32>
    %63 = math.exp %62 : vector<32x32xf32>
    %64 = arith.truncf %63 : vector<32x32xf32> to vector<32x32xbf16>
    %65 = arith.mulf %64, %1 : vector<32x32xbf16>
    %66 = vector.extract_strided_slice %17 {offsets = [0, 8], sizes = [32, 8], strides = [1, 1]} : vector<32x32xbf16> to vector<32x8xbf16>
    %67 = tpu.concatenate %66, %18 in 1 : vector<32x8xbf16>, vector<32x1xbf16> -> vector<32x9xbf16>
    %cst_23 = arith.constant dense<0.000000e+00> : vector<32x9xf32>
    %68 = tpu.matmul %65, %67, %cst_23 {dimension_numbers = #tpu.dot_dimension_numbers<[1], [0], [0], [1], [0, 0, 1, 1], [], []>} : vector<32x32xbf16>, vector<32x9xbf16>, vector<32x9xf32> -> vector<32x9xf32>
    %69 = vector.extract_strided_slice %68 {offsets = [0, 8], sizes = [32, 1], strides = [1, 1]} : vector<32x9xf32> to vector<32x1xf32>
    %cst_24 = arith.constant 9.99999968E-21 : f32
    %70 = vector.broadcast %cst_24 : f32 to vector<32x1xf32>
    %71 = arith.maximumf %69, %70 : vector<32x1xf32>
    %72 = vector.extract_strided_slice %68 {offsets = [0, 0], sizes = [32, 8], strides = [1, 1]} : vector<32x9xf32> to vector<32x8xf32>
    %73 = tpu.reciprocal %71 {approx = true} : vector<32x1xf32> -> vector<32x1xf32>
    %74 = vector.broadcast %73 : vector<32x1xf32> to vector<32x8xf32>
    %75 = arith.mulf %72, %74 : vector<32x8xf32>
    %76 = vector.extract_strided_slice %13 {offsets = [0, 8], sizes = [32, 8], strides = [1, 1]} : vector<32x32xf32> to vector<32x8xf32>
    %77 = arith.addf %75, %76 : vector<32x8xf32>
    %c0_25 = arith.constant 0 : index
    %c8 = arith.constant 8 : index
    %78 = vector.load %arg9[%c0_25, %c8] : memref<32x32xf32, #tpu.memory_space<vmem>>, vector<32x8xf32>
    tpu.vector_store %arg9[%c0_25, %c8], %77 {strides = array<i32>} : memref<32x32xf32, #tpu.memory_space<vmem>>, vector<32x8xf32>,
    %79 = vector.extract_strided_slice %16 {offsets = [0, 2], sizes = [32, 1], strides = [1, 1]} : vector<32x4xf32> to vector<32x1xf32>
    %80 = vector.extract_strided_slice %15 {offsets = [2, 0], sizes = [1, 32], strides = [1, 1]} : vector<4x32xf32> to vector<1x32xf32>
    %81 = vector.broadcast %79 : vector<32x1xf32> to vector<32x32xf32>
    %82 = vector.broadcast %80 : vector<1x32xf32> to vector<32x32xf32>
    %83 = arith.addf %81, %82 : vector<32x32xf32>
    %cst_26 = arith.constant 0.000000e+00 : f32
    %84 = vector.broadcast %cst_26 : f32 to vector<32x32xf32>
    %85 = arith.cmpf oge, %83, %84 : vector<32x32xf32>
    %cst_27 = arith.constant 2.000000e-01 : f32
    %86 = vector.broadcast %cst_27 : f32 to vector<32x32xf32>
    %87 = arith.mulf %86, %83 : vector<32x32xf32>
    %88 = arith.select %85, %83, %87 : vector<32x32xi1>, vector<32x32xf32>
    %cst_28 = arith.constant dense<0xFF800000> : vector<32xf32>
    %89 = vector.multi_reduction <maximumf>, %88, %cst_28 [1] : vector<32x32xf32> to vector<32xf32>
    %90 = vector.shape_cast %89 : vector<32xf32> to vector<32x1xf32>
    %91 = vector.broadcast %90 : vector<32x1xf32> to vector<32x32xf32>
    %92 = arith.subf %88, %91 : vector<32x32xf32>
    %93 = math.exp %92 : vector<32x32xf32>
    %94 = arith.truncf %93 : vector<32x32xf32> to vector<32x32xbf16>
    %95 = arith.mulf %94, %1 : vector<32x32xbf16>
    %96 = vector.extract_strided_slice %17 {offsets = [0, 16], sizes = [32, 8], strides = [1, 1]} : vector<32x32xbf16> to vector<32x8xbf16>
    %97 = tpu.concatenate %96, %18 in 1 : vector<32x8xbf16>, vector<32x1xbf16> -> vector<32x9xbf16>
    %cst_29 = arith.constant dense<0.000000e+00> : vector<32x9xf32>
    %98 = tpu.matmul %95, %97, %cst_29 {dimension_numbers = #tpu.dot_dimension_numbers<[1], [0], [0], [1], [0, 0, 1, 1], [], []>} : vector<32x32xbf16>, vector<32x9xbf16>, vector<32x9xf32> -> vector<32x9xf32>
    %99 = vector.extract_strided_slice %98 {offsets = [0, 8], sizes = [32, 1], strides = [1, 1]} : vector<32x9xf32> to vector<32x1xf32>
    %cst_30 = arith.constant 9.99999968E-21 : f32
    %100 = vector.broadcast %cst_30 : f32 to vector<32x1xf32>
    %101 = arith.maximumf %99, %100 : vector<32x1xf32>
    %102 = vector.extract_strided_slice %98 {offsets = [0, 0], sizes = [32, 8], strides = [1, 1]} : vector<32x9xf32> to vector<32x8xf32>
    %103 = tpu.reciprocal %101 {approx = true} : vector<32x1xf32> -> vector<32x1xf32>
    %104 = vector.broadcast %103 : vector<32x1xf32> to vector<32x8xf32>
    %105 = arith.mulf %102, %104 : vector<32x8xf32>
    %106 = vector.extract_strided_slice %13 {offsets = [0, 16], sizes = [32, 8], strides = [1, 1]} : vector<32x32xf32> to vector<32x8xf32>
    %107 = arith.addf %105, %106 : vector<32x8xf32>
    %c0_31 = arith.constant 0 : index
    %c16 = arith.constant 16 : index
    %108 = vector.load %arg9[%c0_31, %c16] : memref<32x32xf32, #tpu.memory_space<vmem>>, vector<32x8xf32>
    tpu.vector_store %arg9[%c0_31, %c16], %107 {strides = array<i32>} : memref<32x32xf32, #tpu.memory_space<vmem>>, vector<32x8xf32>,
    %109 = vector.extract_strided_slice %16 {offsets = [0, 3], sizes = [32, 1], strides = [1, 1]} : vector<32x4xf32> to vector<32x1xf32>
    %110 = vector.extract_strided_slice %15 {offsets = [3, 0], sizes = [1, 32], strides = [1, 1]} : vector<4x32xf32> to vector<1x32xf32>
    %111 = vector.broadcast %109 : vector<32x1xf32> to vector<32x32xf32>
    %112 = vector.broadcast %110 : vector<1x32xf32> to vector<32x32xf32>
    %113 = arith.addf %111, %112 : vector<32x32xf32>
    %cst_32 = arith.constant 0.000000e+00 : f32
    %114 = vector.broadcast %cst_32 : f32 to vector<32x32xf32>
    %115 = arith.cmpf oge, %113, %114 : vector<32x32xf32>
    %cst_33 = arith.constant 2.000000e-01 : f32
    %116 = vector.broadcast %cst_33 : f32 to vector<32x32xf32>
    %117 = arith.mulf %116, %113 : vector<32x32xf32>
    %118 = arith.select %115, %113, %117 : vector<32x32xi1>, vector<32x32xf32>
    %cst_34 = arith.constant dense<0xFF800000> : vector<32xf32>
    %119 = vector.multi_reduction <maximumf>, %118, %cst_34 [1] : vector<32x32xf32> to vector<32xf32>
    %120 = vector.shape_cast %119 : vector<32xf32> to vector<32x1xf32>
    %121 = vector.broadcast %120 : vector<32x1xf32> to vector<32x32xf32>
    %122 = arith.subf %118, %121 : vector<32x32xf32>
    %123 = math.exp %122 : vector<32x32xf32>
    %124 = arith.truncf %123 : vector<32x32xf32> to vector<32x32xbf16>
    %125 = arith.mulf %124, %1 : vector<32x32xbf16>
    %126 = vector.extract_strided_slice %17 {offsets = [0, 24], sizes = [32, 8], strides = [1, 1]} : vector<32x32xbf16> to vector<32x8xbf16>
    %127 = tpu.concatenate %126, %18 in 1 : vector<32x8xbf16>, vector<32x1xbf16> -> vector<32x9xbf16>
    %cst_35 = arith.constant dense<0.000000e+00> : vector<32x9xf32>
    %128 = tpu.matmul %125, %127, %cst_35 {dimension_numbers = #tpu.dot_dimension_numbers<[1], [0], [0], [1], [0, 0, 1, 1], [], []>} : vector<32x32xbf16>, vector<32x9xbf16>, vector<32x9xf32> -> vector<32x9xf32>
    %129 = vector.extract_strided_slice %128 {offsets = [0, 8], sizes = [32, 1], strides = [1, 1]} : vector<32x9xf32> to vector<32x1xf32>
    %cst_36 = arith.constant 9.99999968E-21 : f32
    %130 = vector.broadcast %cst_36 : f32 to vector<32x1xf32>
    %131 = arith.maximumf %129, %130 : vector<32x1xf32>
    %132 = vector.extract_strided_slice %128 {offsets = [0, 0], sizes = [32, 8], strides = [1, 1]} : vector<32x9xf32> to vector<32x8xf32>
    %133 = tpu.reciprocal %131 {approx = true} : vector<32x1xf32> -> vector<32x1xf32>
    %134 = vector.broadcast %133 : vector<32x1xf32> to vector<32x8xf32>
    %135 = arith.mulf %132, %134 : vector<32x8xf32>
    %136 = vector.extract_strided_slice %13 {offsets = [0, 24], sizes = [32, 8], strides = [1, 1]} : vector<32x32xf32> to vector<32x8xf32>
    %137 = arith.addf %135, %136 : vector<32x8xf32>
    %c0_37 = arith.constant 0 : index
    %c24 = arith.constant 24 : index
    %138 = vector.load %arg9[%c0_37, %c24] : memref<32x32xf32, #tpu.memory_space<vmem>>, vector<32x8xf32>
    tpu.vector_store %arg9[%c0_37, %c24], %137 {strides = array<i32>} : memref<32x32xf32, #tpu.memory_space<vmem>>, vector<32x8xf32>,
    %c0_38 = arith.constant 0 : index
    %c0_39 = arith.constant 0 : index
    %139 = vector.load %arg9[%c0_38, %c0_39] : memref<32x32xf32, #tpu.memory_space<vmem>>, vector<32x32xf32>
    %cst_40 = arith.constant dense<0.000000e+00> : vector<32xf32>
    %140 = vector.multi_reduction <add>, %139, %cst_40 [0] : vector<32x32xf32> to vector<32xf32>
    %141 = vector.shape_cast %140 : vector<32xf32> to vector<1x32xf32>
    %cst_41 = arith.constant 3.200000e+01 : f32
    %142 = vector.broadcast %cst_41 : f32 to vector<1x32xf32>
    %143 = arith.divf %141, %142 : vector<1x32xf32>
    %144 = vector.broadcast %143 : vector<1x32xf32> to vector<32x32xf32>
    %145 = arith.subf %139, %144 : vector<32x32xf32>
    %146 = arith.mulf %145, %145 : vector<32x32xf32>
    %cst_42 = arith.constant dense<0.000000e+00> : vector<32xf32>
    %147 = vector.multi_reduction <add>, %146, %cst_42 [0] : vector<32x32xf32> to vector<32xf32>
    %148 = vector.shape_cast %147 : vector<32xf32> to vector<1x32xf32>
    %cst_43 = arith.constant 3.200000e+01 : f32
    %149 = vector.broadcast %cst_43 : f32 to vector<1x32xf32>
    %150 = arith.divf %148, %149 : vector<1x32xf32>
    %151 = vector.broadcast %143 : vector<1x32xf32> to vector<32x32xf32>
    %152 = arith.subf %139, %151 : vector<32x32xf32>
    %cst_44 = arith.constant 9.99999974E-6 : f32
    %153 = vector.broadcast %cst_44 : f32 to vector<1x32xf32>
    %154 = arith.addf %150, %153 : vector<1x32xf32>
    %155 = math.rsqrt %154 : vector<1x32xf32>
    %156 = vector.broadcast %155 : vector<1x32xf32> to vector<32x32xf32>
    %157 = arith.mulf %152, %156 : vector<32x32xf32>
    %cst_45 = arith.constant 0.000000e+00 : f32
    %158 = vector.broadcast %cst_45 : f32 to vector<32x32xf32>
    %159 = arith.cmpf ogt, %157, %158 : vector<32x32xf32>
    %160 = math.exp %157 : vector<32x32xf32>
    %cst_46 = arith.constant 1.000000e+00 : f32
    %161 = vector.broadcast %cst_46 : f32 to vector<32x32xf32>
    %162 = arith.subf %160, %161 : vector<32x32xf32>
    %163 = arith.select %159, %157, %162 : vector<32x32xi1>, vector<32x32xf32>
    %c0_47 = arith.constant 0 : index
    %c0_48 = arith.constant 0 : index
    %164 = vector.load %arg6[%c0_47, %c0_48] : memref<32x204xbf16, #tpu.memory_space<vmem>>, vector<32x204xbf16>
    %c0_49 = arith.constant 0 : index
    %c0_50 = arith.constant 0 : index
    %165 = vector.load %arg7[%c0_49, %c0_50] : memref<1x96xf32, #tpu.memory_space<vmem>>, vector<1x96xf32>
    %166 = arith.truncf %163 : vector<32x32xf32> to vector<32x32xbf16>
    %cst_51 = arith.constant dense<0.000000e+00> : vector<32x204xf32>
    %167 = tpu.matmul %166, %164, %cst_51 {dimension_numbers = #tpu.dot_dimension_numbers<[1], [0], [0], [1], [0, 0, 1, 1], [], []>} : vector<32x32xbf16>, vector<32x204xbf16>, vector<32x204xf32> -> vector<32x204xf32>
    %168 = vector.extract_strided_slice %167 {offsets = [0, 0], sizes = [32, 96], strides = [1, 1]} : vector<32x204xf32> to vector<32x96xf32>
    %169 = vector.extract_strided_slice %167 {offsets = [0, 96], sizes = [32, 96], strides = [1, 1]} : vector<32x204xf32> to vector<32x96xf32>
    %170 = vector.broadcast %165 : vector<1x96xf32> to vector<32x96xf32>
    %171 = arith.addf %169, %170 : vector<32x96xf32>
    %172 = vector.extract_strided_slice %167 {offsets = [0, 192], sizes = [32, 6], strides = [1, 1]} : vector<32x204xf32> to vector<32x6xf32>
    %173 = tpu.transpose %172, [1, 0] : vector<32x6xf32> -> vector<6x32xf32>
    %174 = vector.extract_strided_slice %167 {offsets = [0, 198], sizes = [32, 6], strides = [1, 1]} : vector<32x204xf32> to vector<32x6xf32>
    %175 = arith.truncf %168 : vector<32x96xf32> to vector<32x96xbf16>
    %cst_52 = arith.constant 1.000000e+00 : bf16
    %176 = vector.broadcast %cst_52 : bf16 to vector<32x1xbf16>
    %177 = vector.extract_strided_slice %174 {offsets = [0, 0], sizes = [32, 1], strides = [1, 1]} : vector<32x6xf32> to vector<32x1xf32>
    %178 = vector.extract_strided_slice %173 {offsets = [0, 0], sizes = [1, 32], strides = [1, 1]} : vector<6x32xf32> to vector<1x32xf32>
    %179 = vector.broadcast %177 : vector<32x1xf32> to vector<32x32xf32>
    %180 = vector.broadcast %178 : vector<1x32xf32> to vector<32x32xf32>
    %181 = arith.addf %179, %180 : vector<32x32xf32>
    %cst_53 = arith.constant 0.000000e+00 : f32
    %182 = vector.broadcast %cst_53 : f32 to vector<32x32xf32>
    %183 = arith.cmpf oge, %181, %182 : vector<32x32xf32>
    %cst_54 = arith.constant 2.000000e-01 : f32
    %184 = vector.broadcast %cst_54 : f32 to vector<32x32xf32>
    %185 = arith.mulf %184, %181 : vector<32x32xf32>
    %186 = arith.select %183, %181, %185 : vector<32x32xi1>, vector<32x32xf32>
    %cst_55 = arith.constant dense<0xFF800000> : vector<32xf32>
    %187 = vector.multi_reduction <maximumf>, %186, %cst_55 [1] : vector<32x32xf32> to vector<32xf32>
    %188 = vector.shape_cast %187 : vector<32xf32> to vector<32x1xf32>
    %189 = vector.broadcast %188 : vector<32x1xf32> to vector<32x32xf32>
    %190 = arith.subf %186, %189 : vector<32x32xf32>
    %191 = math.exp %190 : vector<32x32xf32>
    %192 = arith.truncf %191 : vector<32x32xf32> to vector<32x32xbf16>
    %193 = arith.mulf %192, %3 : vector<32x32xbf16>
    %194 = vector.extract_strided_slice %175 {offsets = [0, 0], sizes = [32, 16], strides = [1, 1]} : vector<32x96xbf16> to vector<32x16xbf16>
    %195 = tpu.concatenate %194, %176 in 1 : vector<32x16xbf16>, vector<32x1xbf16> -> vector<32x17xbf16>
    %cst_56 = arith.constant dense<0.000000e+00> : vector<32x17xf32>
    %196 = tpu.matmul %193, %195, %cst_56 {dimension_numbers = #tpu.dot_dimension_numbers<[1], [0], [0], [1], [0, 0, 1, 1], [], []>} : vector<32x32xbf16>, vector<32x17xbf16>, vector<32x17xf32> -> vector<32x17xf32>
    %197 = vector.extract_strided_slice %196 {offsets = [0, 16], sizes = [32, 1], strides = [1, 1]} : vector<32x17xf32> to vector<32x1xf32>
    %cst_57 = arith.constant 9.99999968E-21 : f32
    %198 = vector.broadcast %cst_57 : f32 to vector<32x1xf32>
    %199 = arith.maximumf %197, %198 : vector<32x1xf32>
    %200 = vector.extract_strided_slice %196 {offsets = [0, 0], sizes = [32, 16], strides = [1, 1]} : vector<32x17xf32> to vector<32x16xf32>
    %201 = tpu.reciprocal %199 {approx = true} : vector<32x1xf32> -> vector<32x1xf32>
    %202 = vector.broadcast %201 : vector<32x1xf32> to vector<32x16xf32>
    %203 = arith.mulf %200, %202 : vector<32x16xf32>
    %204 = vector.extract_strided_slice %171 {offsets = [0, 0], sizes = [32, 16], strides = [1, 1]} : vector<32x96xf32> to vector<32x16xf32>
    %205 = arith.addf %203, %204 : vector<32x16xf32>
    %cst_58 = arith.constant 0.000000e+00 : f32
    %206 = vector.broadcast %cst_58 : f32 to vector<32x16xf32>
    %207 = arith.cmpf ogt, %205, %206 : vector<32x16xf32>
    %208 = math.exp %205 : vector<32x16xf32>
    %cst_59 = arith.constant 1.000000e+00 : f32
    %209 = vector.broadcast %cst_59 : f32 to vector<32x16xf32>
    %210 = arith.subf %208, %209 : vector<32x16xf32>
    %211 = arith.select %207, %205, %210 : vector<32x16xi1>, vector<32x16xf32>
    %c0_60 = arith.constant 0 : index
    %c0_61 = arith.constant 0 : index
    %212 = vector.load %arg10[%c0_60, %c0_61] : memref<32x96xf32, #tpu.memory_space<vmem>>, vector<32x16xf32>
    tpu.vector_store %arg10[%c0_60, %c0_61], %211 {strides = array<i32>} : memref<32x96xf32, #tpu.memory_space<vmem>>, vector<32x16xf32>,
    %213 = vector.extract_strided_slice %174 {offsets = [0, 1], sizes = [32, 1], strides = [1, 1]} : vector<32x6xf32> to vector<32x1xf32>
    %214 = vector.extract_strided_slice %173 {offsets = [1, 0], sizes = [1, 32], strides = [1, 1]} : vector<6x32xf32> to vector<1x32xf32>
    %215 = vector.broadcast %213 : vector<32x1xf32> to vector<32x32xf32>
    %216 = vector.broadcast %214 : vector<1x32xf32> to vector<32x32xf32>
    %217 = arith.addf %215, %216 : vector<32x32xf32>
    %cst_62 = arith.constant 0.000000e+00 : f32
    %218 = vector.broadcast %cst_62 : f32 to vector<32x32xf32>
    %219 = arith.cmpf oge, %217, %218 : vector<32x32xf32>
    %cst_63 = arith.constant 2.000000e-01 : f32
    %220 = vector.broadcast %cst_63 : f32 to vector<32x32xf32>
    %221 = arith.mulf %220, %217 : vector<32x32xf32>
    %222 = arith.select %219, %217, %221 : vector<32x32xi1>, vector<32x32xf32>
    %cst_64 = arith.constant dense<0xFF800000> : vector<32xf32>
    %223 = vector.multi_reduction <maximumf>, %222, %cst_64 [1] : vector<32x32xf32> to vector<32xf32>
    %224 = vector.shape_cast %223 : vector<32xf32> to vector<32x1xf32>
    %225 = vector.broadcast %224 : vector<32x1xf32> to vector<32x32xf32>
    %226 = arith.subf %222, %225 : vector<32x32xf32>
    %227 = math.exp %226 : vector<32x32xf32>
    %228 = arith.truncf %227 : vector<32x32xf32> to vector<32x32xbf16>
    %229 = arith.mulf %228, %3 : vector<32x32xbf16>
    %230 = vector.extract_strided_slice %175 {offsets = [0, 16], sizes = [32, 16], strides = [1, 1]} : vector<32x96xbf16> to vector<32x16xbf16>
    %231 = tpu.concatenate %230, %176 in 1 : vector<32x16xbf16>, vector<32x1xbf16> -> vector<32x17xbf16>
    %cst_65 = arith.constant dense<0.000000e+00> : vector<32x17xf32>
    %232 = tpu.matmul %229, %231, %cst_65 {dimension_numbers = #tpu.dot_dimension_numbers<[1], [0], [0], [1], [0, 0, 1, 1], [], []>} : vector<32x32xbf16>, vector<32x17xbf16>, vector<32x17xf32> -> vector<32x17xf32>
    %233 = vector.extract_strided_slice %232 {offsets = [0, 16], sizes = [32, 1], strides = [1, 1]} : vector<32x17xf32> to vector<32x1xf32>
    %cst_66 = arith.constant 9.99999968E-21 : f32
    %234 = vector.broadcast %cst_66 : f32 to vector<32x1xf32>
    %235 = arith.maximumf %233, %234 : vector<32x1xf32>
    %236 = vector.extract_strided_slice %232 {offsets = [0, 0], sizes = [32, 16], strides = [1, 1]} : vector<32x17xf32> to vector<32x16xf32>
    %237 = tpu.reciprocal %235 {approx = true} : vector<32x1xf32> -> vector<32x1xf32>
    %238 = vector.broadcast %237 : vector<32x1xf32> to vector<32x16xf32>
    %239 = arith.mulf %236, %238 : vector<32x16xf32>
    %240 = vector.extract_strided_slice %171 {offsets = [0, 16], sizes = [32, 16], strides = [1, 1]} : vector<32x96xf32> to vector<32x16xf32>
    %241 = arith.addf %239, %240 : vector<32x16xf32>
    %cst_67 = arith.constant 0.000000e+00 : f32
    %242 = vector.broadcast %cst_67 : f32 to vector<32x16xf32>
    %243 = arith.cmpf ogt, %241, %242 : vector<32x16xf32>
    %244 = math.exp %241 : vector<32x16xf32>
    %cst_68 = arith.constant 1.000000e+00 : f32
    %245 = vector.broadcast %cst_68 : f32 to vector<32x16xf32>
    %246 = arith.subf %244, %245 : vector<32x16xf32>
    %247 = arith.select %243, %241, %246 : vector<32x16xi1>, vector<32x16xf32>
    %c0_69 = arith.constant 0 : index
    %c16_70 = arith.constant 16 : index
    %248 = vector.load %arg10[%c0_69, %c16_70] : memref<32x96xf32, #tpu.memory_space<vmem>>, vector<32x16xf32>
    tpu.vector_store %arg10[%c0_69, %c16_70], %247 {strides = array<i32>} : memref<32x96xf32, #tpu.memory_space<vmem>>, vector<32x16xf32>,
    %249 = vector.extract_strided_slice %174 {offsets = [0, 2], sizes = [32, 1], strides = [1, 1]} : vector<32x6xf32> to vector<32x1xf32>
    %250 = vector.extract_strided_slice %173 {offsets = [2, 0], sizes = [1, 32], strides = [1, 1]} : vector<6x32xf32> to vector<1x32xf32>
    %251 = vector.broadcast %249 : vector<32x1xf32> to vector<32x32xf32>
    %252 = vector.broadcast %250 : vector<1x32xf32> to vector<32x32xf32>
    %253 = arith.addf %251, %252 : vector<32x32xf32>
    %cst_71 = arith.constant 0.000000e+00 : f32
    %254 = vector.broadcast %cst_71 : f32 to vector<32x32xf32>
    %255 = arith.cmpf oge, %253, %254 : vector<32x32xf32>
    %cst_72 = arith.constant 2.000000e-01 : f32
    %256 = vector.broadcast %cst_72 : f32 to vector<32x32xf32>
    %257 = arith.mulf %256, %253 : vector<32x32xf32>
    %258 = arith.select %255, %253, %257 : vector<32x32xi1>, vector<32x32xf32>
    %cst_73 = arith.constant dense<0xFF800000> : vector<32xf32>
    %259 = vector.multi_reduction <maximumf>, %258, %cst_73 [1] : vector<32x32xf32> to vector<32xf32>
    %260 = vector.shape_cast %259 : vector<32xf32> to vector<32x1xf32>
    %261 = vector.broadcast %260 : vector<32x1xf32> to vector<32x32xf32>
    %262 = arith.subf %258, %261 : vector<32x32xf32>
    %263 = math.exp %262 : vector<32x32xf32>
    %264 = arith.truncf %263 : vector<32x32xf32> to vector<32x32xbf16>
    %265 = arith.mulf %264, %3 : vector<32x32xbf16>
    %266 = vector.extract_strided_slice %175 {offsets = [0, 32], sizes = [32, 16], strides = [1, 1]} : vector<32x96xbf16> to vector<32x16xbf16>
    %267 = tpu.concatenate %266, %176 in 1 : vector<32x16xbf16>, vector<32x1xbf16> -> vector<32x17xbf16>
    %cst_74 = arith.constant dense<0.000000e+00> : vector<32x17xf32>
    %268 = tpu.matmul %265, %267, %cst_74 {dimension_numbers = #tpu.dot_dimension_numbers<[1], [0], [0], [1], [0, 0, 1, 1], [], []>} : vector<32x32xbf16>, vector<32x17xbf16>, vector<32x17xf32> -> vector<32x17xf32>
    %269 = vector.extract_strided_slice %268 {offsets = [0, 16], sizes = [32, 1], strides = [1, 1]} : vector<32x17xf32> to vector<32x1xf32>
    %cst_75 = arith.constant 9.99999968E-21 : f32
    %270 = vector.broadcast %cst_75 : f32 to vector<32x1xf32>
    %271 = arith.maximumf %269, %270 : vector<32x1xf32>
    %272 = vector.extract_strided_slice %268 {offsets = [0, 0], sizes = [32, 16], strides = [1, 1]} : vector<32x17xf32> to vector<32x16xf32>
    %273 = tpu.reciprocal %271 {approx = true} : vector<32x1xf32> -> vector<32x1xf32>
    %274 = vector.broadcast %273 : vector<32x1xf32> to vector<32x16xf32>
    %275 = arith.mulf %272, %274 : vector<32x16xf32>
    %276 = vector.extract_strided_slice %171 {offsets = [0, 32], sizes = [32, 16], strides = [1, 1]} : vector<32x96xf32> to vector<32x16xf32>
    %277 = arith.addf %275, %276 : vector<32x16xf32>
    %cst_76 = arith.constant 0.000000e+00 : f32
    %278 = vector.broadcast %cst_76 : f32 to vector<32x16xf32>
    %279 = arith.cmpf ogt, %277, %278 : vector<32x16xf32>
    %280 = math.exp %277 : vector<32x16xf32>
    %cst_77 = arith.constant 1.000000e+00 : f32
    %281 = vector.broadcast %cst_77 : f32 to vector<32x16xf32>
    %282 = arith.subf %280, %281 : vector<32x16xf32>
    %283 = arith.select %279, %277, %282 : vector<32x16xi1>, vector<32x16xf32>
    %c0_78 = arith.constant 0 : index
    %c32 = arith.constant 32 : index
    %284 = vector.load %arg10[%c0_78, %c32] : memref<32x96xf32, #tpu.memory_space<vmem>>, vector<32x16xf32>
    tpu.vector_store %arg10[%c0_78, %c32], %283 {strides = array<i32>} : memref<32x96xf32, #tpu.memory_space<vmem>>, vector<32x16xf32>,
    %285 = vector.extract_strided_slice %174 {offsets = [0, 3], sizes = [32, 1], strides = [1, 1]} : vector<32x6xf32> to vector<32x1xf32>
    %286 = vector.extract_strided_slice %173 {offsets = [3, 0], sizes = [1, 32], strides = [1, 1]} : vector<6x32xf32> to vector<1x32xf32>
    %287 = vector.broadcast %285 : vector<32x1xf32> to vector<32x32xf32>
    %288 = vector.broadcast %286 : vector<1x32xf32> to vector<32x32xf32>
    %289 = arith.addf %287, %288 : vector<32x32xf32>
    %cst_79 = arith.constant 0.000000e+00 : f32
    %290 = vector.broadcast %cst_79 : f32 to vector<32x32xf32>
    %291 = arith.cmpf oge, %289, %290 : vector<32x32xf32>
    %cst_80 = arith.constant 2.000000e-01 : f32
    %292 = vector.broadcast %cst_80 : f32 to vector<32x32xf32>
    %293 = arith.mulf %292, %289 : vector<32x32xf32>
    %294 = arith.select %291, %289, %293 : vector<32x32xi1>, vector<32x32xf32>
    %cst_81 = arith.constant dense<0xFF800000> : vector<32xf32>
    %295 = vector.multi_reduction <maximumf>, %294, %cst_81 [1] : vector<32x32xf32> to vector<32xf32>
    %296 = vector.shape_cast %295 : vector<32xf32> to vector<32x1xf32>
    %297 = vector.broadcast %296 : vector<32x1xf32> to vector<32x32xf32>
    %298 = arith.subf %294, %297 : vector<32x32xf32>
    %299 = math.exp %298 : vector<32x32xf32>
    %300 = arith.truncf %299 : vector<32x32xf32> to vector<32x32xbf16>
    %301 = arith.mulf %300, %3 : vector<32x32xbf16>
    %302 = vector.extract_strided_slice %175 {offsets = [0, 48], sizes = [32, 16], strides = [1, 1]} : vector<32x96xbf16> to vector<32x16xbf16>
    %303 = tpu.concatenate %302, %176 in 1 : vector<32x16xbf16>, vector<32x1xbf16> -> vector<32x17xbf16>
    %cst_82 = arith.constant dense<0.000000e+00> : vector<32x17xf32>
    %304 = tpu.matmul %301, %303, %cst_82 {dimension_numbers = #tpu.dot_dimension_numbers<[1], [0], [0], [1], [0, 0, 1, 1], [], []>} : vector<32x32xbf16>, vector<32x17xbf16>, vector<32x17xf32> -> vector<32x17xf32>
    %305 = vector.extract_strided_slice %304 {offsets = [0, 16], sizes = [32, 1], strides = [1, 1]} : vector<32x17xf32> to vector<32x1xf32>
    %cst_83 = arith.constant 9.99999968E-21 : f32
    %306 = vector.broadcast %cst_83 : f32 to vector<32x1xf32>
    %307 = arith.maximumf %305, %306 : vector<32x1xf32>
    %308 = vector.extract_strided_slice %304 {offsets = [0, 0], sizes = [32, 16], strides = [1, 1]} : vector<32x17xf32> to vector<32x16xf32>
    %309 = tpu.reciprocal %307 {approx = true} : vector<32x1xf32> -> vector<32x1xf32>
    %310 = vector.broadcast %309 : vector<32x1xf32> to vector<32x16xf32>
    %311 = arith.mulf %308, %310 : vector<32x16xf32>
    %312 = vector.extract_strided_slice %171 {offsets = [0, 48], sizes = [32, 16], strides = [1, 1]} : vector<32x96xf32> to vector<32x16xf32>
    %313 = arith.addf %311, %312 : vector<32x16xf32>
    %cst_84 = arith.constant 0.000000e+00 : f32
    %314 = vector.broadcast %cst_84 : f32 to vector<32x16xf32>
    %315 = arith.cmpf ogt, %313, %314 : vector<32x16xf32>
    %316 = math.exp %313 : vector<32x16xf32>
    %cst_85 = arith.constant 1.000000e+00 : f32
    %317 = vector.broadcast %cst_85 : f32 to vector<32x16xf32>
    %318 = arith.subf %316, %317 : vector<32x16xf32>
    %319 = arith.select %315, %313, %318 : vector<32x16xi1>, vector<32x16xf32>
    %c0_86 = arith.constant 0 : index
    %c48 = arith.constant 48 : index
    %320 = vector.load %arg10[%c0_86, %c48] : memref<32x96xf32, #tpu.memory_space<vmem>>, vector<32x16xf32>
    tpu.vector_store %arg10[%c0_86, %c48], %319 {strides = array<i32>} : memref<32x96xf32, #tpu.memory_space<vmem>>, vector<32x16xf32>,
    %321 = vector.extract_strided_slice %174 {offsets = [0, 4], sizes = [32, 1], strides = [1, 1]} : vector<32x6xf32> to vector<32x1xf32>
    %322 = vector.extract_strided_slice %173 {offsets = [4, 0], sizes = [1, 32], strides = [1, 1]} : vector<6x32xf32> to vector<1x32xf32>
    %323 = vector.broadcast %321 : vector<32x1xf32> to vector<32x32xf32>
    %324 = vector.broadcast %322 : vector<1x32xf32> to vector<32x32xf32>
    %325 = arith.addf %323, %324 : vector<32x32xf32>
    %cst_87 = arith.constant 0.000000e+00 : f32
    %326 = vector.broadcast %cst_87 : f32 to vector<32x32xf32>
    %327 = arith.cmpf oge, %325, %326 : vector<32x32xf32>
    %cst_88 = arith.constant 2.000000e-01 : f32
    %328 = vector.broadcast %cst_88 : f32 to vector<32x32xf32>
    %329 = arith.mulf %328, %325 : vector<32x32xf32>
    %330 = arith.select %327, %325, %329 : vector<32x32xi1>, vector<32x32xf32>
    %cst_89 = arith.constant dense<0xFF800000> : vector<32xf32>
    %331 = vector.multi_reduction <maximumf>, %330, %cst_89 [1] : vector<32x32xf32> to vector<32xf32>
    %332 = vector.shape_cast %331 : vector<32xf32> to vector<32x1xf32>
    %333 = vector.broadcast %332 : vector<32x1xf32> to vector<32x32xf32>
    %334 = arith.subf %330, %333 : vector<32x32xf32>
    %335 = math.exp %334 : vector<32x32xf32>
    %336 = arith.truncf %335 : vector<32x32xf32> to vector<32x32xbf16>
    %337 = arith.mulf %336, %3 : vector<32x32xbf16>
    %338 = vector.extract_strided_slice %175 {offsets = [0, 64], sizes = [32, 16], strides = [1, 1]} : vector<32x96xbf16> to vector<32x16xbf16>
    %339 = tpu.concatenate %338, %176 in 1 : vector<32x16xbf16>, vector<32x1xbf16> -> vector<32x17xbf16>
    %cst_90 = arith.constant dense<0.000000e+00> : vector<32x17xf32>
    %340 = tpu.matmul %337, %339, %cst_90 {dimension_numbers = #tpu.dot_dimension_numbers<[1], [0], [0], [1], [0, 0, 1, 1], [], []>} : vector<32x32xbf16>, vector<32x17xbf16>, vector<32x17xf32> -> vector<32x17xf32>
    %341 = vector.extract_strided_slice %340 {offsets = [0, 16], sizes = [32, 1], strides = [1, 1]} : vector<32x17xf32> to vector<32x1xf32>
    %cst_91 = arith.constant 9.99999968E-21 : f32
    %342 = vector.broadcast %cst_91 : f32 to vector<32x1xf32>
    %343 = arith.maximumf %341, %342 : vector<32x1xf32>
    %344 = vector.extract_strided_slice %340 {offsets = [0, 0], sizes = [32, 16], strides = [1, 1]} : vector<32x17xf32> to vector<32x16xf32>
    %345 = tpu.reciprocal %343 {approx = true} : vector<32x1xf32> -> vector<32x1xf32>
    %346 = vector.broadcast %345 : vector<32x1xf32> to vector<32x16xf32>
    %347 = arith.mulf %344, %346 : vector<32x16xf32>
    %348 = vector.extract_strided_slice %171 {offsets = [0, 64], sizes = [32, 16], strides = [1, 1]} : vector<32x96xf32> to vector<32x16xf32>
    %349 = arith.addf %347, %348 : vector<32x16xf32>
    %cst_92 = arith.constant 0.000000e+00 : f32
    %350 = vector.broadcast %cst_92 : f32 to vector<32x16xf32>
    %351 = arith.cmpf ogt, %349, %350 : vector<32x16xf32>
    %352 = math.exp %349 : vector<32x16xf32>
    %cst_93 = arith.constant 1.000000e+00 : f32
    %353 = vector.broadcast %cst_93 : f32 to vector<32x16xf32>
    %354 = arith.subf %352, %353 : vector<32x16xf32>
    %355 = arith.select %351, %349, %354 : vector<32x16xi1>, vector<32x16xf32>
    %c0_94 = arith.constant 0 : index
    %c64 = arith.constant 64 : index
    %356 = vector.load %arg10[%c0_94, %c64] : memref<32x96xf32, #tpu.memory_space<vmem>>, vector<32x16xf32>
    tpu.vector_store %arg10[%c0_94, %c64], %355 {strides = array<i32>} : memref<32x96xf32, #tpu.memory_space<vmem>>, vector<32x16xf32>,
    %357 = vector.extract_strided_slice %174 {offsets = [0, 5], sizes = [32, 1], strides = [1, 1]} : vector<32x6xf32> to vector<32x1xf32>
    %358 = vector.extract_strided_slice %173 {offsets = [5, 0], sizes = [1, 32], strides = [1, 1]} : vector<6x32xf32> to vector<1x32xf32>
    %359 = vector.broadcast %357 : vector<32x1xf32> to vector<32x32xf32>
    %360 = vector.broadcast %358 : vector<1x32xf32> to vector<32x32xf32>
    %361 = arith.addf %359, %360 : vector<32x32xf32>
    %cst_95 = arith.constant 0.000000e+00 : f32
    %362 = vector.broadcast %cst_95 : f32 to vector<32x32xf32>
    %363 = arith.cmpf oge, %361, %362 : vector<32x32xf32>
    %cst_96 = arith.constant 2.000000e-01 : f32
    %364 = vector.broadcast %cst_96 : f32 to vector<32x32xf32>
    %365 = arith.mulf %364, %361 : vector<32x32xf32>
    %366 = arith.select %363, %361, %365 : vector<32x32xi1>, vector<32x32xf32>
    %cst_97 = arith.constant dense<0xFF800000> : vector<32xf32>
    %367 = vector.multi_reduction <maximumf>, %366, %cst_97 [1] : vector<32x32xf32> to vector<32xf32>
    %368 = vector.shape_cast %367 : vector<32xf32> to vector<32x1xf32>
    %369 = vector.broadcast %368 : vector<32x1xf32> to vector<32x32xf32>
    %370 = arith.subf %366, %369 : vector<32x32xf32>
    %371 = math.exp %370 : vector<32x32xf32>
    %372 = arith.truncf %371 : vector<32x32xf32> to vector<32x32xbf16>
    %373 = arith.mulf %372, %3 : vector<32x32xbf16>
    %374 = vector.extract_strided_slice %175 {offsets = [0, 80], sizes = [32, 16], strides = [1, 1]} : vector<32x96xbf16> to vector<32x16xbf16>
    %375 = tpu.concatenate %374, %176 in 1 : vector<32x16xbf16>, vector<32x1xbf16> -> vector<32x17xbf16>
    %cst_98 = arith.constant dense<0.000000e+00> : vector<32x17xf32>
    %376 = tpu.matmul %373, %375, %cst_98 {dimension_numbers = #tpu.dot_dimension_numbers<[1], [0], [0], [1], [0, 0, 1, 1], [], []>} : vector<32x32xbf16>, vector<32x17xbf16>, vector<32x17xf32> -> vector<32x17xf32>
    %377 = vector.extract_strided_slice %376 {offsets = [0, 16], sizes = [32, 1], strides = [1, 1]} : vector<32x17xf32> to vector<32x1xf32>
    %cst_99 = arith.constant 9.99999968E-21 : f32
    %378 = vector.broadcast %cst_99 : f32 to vector<32x1xf32>
    %379 = arith.maximumf %377, %378 : vector<32x1xf32>
    %380 = vector.extract_strided_slice %376 {offsets = [0, 0], sizes = [32, 16], strides = [1, 1]} : vector<32x17xf32> to vector<32x16xf32>
    %381 = tpu.reciprocal %379 {approx = true} : vector<32x1xf32> -> vector<32x1xf32>
    %382 = vector.broadcast %381 : vector<32x1xf32> to vector<32x16xf32>
    %383 = arith.mulf %380, %382 : vector<32x16xf32>
    %384 = vector.extract_strided_slice %171 {offsets = [0, 80], sizes = [32, 16], strides = [1, 1]} : vector<32x96xf32> to vector<32x16xf32>
    %385 = arith.addf %383, %384 : vector<32x16xf32>
    %cst_100 = arith.constant 0.000000e+00 : f32
    %386 = vector.broadcast %cst_100 : f32 to vector<32x16xf32>
    %387 = arith.cmpf ogt, %385, %386 : vector<32x16xf32>
    %388 = math.exp %385 : vector<32x16xf32>
    %cst_101 = arith.constant 1.000000e+00 : f32
    %389 = vector.broadcast %cst_101 : f32 to vector<32x16xf32>
    %390 = arith.subf %388, %389 : vector<32x16xf32>
    %391 = arith.select %387, %385, %390 : vector<32x16xi1>, vector<32x16xf32>
    %c0_102 = arith.constant 0 : index
    %c80 = arith.constant 80 : index
    %392 = vector.load %arg10[%c0_102, %c80] : memref<32x96xf32, #tpu.memory_space<vmem>>, vector<32x16xf32>
    tpu.vector_store %arg10[%c0_102, %c80], %391 {strides = array<i32>} : memref<32x96xf32, #tpu.memory_space<vmem>>, vector<32x16xf32>,
    %c0_103 = arith.constant 0 : index
    %c0_104 = arith.constant 0 : index
    %393 = vector.load %arg10[%c0_103, %c0_104] : memref<32x96xf32, #tpu.memory_space<vmem>>, vector<32x96xf32>
    %c0_105 = arith.constant 0 : index
    %c0_106 = arith.constant 0 : index
    %c0_107 = arith.constant 0 : index
    %394 = vector.load %arg8[%c0_105, %c0_106, %c0_107] : memref<1x32x96xf32, #tpu.memory_space<vmem>>, vector<1x32x96xf32>
    %395 = vector.shape_cast %394 : vector<1x32x96xf32> to vector<32x96xf32>
    %396 = vector.shape_cast %393 : vector<32x96xf32> to vector<1x32x96xf32>
    tpu.vector_store %arg8[%c0_105, %c0_106, %c0_107], %396 {strides = array<i32>} : memref<1x32x96xf32, #tpu.memory_space<vmem>>, vector<1x32x96xf32>,
    return
  }
  func.func @transform_0(%arg0: i32) -> (i32, i32, i32) {
    %c0_i32 = arith.constant 0 : i32
    %c0_i32_0 = arith.constant 0 : i32
    %c0_i32_1 = arith.constant 0 : i32
    return %arg0, %c0_i32, %c0_i32_0 : i32, i32, i32
  }
  func.func @transform_1(%arg0: i32) -> (i32, i32, i32) {
    %c0_i32 = arith.constant 0 : i32
    %c0_i32_0 = arith.constant 0 : i32
    %c0_i32_1 = arith.constant 0 : i32
    return %arg0, %c0_i32, %c0_i32_0 : i32, i32, i32
  }
  func.func @transform_2(%arg0: i32) -> (i32, i32, i32) {
    %c0_i32 = arith.constant 0 : i32
    %c0_i32_0 = arith.constant 0 : i32
    %c0_i32_1 = arith.constant 0 : i32
    return %arg0, %c0_i32, %c0_i32_0 : i32, i32, i32
  }
  func.func @transform_3(%arg0: i32) -> (i32, i32) {
    %c0_i32 = arith.constant 0 : i32
    %c0_i32_0 = arith.constant 0 : i32
    %c0_i32_1 = arith.constant 0 : i32
    return %c0_i32, %c0_i32_0 : i32, i32
  }
  func.func @transform_4(%arg0: i32) -> (i32, i32) {
    %c0_i32 = arith.constant 0 : i32
    %c0_i32_0 = arith.constant 0 : i32
    %c0_i32_1 = arith.constant 0 : i32
    return %c0_i32, %c0_i32_0 : i32, i32
  }
  func.func @transform_5(%arg0: i32) -> (i32, i32) {
    %c0_i32 = arith.constant 0 : i32
    %c0_i32_0 = arith.constant 0 : i32
    %c0_i32_1 = arith.constant 0 : i32
    return %c0_i32, %c0_i32_0 : i32, i32
  }
  func.func @transform_6(%arg0: i32) -> (i32, i32) {
    %c0_i32 = arith.constant 0 : i32
    %c0_i32_0 = arith.constant 0 : i32
    %c0_i32_1 = arith.constant 0 : i32
    return %c0_i32, %c0_i32_0 : i32, i32
  }
  func.func @transform_7(%arg0: i32) -> (i32, i32, i32) {
    %c0_i32 = arith.constant 0 : i32
    %c0_i32_0 = arith.constant 0 : i32
    %c0_i32_1 = arith.constant 0 : i32
    return %arg0, %c0_i32, %c0_i32_0 : i32, i32, i32
  }
}

</mosaic_0001>

<bundles_post_ra>
// kernel: tpu_custom_call.1
= control target key start
LH: loop header
LB: loop body
LE: loop exit
PB: predicated region body
PF: predicated region fallthrough
CT: control target
= control target key end

     0   :  { %12 = vsyncpa [#allocation5], 0  ;;  %s4413_s0 = inlined_call_operand.vmem [shape: bf16[2,32,32], index: 0, kind: input, shape index: {}]   ;;  %s4414_s1 = inlined_call_operand.vmem [shape: bf16[2,32,32], index: 1, kind: input, shape index: {}]   ;;  %s4415_s2 = inlined_call_operand.vmem [shape: f32[2,32,16], index: 2, kind: input, shape index: {}]   ;;  %s4416_s3 = inlined_call_operand.hbm [shape: bf16[16,72], index: 3, kind: input, shape index: {}]   ;;  %s4417_s4 = inlined_call_operand.vmem [shape: f32[1,32], index: 4, kind: input, shape index: {}]   ;;  %s4418_s5 = inlined_call_operand.vmem [shape: bf16[32,204], index: 5, kind: input, shape index: {}]   ;;  %s4419_s6 = inlined_call_operand.vmem [shape: f32[1,96], index: 6, kind: input, shape index: {}]   ;;  %s4420_s7 = inlined_call_operand.hbm [shape: f32[2,32,96], index: 7, kind: output, shape index: {}]  }
   0x1   :  { %13 = vsyncpa [#allocation6], 0 }
   0x2   :  { %15 = vsyncpa [#allocation6 + $0x1], 0  ;;  %s3276_s24 = smov 0   ;;  %s3278_s25 = smov 0  }
   0x3   :  { %s3280_s26 = smov 0   ;;  %s3282_s27 = smov 0  }
   0x4 LB: > { %s3297_s28 = sadd.s32 4294967295, %s3206_s27   ;;  %s2646_s29 = sadd.s32 4294967294, %s3206_s27   ;;  %s3206_s27 = sphi %s3282_s27, %s4442_s27   ;;  %s3202_s26 = sphi %s3280_s26, %s4441_s26   ;;  %s3198_s25 = sphi %s3278_s25, %s4440_s25   ;;  %s3194_s24 = sphi %s3276_s24, %s4439_s24  }
   0x5   : > { %s3301_s30 = sadd.s32 1, %s3206_s27   ;;  %s190_s8 = sadd.s32 1, %s3202_s26 }
   0x6   : > { %s187_s9 = ssub.s32 %s3206_s27, %s3301_s30  ;;  %p200_p0 = scmp.ne.s32.totalorder %s3202_s26, %s3198_s25 }
   0x7   : > { %p188_p1 = scmp.eq.s32.totalorder %s187_s9, 0  ;;  %p201_p2 = scmp.eq.s32.totalorder %s3297_s28, 1 }
   0x8   : > { %p206_p3 = scmp.ne.s32.totalorder %s3198_s25, %s3194_s24  ;;  %p207_p4 = scmp.eq.s32.totalorder %s2646_s29, 1 }
   0x9   : > { %s3312_s10 = scalar_select %p188_p1, %s3202_s26, %s190_s8  }
   0xa   : > { %p3314_p5 = por %p201_p2, %p200_p0  ;;  %p3318_p6 = por %p207_p4, %p206_p3 }
   0xb   : > { %p2647_p7 = scmp.ge.s32.totalorder %s3206_s27, 1  ;;  %p214_p8 = scmp.lt.s32.totalorder %s3206_s27, 3 }
   0xc   : > { %p2780_p9 = scmp.eq.s32.totalorder %s3297_s28, 0  ;;  %s225_s15 = sshll.u32 %s4416_s3, 4  ;;  %s226_s15 = int_to_ptr.hbm [resolvable:$true] %s225_s15 }
   0xd   : > { %p215_p10 = pnand %p2647_p7, %p214_p8  ;;  %s3208_s16 = smov [#allocation4]  }
   0xe   : > { %s227_s17 = sshll.u32 %s3208_s16, 4  ;;  %s3209_s18 = smov 64   ;;  %s228_s17 = int_to_ptr.vmem [resolvable:$true] %s227_s17 }
   0xf   : > { %p2772_p11 = pneg %p215_p10  ;;  %s3210_s19 = smov 4  }
  0x10   : > { %276 = sbr.rel (%p215_p10) target bundleno = 2375 (0x947), region = 48 }
  0x11   : > { %p2773_p12 = pnand %p2780_p9, %p2772_p11 }
  0x13   : > { %2775 = dma.hbm_to_vmem [thread:$0]  (!%p2773_p12), %s226_s15, 128, %s228_s17, [#allocation5], %s3209_s18, %s3209_s18, %s3210_s19  }
  0x15   : > { %3185 = dma.done.wait (%p2780_p9), [#allocation5], 128  }
  0x16   : > { %3187 = vsyncadd (%p2780_p9), [#allocation5], 4294967168  ;;  %p319_p13 = scmp.lt.s32.totalorder %s3297_s28, 1  ;;  %v2741_v0 = vld [vmem:[#allocation4] sm:$0xff]  ;;  %vm359_vm0 = vcmask 130048   ;;  %s3211_s13 = smov 32  }
  0x17   : > { %373 = vmatpush.bf16.msra.mxu0 %v2741_v0  ;;  %2765 = vmatpush.bf16.msra.mxu1 %v2741_v0  ;;  %v2888_v7 = vld [vmem:[%s4417_s4] ss:$0 sm:$0xff]  ;;  %v3212_v8 = vmov 68   ;;  %s4427_s14 = smov 64   ;;  %vm532_vm1 = vcmask 64512   ;;  %v3214_v24 = vmov 69  }
  0x18   : > { %s3336_s20 = scalar_select %p319_p13, %s3297_s28, 1  ;;  %387 = vrot.lane.b32.xlu0 %v2888_v7, %s3211_s13  ;;  %2845 = vset.pattern.permute.xlu1 %v3212_v8  ;;  %v3215_v26 = vmov 70   ;;  %v3216_v27 = vmov 71   ;;  %vm479_vm2 = vcmask 261120  }
  0x19   : > { %2844 = vset.pattern.permute.xlu0 %v3212_v8  ;;  %s3217_s15 = smov 120   ;;  %s4425_s16 = smov 112  }
  0x1a   : > { %s2740_s21 = sshll.u32 %s3336_s20, 5  ;;  %s3219_s17 = smov 104  }
  0x1b   : > { %s333_s29 = scalar_lea.vmem %s4415_s2, %s2740_s21  ;;  %s3220_s18 = smov 96  }
  0x1c   : > { %v344_v1 = vld [vmem:[%s333_s29] sm:$0xff]  ;;  %v345_v2 = vld [vmem:[%s333_s29 + $0x8] sm:$0xff]  ;;  %v346_v4 = vld [vmem:[%s333_s29 + $0x10] sm:$0xff]  ;;  %s3221_s19 = smov 88   ;;  %s4423_s21 = smov 80  }
  0x1d   : > { %v351_v3 = vpack.c.bf16 %v345_v2, %v344_v1  ;;  %v347_v5 = vld [vmem:[%s333_s29 + $0x18] sm:$0xff]  ;;  %s4422_s22 = sshll.u32 %s3336_s20, 4  ;;  %s3223_s9 = smov 72  }
  0x1e   : > { %v352_v6 = vpack.c.bf16 %v347_v5, %v346_v4  ;;  %s3527_s8 = scalar_lea.vmem %s4413_s0, %s4422_s22  ;;  %s4434_s22 = smov 64  }
  0x1f   : > { %2663 = vmatmul.msk.bf16.vlgmr.msra.gmra.mxu0 %vm359_vm0, %v351_v3  ;;  %s3233_s23 = smov 48   ;;  %s4437_s29 = sshll.u32 %s3336_s20, 4 }
  0x20   : > { %2664 = vmatmul.msk.bf16.vlgmr.msra.gmra.mxu1 %vm359_vm0, %v352_v6  ;;  %s316_s20 = sand.u32 1, %s3198_s25  }
  0x8a   : > { %v3403_v28 = vpop.permute.xlu0 %387 }
  0x9c   : > { %v3348_v9 = vpop.f32.mrf.mxu0 }
  0x9d   : > { %v3350_v10 = vpop.f32.mrf.mxu1  ;;  %398 = vrot.lane.b32.xlu0 %v3348_v9, %s4427_s14  ;;  %v442_v11 = vpack.c.bf16 %v3348_v9, %v3348_v9 }
  0x9e   : > { %402 = vrot.lane.b32.xlu1 %v3350_v10, %s4427_s14  ;;  %v444_v12 = vpack.c.bf16 %v3350_v10, %v3350_v10 }
  0x9f   : > { %v526_v17 = vunpack.c.l.b16 %v442_v11 }
  0xa0   : > { %v528_v18 = vunpack.c.l.b16 %v444_v12 }
  0xa4   : > { %v3362_v14 = vpop.f32.mrf.mxu0 }
  0xa5   : > { %v3360_v13 = vpop.f32.mrf.mxu1  ;;  %v443_v16 = vpack.c.bf16 %v3362_v14, %v3362_v14  ;;  %447 = vperm.xlu0 %2844, %v3348_v9  }
  0xa6   : > { %455 = vperm.xlu1 %2845, %v3350_v10   ;;  %404 = vrot.lane.b32.xlu2 %v3360_v13, %s4427_s14  ;;  %v445_v15 = vpack.c.bf16 %v3360_v13, %v3360_v13 }
  0xa7   : > { %v527_v20 = vunpack.c.l.b16 %v443_v16 }
  0xa8   : > { %v529_v19 = vunpack.c.l.b16 %v445_v15 }
  0xa9   : > { %v3374_v22 = vpack.c.b16 %v527_v20, %v526_v17 }
  0xaa   : > { %v3372_v21 = vpack.c.b16 %v529_v19, %v528_v18 }
  0xab   : > { %v535_v25 = vsel %vm532_vm1, %v3374_v22, 1065369472 }
  0xac   : > { %v538_v23 = vsel %vm532_vm1, %v3372_v21, 1065369472 }
  0xad   : > { %552 = vmatpush.bf16.msrb.mxu1 %v538_v23  ;;  %2849 = vset.pattern.permute.xlu0 %v3214_v24 }
  0xae   : > { %2846 = vset.pattern.permute.xlu1 %v3214_v24  ;;  %630 = vperm.xlu0 %2849, %v3350_v10  }
  0xaf   : > { %622 = vperm.xlu1 %2846, %v3348_v9  }
  0xb1   : > { %553 = vmatpush.bf16.msrb.mxu1 %v535_v25 }
  0xb6   : > { %2853 = vset.pattern.permute.xlu0 %v3212_v8 }
  0xb7   : > { %2847 = vset.pattern.permute.xlu1 %v3215_v26  ;;  %459 = vperm.xlu0 %2853, %v3360_v13  }
  0xb8   : > { %797 = vperm.xlu1 %2847, %v3348_v9  }
  0xbf   : > { %2855 = vset.pattern.permute.xlu0 %v3215_v26 }
  0xc0   : > { %2848 = vset.pattern.permute.xlu1 %v3216_v27  ;;  %801 = vperm.xlu0 %2855, %v3362_v14  }
  0xc1   : > { %972 = vperm.xlu1 %2848, %v3348_v9  }
  0xc8   : > { %809 = vperm.xlu0 %2855, %v3360_v13  }
  0xc9   : > { %2850 = vset.pattern.permute.xlu1 %v3215_v26 }
  0xca   : > { %805 = vperm.xlu1 %2850, %v3350_v10  }
  0xd2   : > { %2851 = vset.pattern.permute.xlu1 %v3216_v27 }
  0xd3   : > { %980 = vperm.xlu1 %2851, %v3350_v10  }
  0xdb   : > { %400 = vrot.lane.b32.xlu1 %v3362_v14, %s4427_s14  ;;  %s2746_s14 = sshll.u32 %s3297_s28, 5  ;;  %s2533_s28 = scalar_lea.sflag [#allocation6], %s316_s20 }
  0xdc   : > { %2852 = vset.pattern.permute.xlu1 %v3212_v8 }
  0xe3   : > { %451 = vperm.xlu1 %2852, %v3362_v14  }
  0xeb   : > { %2854 = vset.pattern.permute.xlu1 %v3214_v24 }
  0xec   : > { %626 = vperm.xlu1 %2854, %v3362_v14  }
  0xf4   : > { %2856 = vset.pattern.permute.xlu1 %v3216_v27 }
  0xf5   : > { %976 = vperm.xlu1 %2856, %v3362_v14  }
  0xfd   : > { %2857 = vset.pattern.permute.xlu1 %v3214_v24 }
  0xfe   : > { %634 = vperm.xlu1 %2857, %v3360_v13  }
 0x100   : > { %v405_v38 = vpop.permute.xlu2 %404 }
 0x106   : > { %2858 = vset.pattern.permute.xlu1 %v3216_v27 }
 0x107   : > { %984 = vperm.xlu1 %2858, %v3360_v13  }
 0x10f   : > { %v399_v30 = vpop.permute.xlu0 %398 }
 0x110   : > { %v403_v29 = vpop.permute.xlu1 %402  ;;  %410 = vxpose.xlu2.b32.start [1/4] (short) (narrow) %v399_v30, 8 }
 0x117   : > { %v448_v39 = vpop.permute.xlu0 %447 }
 0x118   : > { %v456_v31 = vpop.permute.xlu1 %455 }
 0x120   : > { %v3411_v40 = vpop.permute.xlu0 %630 }
 0x121   : > { %v623_v32 = vpop.permute.xlu1 %622 }
 0x129   : > { %v460_v45 = vpop.permute.xlu0 %459 }
 0x12a   : > { %v3405_v33 = vpop.permute.xlu1 %797 }
 0x132   : > { %v802_v7 = vpop.permute.xlu0 %801 }
 0x133   : > { %v3407_v34 = vpop.permute.xlu1 %972 }
 0x13a   : > { %v810_v20 = vpop.permute.xlu0 %809 }
 0x13c   : > { %v806_v35 = vpop.permute.xlu1 %805 }
 0x145   : > { %v3409_v36 = vpop.permute.xlu1 %980 }
 0x14d   : > { %v401_v37 = vpop.permute.xlu1 %400 }
 0x14e   : > { %411 = vxpose.xlu2.b32.cont [2/4] (short) (narrow) %v401_v37, 8 }
 0x155   : > { %v452_v43 = vpop.permute.xlu1 %451 }
 0x156   : > { %412 = vxpose.xlu2.b32.cont [3/4] (short) (narrow) %v403_v29, 8 }
 0x15e   : > { %413 = vxpose.xlu2.b32.end [4/4] (short) (narrow) %v405_v38, 8  ;;  %v627_v2 = vpop.permute.xlu1 %626 }
 0x167   : > { %v977_v3 = vpop.permute.xlu1 %976 }
 0x170   : > { %v3444_v5 = vpop.permute.xlu1 %634 }
 0x179   : > { %v985_v15 = vpop.permute.xlu1 %984 }
 0x1df   : > { %v426_v41 = vpop.trf.xlu2 }
 0x1e0   : > { %v462_v42 = vperm.slane %v426_v41, 0  ;;  %v3413_v44 = vperm.slane %v426_v41, 1  ;;  %v812_v4 = vperm.slane %v426_v41, 2  ;;  %v3446_v8 = vperm.slane %v426_v41, 3 }
 0x1e2   : > { %v465_v46 = vadd.f32 %v462_v42, %v456_v31  ;;  %v463_v47 = vadd.f32 %v462_v42, %v448_v39  ;;  %v464_v48 = vadd.f32 %v462_v42, %v452_v43  ;;  %v466_v49 = vadd.f32 %v462_v42, %v460_v45 }
 0x1e3   : > { %v638_v53 = vadd.f32 %v3413_v44, %v623_v32  ;;  %v815_v6 = vadd.f32 %v812_v4, %v806_v35  ;;  %v639_v12 = vadd.f32 %v3413_v44, %v627_v2  ;;  %v991_v18 = vadd.f32 %v3446_v8, %v985_v15 }
 0x1e4   : > { %vm469_vm3 = vcmp.ge.f32.partialorder %v465_v46, 0.0  ;;  %v473_v50 = vmul.f32 0.2, %v465_v46  ;;  %vm467_vm4 = vcmp.ge.f32.partialorder %v463_v47, 0.0  ;;  %v471_v51 = vmul.f32 0.2, %v463_v47 }
 0x1e5   : > { %vm468_vm5 = vcmp.ge.f32.partialorder %v464_v48, 0.0  ;;  %v472_v52 = vmul.f32 0.2, %v464_v48  ;;  %v474_v60 = vmul.f32 0.2, %v466_v49  ;;  %vm470_vm6 = vcmp.ge.f32.partialorder %v466_v49, 0.0 }
 0x1e6   : > { %v3416_v54 = vsel %vm469_vm3, %v465_v46, %v473_v50  ;;  %v3418_v55 = vsel %vm467_vm4, %v463_v47, %v471_v51  ;;  %v646_v61 = vmul.f32 0.2, %v638_v53  ;;  %vm642_vm7 = vcmp.ge.f32.partialorder %v638_v53, 0.0 }
 0x1e7   : > { %v486_v56 = vsel %vm479_vm2, %v3416_v54, -inf  ;;  %v480_v57 = vsel %vm479_vm2, %v3418_v55, -inf  ;;  %v3424_v58 = vsel %vm468_vm5, %v464_v48, %v472_v52  ;;  %v3428_v62 = vsel %vm470_vm6, %v466_v49, %v474_v60 }
 0x1e8   : > { %487 = vmax.xlane.f32.xlu2 %v486_v56  ;;  %481 = vmax.xlane.f32.xlu1 %v480_v57  ;;  %v483_v59 = vsel %vm479_vm2, %v3424_v58, -inf  ;;  %v3430_v63 = vsel %vm642_vm7, %v638_v53, %v646_v61  ;;  %v489_v0 = vsel %vm479_vm2, %v3428_v62, -inf  ;;  %v823_v11 = vmul.f32 0.2, %v815_v6 }
 0x1e9   : > { %484 = vmax.xlane.f32.xlu0 %v483_v59  ;;  %v654_v1 = vsel %vm479_vm2, %v3430_v63, -inf  ;;  %vm819_vm8 = vcmp.ge.f32.partialorder %v815_v6, 0.0  ;;  %v647_v17 = vmul.f32 0.2, %v639_v12  ;;  %vm643_vm9 = vcmp.ge.f32.partialorder %v639_v12, 0.0 }
 0x1ea   : > { %v3449_v16 = vsel %vm819_vm8, %v815_v6, %v823_v11  ;;  %v813_v19 = vadd.f32 %v812_v4, %v3405_v33  ;;  %v999_v24 = vmul.f32 0.2, %v991_v18  ;;  %v816_v25 = vadd.f32 %v812_v4, %v810_v20  ;;  %v2748_v11 = vld [vmem:[%s3527_s8] sm:$0xff]  }
 0x1eb   : > { %v3455_v23 = vsel %vm643_vm9, %v639_v12, %v647_v17  ;;  %vm995_vm10 = vcmp.ge.f32.partialorder %v991_v18, 0.0  ;;  %v814_v35 = vadd.f32 %v812_v4, %v802_v7  ;;  %v988_v45 = vadd.f32 %v3446_v8, %v3407_v34 }
 0x1ec   : > { %v821_v29 = vmul.f32 0.2, %v813_v19  ;;  %v657_v30 = vsel %vm479_vm2, %v3455_v23, -inf  ;;  %vm817_vm11 = vcmp.ge.f32.partialorder %v813_v19, 0.0  ;;  %v3459_v31 = vsel %vm995_vm10, %v991_v18, %v999_v24 }
 0x1ed   : > { %v824_v32 = vmul.f32 0.2, %v816_v25  ;;  %vm820_vm12 = vcmp.ge.f32.partialorder %v816_v25, 0.0  ;;  %v1013_v37 = vsel %vm479_vm2, %v3459_v31, -inf  ;;  %v822_v41 = vmul.f32 0.2, %v814_v35 }
 0x1ee   : > { %v3461_v33 = vsel %vm817_vm11, %v813_v19, %v821_v29  ;;  %vm818_vm13 = vcmp.ge.f32.partialorder %v814_v35, 0.0  ;;  %v996_v47 = vmul.f32 0.2, %v988_v45  ;;  %vm992_vm14 = vcmp.ge.f32.partialorder %v988_v45, 0.0 }
 0x1ef   : > { %v3465_v38 = vsel %vm820_vm12, %v816_v25, %v824_v32  ;;  %v829_v39 = vsel %vm479_vm2, %v3461_v33, -inf  ;;  %v3471_v43 = vsel %vm818_vm13, %v814_v35, %v822_v41  ;;  %v989_v49 = vadd.f32 %v3446_v8, %v977_v3 }
 0x1f0   : > { %490 = vmax.xlane.f32.xlu1 %v489_v0  ;;  %v838_v42 = vsel %vm479_vm2, %v3465_v38, -inf  ;;  %v832_v46 = vsel %vm479_vm2, %v3471_v43, -inf  ;;  %v3477_v48 = vsel %vm992_vm14, %v988_v45, %v996_v47  ;;  %v3484_v51 = vadd.f32 %v3403_v28, %v3350_v10 }
 0x1f1   : > { %655 = vmax.xlane.f32.xlu0 %v654_v1  ;;  %v1004_v50 = vsel %vm479_vm2, %v3477_v48, -inf  ;;  %v997_v52 = vmul.f32 0.2, %v989_v49  ;;  %vm993_vm15 = vcmp.ge.f32.partialorder %v989_v49, 0.0  ;;  %v640_v53 = vadd.f32 %v3413_v44, %v3411_v40 }
 0x1f2   : > { %v641_v59 = vadd.f32 %v3413_v44, %v3444_v5  ;;  %v391_v60 = vadd.f32 %v3403_v28, %v3362_v14  ;;  %v3508_v0 = vadd.f32 %v3403_v28, %v3348_v9  ;;  %v990_v9 = vadd.f32 %v3446_v8, %v3409_v36 }
 0x1f3   : > { %v3488_v34 = vsel %vm993_vm15, %v989_v49, %v997_v52  ;;  %v648_v57 = vmul.f32 0.2, %v640_v53  ;;  %vm644_vm3 = vcmp.ge.f32.partialorder %v640_v53, 0.0  ;;  %v3536_v20 = vunpack.c.h.bf16 %v2748_v11  ;;  %v2763_v49 = vld [vmem:[%s3527_s8 + $0x8] sm:$0xff]  }
 0x1f4   : > { %v1007_v56 = vsel %vm479_vm2, %v3488_v34, -inf  ;;  %v649_v61 = vmul.f32 0.2, %v641_v59  ;;  %vm645_vm4 = vcmp.ge.f32.partialorder %v641_v59, 0.0  ;;  %v998_v7 = vmul.f32 0.2, %v990_v9 }
 0x1f5   : > { %v3498_v10 = vsel %vm644_vm3, %v640_v53, %v648_v57  ;;  %vm994_vm5 = vcmp.ge.f32.partialorder %v990_v9, 0.0  ;;  %v3540_v25 = vunpack.c.l.bf16 %v2748_v11  ;;  %v3544_v29 = vadd.f32 %v3403_v28, %v3360_v13 }
 0x1f6   : > { %v660_v40 = vsel %vm479_vm2, %v3498_v10, -inf  ;;  %v3515_v3 = vsel %vm645_vm4, %v641_v59, %v649_v61  ;;  %v3534_v12 = vsel %vm994_vm5, %v990_v9, %v998_v7  ;;  %v3554_v53 = vunpack.c.h.bf16 %v2763_v49 }
 0x1f7   : > { %v663_v6 = vsel %vm479_vm2, %v3515_v3, -inf  ;;  %v1010_v24 = vsel %vm479_vm2, %v3534_v12, -inf  ;;  %v3557_v59 = vunpack.c.l.bf16 %v2763_v49  ;;  %vm966_vm6 = vcmask 195712  }
 0x1f8   : > { %vm1141_vm7 = vcmask 261312  }
 0x200   : > { %692 = vrot.lane.b32.xlu2 %v3374_v22, %s3217_s15 }
 0x205   : > { %694 = vrot.lane.b32.xlu0 %v3372_v21, %s3217_s15  ;;  %s4421_s15 = smov 8  }
 0x208   : > { %867 = vrot.lane.b32.xlu2 %v3374_v22, %s4425_s16 }
 0x209   : > { %869 = vrot.lane.b32.xlu1 %v3372_v21, %s4425_s16 }
 0x210   : > { %1044 = vrot.lane.b32.xlu2 %v3372_v21, %s3219_s17  ;;  %v835_v21 = vsel %vm479_vm2, %v3449_v16, -inf }
 0x22f   : > { %836 = vmax.xlane.f32.xlu0 %v835_v21 }
 0x233   : > { %658 = vmax.xlane.f32.xlu1 %v657_v30 }
 0x237   : > { %1014 = vmax.xlane.f32.xlu0 %v1013_v37 }
 0x239   : > { %830 = vmax.xlane.f32.xlu2 %v829_v39 }
 0x23b   : > { %839 = vmax.xlane.f32.xlu1 %v838_v42 }
 0x241   : > { %833 = vmax.xlane.f32.xlu2 %v832_v46 }
 0x249   : > { %1005 = vmax.xlane.f32.xlu2 %v1004_v50 }
 0x24b   : > { %605 = vrot.lane.b32.xlu0 %v3484_v51, %s3220_s18 }
 0x251   : > { %1008 = vmax.xlane.f32.xlu2 %v1007_v56 }
 0x253   : > { %763 = vrot.lane.b32.xlu0 %v3484_v51, %s3221_s19 }
 0x254   : > { %1042 = vrot.lane.b32.xlu1 %v3374_v22, %s3219_s17  ;;  %s4429_s17 = smov 16  }
 0x259   : > { %661 = vmax.xlane.f32.xlu2 %v660_v40 }
 0x25b   : > { %936 = vrot.lane.b32.xlu0 %v391_v60, %s4423_s21  ;;  %v488_v22 = vpop.xlane.xlu2 %487  ;;  %v482_v44 = vpop.xlane.xlu1 %481 }
 0x25c   : > { %v485_v1 = vpop.xlane.xlu0 %484  ;;  %v492_v2 = vsub.f32 %v3418_v55, %v482_v44  ;;  %601 = vrot.lane.b32.xlu1 %v3508_v0, %s3220_s18 }
 0x25d   : > { %v493_v14 = vsub.f32 %v3424_v58, %v485_v1  ;;  %v494_v58 = vsub.f32 %v3416_v54, %v488_v22 }
 0x25e   : > { %v496_v4 = vmul.f32 1.442695, %v492_v2 }
 0x25f   : > { %v498_v5 = vmul.f32 1.442695, %v493_v14  ;;  %v500_v19 = vmul.f32 1.442695, %v494_v58 }
 0x261   : > { %2890 = vpow2.f32 %v498_v5  ;;  %664 = vmax.xlane.f32.xlu2 %v663_v6 }
 0x262   : > { %2892 = vpow2.f32 %v496_v4 }
 0x263   : > { %1111 = vrot.lane.b32.xlu0 %v391_v60, %s3223_s9  ;;  %v491_v36 = vpop.xlane.xlu1 %490  ;;  %v693_v55 = vpop.permute.xlu2 %692 }
 0x264   : > { %v495_v8 = vsub.f32 %v3428_v62, %v491_v36  ;;  %603 = vrot.lane.b32.xlu1 %v391_v60, %s3220_s18  ;;  %v656_v39 = vpop.xlane.xlu0 %655 }
 0x265   : > { %v666_v14 = vsub.f32 %v3430_v63, %v656_v39 }
 0x266   : > { %v502_v15 = vmul.f32 1.442695, %v495_v8 }
 0x267   : > { %v2891_v17 = vpop.eup %2890  ;;  %v670_v9 = vmul.f32 1.442695, %v666_v14 }
 0x268   : > { %v2893_v18 = vpop.eup %2892  ;;  %v505_v21 = vpack.c.bf16 %v2891_v17, %v2891_v17  ;;  %2894 = vpow2.f32 %v502_v15 }
 0x269   : > { %v504_v54 = vpack.c.bf16 %v2893_v18, %v2893_v18  ;;  %1011 = vmax.xlane.f32.xlu2 %v1010_v24  ;;  %2896 = vpow2.f32 %v500_v19 }
 0x26a   : > { %v509_v62 = vunpack.c.l.bf16 %v505_v21  ;;  %2898 = vpow2.f32 %v670_v9 }
 0x26b   : > { %v508_v30 = vunpack.c.l.bf16 %v504_v54  ;;  %v868_v32 = vpop.permute.xlu2 %867 }
 0x26c   : > { %v517_v35 = vmul.f32 %v3536_v20, %v509_v62  ;;  %607 = vrot.lane.b32.xlu1 %v3544_v29, %s3220_s18  ;;  %v872_v2 = vsel %vm532_vm1, %v868_v32, 1065369472 }
 0x26d   : > { %v516_v37 = vmul.f32 %v3540_v25, %v508_v30 }
 0x26e   : > { %v2895_v42 = vpop.eup %2894 }
 0x26f   : > { %v520_v41 = vpack.c.bf16 %v517_v35, %v516_v37  ;;  %v2897_v45 = vpop.eup %2896  ;;  %v507_v46 = vpack.c.bf16 %v2895_v42, %v2895_v42 }
 0x270   : > { %v506_v47 = vpack.c.bf16 %v2897_v45, %v2897_v45  ;;  %v2899_v7 = vpop.eup %2898 }
 0x271   : > { %2665 = vmatmul.msk.bf16.vlgmr.msrb.gmra.mxu1 %vm479_vm2, %v520_v41  ;;  %v511_v50 = vunpack.c.l.bf16 %v507_v46 }
 0x272   : > { %v510_v57 = vunpack.c.l.bf16 %v506_v47 }
 0x273   : > { %v1045_v13 = vpop.permute.xlu2 %1044  ;;  %v519_v61 = vmul.f32 %v3554_v53, %v511_v50 }
 0x274   : > { %761 = vrot.lane.b32.xlu1 %v391_v60, %s3221_s19  ;;  %v1050_v28 = vsel %vm532_vm1, %v1045_v13, 1065369472  ;;  %v697_v60 = vsel %vm532_vm1, %v693_v55, 1065369472  ;;  %v518_v44 = vmul.f32 %v3557_v59, %v510_v57 }
 0x275   : > { %1064 = vmatpush.bf16.msrb.mxu0 %v1050_v28 }
 0x276   : > { %v521_v1 = vpack.c.bf16 %v519_v61, %v518_v44 }
 0x277   : > { %v695_v52 = vpop.permute.xlu0 %694 }
 0x278   : > { %v700_v56 = vsel %vm532_vm1, %v695_v52, 1065369472 }
 0x279   : > { %714 = vmatpush.bf16.msra.mxu2 %v700_v56 }
 0x27b   : > { %v870_v40 = vpop.permute.xlu1 %869 }
 0x27c   : > { %934 = vrot.lane.b32.xlu1 %v3508_v0, %s4423_s21  ;;  %v875_v22 = vsel %vm532_vm1, %v870_v40, 1065369472 }
 0x27d   : > { %715 = vmatpush.bf16.msra.mxu2 %v697_v60  ;;  %889 = vmatpush.bf16.msra.mxu3 %v875_v22 }
 0x281   : > { %2666 = vmatmul.msk.bf16.gmra.mxu1 %vm479_vm2, %v521_v1  ;;  %759 = vrot.lane.b32.xlu2 %v3508_v0, %s3221_s19 }
 0x282   : > { %890 = vmatpush.bf16.msra.mxu3 %v872_v2 }
 0x284   : > { %1109 = vrot.lane.b32.xlu1 %v3508_v0, %s3223_s9  ;;  %v678_v0 = vpack.c.bf16 %v2899_v7, %v2899_v7 }
 0x286   : > { %v682_v11 = vunpack.c.l.bf16 %v678_v0 }
 0x288   : > { %v686_v21 = vmul.f32 %v3540_v25, %v682_v11 }
 0x289   : > { %765 = vrot.lane.b32.xlu2 %v3544_v29, %s3221_s19  ;;  %s3227_s19 = smov 24  }
 0x28c   : > { %938 = vrot.lane.b32.xlu1 %v3484_v51, %s4423_s21 }
 0x2a2   : > { %v837_v24 = vpop.xlane.xlu0 %836 }
 0x2a3   : > { %v843_v32 = vsub.f32 %v3449_v16, %v837_v24 }
 0x2a5   : > { %v849_v41 = vmul.f32 1.442695, %v843_v32 }
 0x2a6   : > { %v659_v4 = vpop.xlane.xlu1 %658 }
 0x2a7   : > { %v667_v5 = vsub.f32 %v3455_v23, %v659_v4 }
 0x2a9   : > { %v672_v6 = vmul.f32 1.442695, %v667_v5 }
 0x2aa   : > { %v1015_v5 = vpop.xlane.xlu0 %1014 }
 0x2ab   : > { %2900 = vpow2.f32 %v672_v6  ;;  %v1019_v0 = vsub.f32 %v3459_v31, %v1015_v5  ;;  %v3224_v31 = vmov 8  }
 0x2ac   : > { %v831_v36 = vpop.xlane.xlu2 %830  ;;  %2859 = vset.pattern.permute.xlu0 %v3224_v31  ;;  %2861 = vset.pattern.permute.xlu2 %v3224_v31 }
 0x2ad   : > { %v841_v55 = vsub.f32 %v3461_v33, %v831_v36  ;;  %2860 = vset.pattern.permute.xlu1 %v3224_v31 }
 0x2ae   : > { %v840_v19 = vpop.xlane.xlu1 %839 }
 0x2af   : > { %v845_v58 = vmul.f32 1.442695, %v841_v55  ;;  %v844_v33 = vsub.f32 %v3465_v38, %v840_v19 }
 0x2b1   : > { %v2901_v8 = vpop.eup %2900  ;;  %2902 = vpow2.f32 %v845_v58  ;;  %v851_v39 = vmul.f32 1.442695, %v844_v33 }
 0x2b2   : > { %v679_v15 = vpack.c.bf16 %v2901_v8, %v2901_v8 }
 0x2b4   : > { %v683_v17 = vunpack.c.l.bf16 %v679_v15  ;;  %v834_v18 = vpop.xlane.xlu2 %833 }
 0x2b5   : > { %v842_v63 = vsub.f32 %v3471_v43, %v834_v18 }
 0x2b6   : > { %v687_v23 = vmul.f32 %v3536_v20, %v683_v17 }
 0x2b7   : > { %v847_v54 = vmul.f32 1.442695, %v842_v63  ;;  %v2903_v30 = vpop.eup %2902  ;;  %v1026_v63 = vmul.f32 1.442695, %v1019_v0 }
 0x2b8   : > { %v690_v62 = vpack.c.bf16 %v687_v23, %v686_v21  ;;  %v853_v35 = vpack.c.bf16 %v2903_v30, %v2903_v30 }
 0x2b9   : > { %2904 = vpow2.f32 %v847_v54 }
 0x2ba   : > { %2667 = vmatmul.msk.bf16.vlgmr.msra.gmra.mxu2 %vm479_vm2, %v690_v62  ;;  %v857_v46 = vunpack.c.l.bf16 %v853_v35  ;;  %2906 = vpow2.f32 %v851_v39 }
 0x2bb   : > { %2908 = vpow2.f32 %v849_v41 }
 0x2bc   : > { %v1006_v37 = vpop.xlane.xlu2 %1005  ;;  %v861_v47 = vmul.f32 %v3540_v25, %v857_v46 }
 0x2bd   : > { %v1016_v43 = vsub.f32 %v3477_v48, %v1006_v37 }
 0x2bf   : > { %v2905_v42 = vpop.eup %2904  ;;  %v1020_v45 = vmul.f32 1.442695, %v1016_v43 }
 0x2c0   : > { %v854_v13 = vpack.c.bf16 %v2905_v42, %v2905_v42  ;;  %v2907_v56 = vpop.eup %2906 }
 0x2c1   : > { %2910 = vpow2.f32 %v1020_v45  ;;  %v2909_v40 = vpop.eup %2908  ;;  %v856_v60 = vpack.c.bf16 %v2907_v56, %v2907_v56 }
 0x2c2   : > { %v858_v28 = vunpack.c.l.bf16 %v854_v13  ;;  %v855_v22 = vpack.c.bf16 %v2909_v40, %v2909_v40 }
 0x2c3   : > { %v860_v14 = vunpack.c.l.bf16 %v856_v60 }
 0x2c4   : > { %v1009_v38 = vpop.xlane.xlu2 %1008  ;;  %v862_v16 = vmul.f32 %v3536_v20, %v858_v28  ;;  %v859_v4 = vunpack.c.l.bf16 %v855_v22 }
 0x2c5   : > { %v1017_v49 = vsub.f32 %v3488_v34, %v1009_v38  ;;  %v864_v55 = vmul.f32 %v3554_v53, %v860_v14 }
 0x2c6   : > { %v1043_v50 = vpop.permute.xlu1 %1042  ;;  %v865_v52 = vpack.c.bf16 %v862_v16, %v861_v47 }
 0x2c7   : > { %v1022_v48 = vmul.f32 1.442695, %v1017_v49  ;;  %v1047_v57 = vsel %vm532_vm1, %v1043_v50, 1065369472  ;;  %v2911_v61 = vpop.eup %2910  ;;  %v3609_v50 = vpop.permute.xlu0 %605 }
 0x2c8   : > { %2669 = vmatmul.msk.bf16.vlgmr.msra.gmra.mxu3 %vm479_vm2, %v865_v52  ;;  %1065 = vmatpush.bf16.msrb.mxu0 %v1047_v57  ;;  %v1028_v44 = vpack.c.bf16 %v2911_v61, %v2911_v61 }
 0x2c9   : > { %2912 = vpow2.f32 %v1022_v48 }
 0x2ca   : > { %v1032_v6 = vunpack.c.l.bf16 %v1028_v44 }
 0x2cc   : > { %v662_v1 = vpop.xlane.xlu2 %661  ;;  %v1036_v58 = vmul.f32 %v3540_v25, %v1032_v6 }
 0x2cd   : > { %v668_v2 = vsub.f32 %v3498_v10, %v662_v1  ;;  %v863_v10 = vmul.f32 %v3557_v59, %v859_v4 }
 0x2cf   : > { %v2913_v34 = vpop.eup %2912  ;;  %v674_v9 = vmul.f32 1.442695, %v668_v2  ;;  %v866_v17 = vpack.c.bf16 %v864_v55, %v863_v10  ;;  %v3617_v40 = vpop.permute.xlu0 %763 }
 0x2d0   : > { %v1029_v7 = vpack.c.bf16 %v2913_v34, %v2913_v34 }
 0x2d1   : > { %2914 = vpow2.f32 %v674_v9 }
 0x2d2   : > { %v1033_v36 = vunpack.c.l.bf16 %v1029_v7 }
 0x2d4   : > { %v1037_v8 = vmul.f32 %v3536_v20, %v1033_v36  ;;  %v665_v11 = vpop.xlane.xlu2 %664 }
 0x2d5   : > { %v669_v15 = vsub.f32 %v3515_v3, %v665_v11 }
 0x2d6   : > { %v1040_v18 = vpack.c.bf16 %v1037_v8, %v1036_v58 }
 0x2d7   : > { %v676_v19 = vmul.f32 1.442695, %v669_v15  ;;  %v2915_v21 = vpop.eup %2914  ;;  %v3628_v34 = vpop.permute.xlu0 %936 }
 0x2d8   : > { %2670 = vmatmul.msk.bf16.gmra.mxu3 %vm479_vm2, %v866_v17  ;;  %2671 = vmatmul.msk.bf16.vlgmr.msrb.gmra.mxu0 %vm479_vm2, %v1040_v18  ;;  %v680_v20 = vpack.c.bf16 %v2915_v21, %v2915_v21  ;;  %v602_v17 = vpop.permute.xlu1 %601 }
 0x2d9   : > { %2916 = vpow2.f32 %v676_v19 }
 0x2da   : > { %2918 = vpow2.f32 %v1026_v63  ;;  %v684_v54 = vunpack.c.l.bf16 %v680_v20 }
 0x2dc   : > { %v1012_v25 = vpop.xlane.xlu2 %1011  ;;  %v688_v35 = vmul.f32 %v3557_v59, %v684_v54 }
 0x2dd   : > { %v1018_v23 = vsub.f32 %v3534_v12, %v1012_v25 }
 0x2df   : > { %v2917_v3 = vpop.eup %2916  ;;  %v1024_v24 = vmul.f32 1.442695, %v1018_v23  ;;  %v3636_v0 = vpop.permute.xlu0 %1111 }
 0x2e0   : > { %v681_v62 = vpack.c.bf16 %v2917_v3, %v2917_v3  ;;  %v2919_v30 = vpop.eup %2918 }
 0x2e1   : > { %2920 = vpow2.f32 %v1024_v24  ;;  %v1031_v32 = vpack.c.bf16 %v2919_v30, %v2919_v30 }
 0x2e2   : > { %v685_v33 = vunpack.c.l.bf16 %v681_v62 }
 0x2e3   : > { %v1035_v41 = vunpack.c.l.bf16 %v1031_v32 }
 0x2e4   : > { %v689_v37 = vmul.f32 %v3554_v53, %v685_v33 }
 0x2e5   : > { %v1039_v46 = vmul.f32 %v3554_v53, %v1035_v41 }
 0x2e6   : > { %v691_v39 = vpack.c.bf16 %v689_v37, %v688_v35 }
 0x2e7   : > { %v2921_v43 = vpop.eup %2920 }
 0x2e8   : > { %v1030_v42 = vpack.c.bf16 %v2921_v43, %v2921_v43  ;;  %2668 = vmatmul.msk.bf16.gmra.mxu2 %vm479_vm2, %v691_v39 }
 0x2ea   : > { %v1034_v45 = vunpack.c.l.bf16 %v1030_v42 }
 0x2ec   : > { %v1038_v12 = vmul.f32 %v3557_v59, %v1034_v45  ;;  %v604_v45 = vpop.permute.xlu1 %603 }
 0x2ee   : > { %v555_v13 = vpop.f32.mrf.mxu1  ;;  %v1041_v28 = vpack.c.bf16 %v1039_v46, %v1038_v12  ;;  %v760_v46 = vpop.permute.xlu2 %759 }
 0x2ef   : > { %v565_v38 = vmax.f32 %v555_v13, 1e-20 }
 0x2f0   : > { %2672 = vmatmul.msk.bf16.gmra.mxu0 %vm479_vm2, %v1041_v28 }
 0x2f1   : > { %2922 = vrcp.f32 %v565_v38 }
 0x2f4   : > { %v608_v12 = vpop.permute.xlu1 %607 }
 0x2f6   : > { %v3619_v61 = vpop.f32.mrf.mxu1  ;;  %v3667_v28 = vpop.permute.xlu2 %765 }
 0x2f7   : > { %v2923_v47 = vpop.eup %2922  ;;  %v566_v60 = vmax.f32 %v3619_v61, 1e-20 }
 0x2f8   : > { %575 = vperm.xlu0 %2859, %v2923_v47  }
 0x2fe   : > { %v3630_v9 = vpop.f32.mrf.mxu1 }
 0x2ff   : > { %v567_v5 = vmax.f32 %v3630_v9, 1e-20 }
 0x306   : > { %v3651_v54 = vpop.f32.mrf.mxu1 }
 0x307   : > { %v568_v30 = vmax.f32 %v3651_v54, 1e-20 }
 0x33d   : > { %v3606_v16 = vpop.f32.mrf.mxu2 }
 0x33e   : > { %v727_v49 = vmax.f32 %v3606_v16, 1e-20 }
 0x340   : > { %2924 = vrcp.f32 %v727_v49 }
 0x345   : > { %v3611_v52 = vpop.f32.mrf.mxu2 }
 0x346   : > { %v2925_v59 = vpop.eup %2924  ;;  %v728_v53 = vmax.f32 %v3611_v52, 1e-20 }
 0x347   : > { %737 = vperm.xlu0 %2859, %v2925_v59  }
 0x348   : > { %2926 = vrcp.f32 %v728_v53 }
 0x34b   : > { %v3614_v56 = vpop.f32.mrf.mxu3 }
 0x34c   : > { %v902_v48 = vmax.f32 %v3614_v56, 1e-20 }
 0x34e   : > { %v2927_v57 = vpop.eup %2926  ;;  %2928 = vrcp.f32 %v902_v48 }
 0x34f   : > { %742 = vperm.xlu2 %2861, %v2927_v57   ;;  %2930 = vrcp.f32 %v566_v60 }
 0x353   : > { %v3622_v22 = vpop.f32.mrf.mxu3 }
 0x354   : > { %v2929_v44 = vpop.eup %2928  ;;  %v903_v1 = vmax.f32 %v3622_v22, 1e-20 }
 0x355   : > { %v3625_v2 = vpop.f32.mrf.mxu0  ;;  %912 = vperm.xlu0 %2859, %v2929_v44   ;;  %v2931_v4 = vpop.eup %2930 }
 0x356   : > { %2932 = vrcp.f32 %v903_v1  ;;  %v1077_v14 = vmax.f32 %v3625_v2, 1e-20 }
 0x358   : > { %2934 = vrcp.f32 %v1077_v14 }
 0x359   : > { %2936 = vrcp.f32 %v567_v5 }
 0x35b   : > { %v3645_v31 = vpop.f32.mrf.mxu3 }
 0x35c   : > { %v2933_v6 = vpop.eup %2932  ;;  %v904_v20 = vmax.f32 %v3645_v31, 1e-20 }
 0x35d   : > { %v3633_v7 = vpop.f32.mrf.mxu0  ;;  %917 = vperm.xlu2 %2861, %v2933_v6   ;;  %580 = vperm.xlu0 %2859, %v2931_v4  }
 0x35e   : > { %v2935_v36 = vpop.eup %2934  ;;  %v1078_v55 = vmax.f32 %v3633_v7, 1e-20 }
 0x35f   : > { %1087 = vperm.xlu1 %2860, %v2935_v36   ;;  %v2937_v58 = vpop.eup %2936 }
 0x360   : > { %2938 = vrcp.f32 %v1078_v55 }
 0x363   : > { %v3659_v37 = vpop.f32.mrf.mxu3 }
 0x364   : > { %v905_v39 = vmax.f32 %v3659_v37, 1e-20 }
 0x366   : > { %v2939_v8 = vpop.eup %2938 }
 0x367   : > { %1092 = vperm.xlu0 %2859, %v2939_v8   ;;  %585 = vperm.xlu1 %2860, %v2937_v58  }
 0x36a   : > { %v576_v11 = vpop.permute.xlu0 %575 }
 0x36b   : > { %v593_v10 = vmul.f32 %v576_v11, %v555_v13  ;;  %v3638_v15 = vpop.f32.mrf.mxu2  ;;  %v762_v13 = vpop.permute.xlu1 %761 }
 0x36c   : > { %v729_v18 = vmax.f32 %v3638_v15, 1e-20 }
 0x36d   : > { %v613_v63 = vadd.f32 %v602_v17, %v593_v10  ;;  %v3641_v19 = vpop.f32.mrf.mxu0 }
 0x36e   : > { %2940 = vrcp.f32 %v729_v18  ;;  %v1079_v21 = vmax.f32 %v3641_v19, 1e-20 }
 0x36f   : > { %617 = vst.msk [vmem:[#allocation2] sm:$0xff] %vm532_vm1, %v613_v63 }
 0x370   : > { %2942 = vrcp.f32 %v1079_v21 }
 0x371   : > { %2944 = vrcp.f32 %v904_v20 }
 0x373   : > { %v3653_v62 = vpop.f32.mrf.mxu2  ;;  %v935_v38 = vpop.permute.xlu1 %934 }
 0x374   : > { %v2941_v25 = vpop.eup %2940  ;;  %v730_v33 = vmax.f32 %v3653_v62, 1e-20 }
 0x375   : > { %v3648_v23 = vpop.f32.mrf.mxu0  ;;  %747 = vperm.xlu1 %2860, %v2941_v25  }
 0x376   : > { %v2943_v3 = vpop.eup %2942  ;;  %v1080_v24 = vmax.f32 %v3648_v23, 1e-20 }
 0x377   : > { %1097 = vperm.xlu2 %2861, %v2943_v3   ;;  %v2945_v32 = vpop.eup %2944 }
 0x378   : > { %2946 = vrcp.f32 %v1080_v24 }
 0x379   : > { %2948 = vrcp.f32 %v568_v30 }
 0x37a   : > { %2950 = vrcp.f32 %v730_v33 }
 0x37b   : > { %2952 = vrcp.f32 %v905_v39 }
 0x37d   : > { %940 = vrot.lane.b32.xlu1 %v3544_v29, %s4423_s21  ;;  %s4433_s21 = smov 16  }
 0x37e   : > { %v2947_v35 = vpop.eup %2946 }
 0x37f   : > { %922 = vperm.xlu2 %2861, %v2945_v32   ;;  %1102 = vperm.xlu0 %2859, %v2947_v35   ;;  %v2949_v43 = vpop.eup %2948 }
 0x380   : > { %v2951_v41 = vpop.eup %2950 }
 0x381   : > { %v2953_v42 = vpop.eup %2952 }
 0x387   : > { %752 = vperm.xlu0 %2859, %v2951_v41   ;;  %590 = vperm.xlu2 %2861, %v2949_v43  }
 0x38f   : > { %1115 = vrot.lane.b32.xlu0 %v3544_v29, %s3223_s9  ;;  %927 = vperm.xlu2 %2861, %v2953_v42   ;;  %v1110_v29 = vpop.permute.xlu1 %1109 }
 0x390   : > { %2862 = vset.pattern.permute.xlu0 %v3215_v26 }
 0x397   : > { %1113 = vrot.lane.b32.xlu2 %v3484_v51, %s3223_s9  ;;  %v939_v1 = vpop.permute.xlu1 %938  ;;  %s4095_s9 = scalar_lea.vmem %s4414_s1, %s4437_s29 }
 0x3a9   : > { %v743_v47 = vpop.permute.xlu2 %742 }
 0x3b7   : > { %v918_v48 = vpop.permute.xlu2 %917 }
 0x3b8   : > { %v931_v57 = vmul.f32 %v918_v48, %v3622_v22  ;;  %v2742_v48 = vld [vmem:[%s4418_s5 + $0x4] sm:$0xf] }
 0x3b9   : > { %v738_v49 = vpop.permute.xlu0 %737 }
 0x3ba   : > { %v755_v59 = vmul.f32 %v738_v49, %v3606_v16  ;;  %v947_v51 = vadd.f32 %v3628_v34, %v931_v57  ;;  %v2679_v49 = vld [vmem:[%s4418_s5] sm:$0xf] }
 0x3bc   : > { %v771_v53 = vadd.f32 %v760_v46, %v755_v59  ;;  %v2687_v46 = vld [vmem:[%s4418_s5 + $0x10] sm:$0xf]  ;;  %v2743_v59 = vld [vmem:[%s4418_s5 + $0x4] sm:$0xf0] }
 0x3bd   : > { %v2680_v57 = vor.u32 %v2743_v59, %v2679_v49 }
 0x3be   : > { %779 = vrot.lane.b32.xlu1 %v771_v53, %s4421_s15 }
 0x3c6   : > { %956 = vrot.lane.b32.xlu1 %v947_v51, %s4429_s17 }
 0x3c7   : > { %v913_v60 = vpop.permute.xlu0 %912 }
 0x3c8   : > { %v930_v44 = vmul.f32 %v913_v60, %v3614_v56  ;;  %v756_v56 = vmul.f32 %v743_v47, %v3611_v52  ;;  %v2689_v47 = vld [vmem:[%s4418_s5 + $0x18] sm:$0xf0] }
 0x3ca   : > { %v946_v14 = vadd.f32 %v935_v38, %v930_v44  ;;  %v772_v17 = vadd.f32 %v762_v13, %v756_v56  ;;  %v2745_v13 = vld [vmem:[%s4418_s5 + $0x14] sm:$0xf0] }
 0x3cb   : > { %v2688_v38 = vor.u32 %v2745_v13, %v2687_v46 }
 0x3cc   : > { %954 = vrot.lane.b32.xlu2 %v946_v14, %s4429_s17  ;;  %v3228_v14 = vmov 32.0  }
 0x3cd   : > { %1267 = vmatpush.bf16.msra.mxu1 %v2688_v38  ;;  %2954 = vrcp.f32 %v3228_v14 }
 0x3cf   : > { %v581_v16 = vpop.permute.xlu0 %580 }
 0x3d0   : > { %v594_v4 = vmul.f32 %v581_v16, %v3619_v61 }
 0x3d1   : > { %v1088_v5 = vpop.permute.xlu1 %1087  ;;  %v1098_v6 = vpop.permute.xlu2 %1097  ;;  %1268 = vmatpush.bf16.msra.mxu1 %v2680_v57 }
 0x3d2   : > { %v614_v36 = vadd.f32 %v604_v45, %v594_v4  ;;  %v1105_v22 = vmul.f32 %v1088_v5, %v3625_v2  ;;  %v1107_v25 = vmul.f32 %v1098_v6, %v3641_v19 }
 0x3d3   : > { %v2955_v5 = vpop.eup %2954 }
 0x3d4   : > { %618 = vst.msk [vmem:[#allocation2 + $0x8] sm:$0xff] %vm532_vm1, %v614_v36  ;;  %v1121_v34 = vadd.f32 %v1110_v29, %v1105_v22  ;;  %v2681_v29 = vld [vmem:[%s4418_s5 + $0x8] sm:$0xf0]  ;;  %vm1168_vm8 = vweird.f32 %v2955_v5 }
 0x3d5   : > { %v2684_v51 = vor.u32 %v2742_v48, %v2681_v29 }
 0x3d6   : > { %1129 = vrot.lane.b32.xlu0 %v1121_v34, %s3227_s19 }
 0x3d9   : > { %v923_v55 = vpop.permute.xlu2 %922  ;;  %v1093_v58 = vpop.permute.xlu0 %1092 }
 0x3da   : > { %v932_v8 = vmul.f32 %v923_v55, %v3645_v31  ;;  %v1106_v11 = vmul.f32 %v1093_v58, %v3633_v7  ;;  %v586_v61 = vpop.permute.xlu1 %585  ;;  %v1164_v55 = vmul.f32 32.0, %v2955_v5 }
 0x3db   : > { %v595_v10 = vmul.f32 %v586_v61, %v3630_v9 }
 0x3dc   : > { %v948_v18 = vadd.f32 %v939_v1, %v932_v8  ;;  %v1122_v2 = vadd.f32 %v3636_v0, %v1106_v11 }
 0x3dd   : > { %v615_v63 = vadd.f32 %v3609_v50, %v595_v10  ;;  %v1165_v10 = vsub.f32 1.0, %v1164_v55 }
 0x3de   : > { %781 = vrot.lane.b32.xlu0 %v772_v17, %s4421_s15  ;;  %958 = vrot.lane.b32.xlu1 %v948_v18, %s4429_s17 }
 0x3df   : > { %619 = vst.msk [vmem:[#allocation2 + $0x10] sm:$0xff] %vm532_vm1, %v615_v63  ;;  %1131 = vrot.lane.b32.xlu2 %v1122_v2, %s3227_s19  ;;  %v1166_v2 = vmul.f32 %v2955_v5, %v1165_v10 }
 0x3e1   : > { %v591_v52 = vpop.permute.xlu2 %590 }
 0x3e2   : > { %v596_v7 = vmul.f32 %v591_v52, %v3651_v54 }
 0x3e4   : > { %v616_v21 = vadd.f32 %v608_v12, %v596_v7  ;;  %v1167_v7 = vadd.f32 %v2955_v5, %v1166_v2  ;;  %v3229_v2 = vmov 73  }
 0x3e5   : > { %2865 = vset.pattern.permute.xlu1 %v3229_v2 }
 0x3e6   : > { %620 = vst.msk [vmem:[#allocation2 + $0x18] sm:$0xff] %vm532_vm1, %v616_v21  ;;  %vm791_vm1 = vcmask 130112  }
 0x3e7   : > { %v748_v9 = vpop.permute.xlu1 %747 }
 0x3e8   : > { %v757_v31 = vmul.f32 %v748_v9, %v3638_v15 }
 0x3e9   : > { %v928_v0 = vpop.permute.xlu2 %927 }
 0x3ea   : > { %v773_v50 = vadd.f32 %v3617_v40, %v757_v31  ;;  %v933_v3 = vmul.f32 %v928_v0, %v3659_v37  ;;  %v1169_v31 = vsel %vm1168_vm8, %v2955_v5, %v1167_v7 }
 0x3ec   : > { %783 = vrot.lane.b32.xlu2 %v773_v50, %s4421_s15 }
 0x3ef   : > { %v941_v20 = vpop.permute.xlu1 %940 }
 0x3f0   : > { %v949_v33 = vadd.f32 %v941_v20, %v933_v3 }
 0x3f1   : > { %v1103_v24 = vpop.permute.xlu0 %1102  ;;  %v1114_v30 = vpop.permute.xlu2 %1113 }
 0x3f2   : > { %v1123_v54 = vadd.f32 %v1114_v30, %v1107_v25  ;;  %v1108_v19 = vmul.f32 %v1103_v24, %v3648_v23 }
 0x3f4   : > { %960 = vrot.lane.b32.xlu2 %v949_v33, %s4429_s17  ;;  %1133 = vrot.lane.b32.xlu0 %v1123_v54, %s3227_s19  ;;  %s4435_s17 = smov 112  }
 0x3f9   : > { %v753_v32 = vpop.permute.xlu0 %752 }
 0x3fa   : > { %v758_v15 = vmul.f32 %v753_v32, %v3653_v62 }
 0x3fc   : > { %v774_v40 = vadd.f32 %v3667_v28, %v758_v15  ;;  %v2744_v28 = vld [vmem:[%s4418_s5 + $0x14] sm:$0xf] }
 0x3fd   : > { %v2692_v53 = vor.u32 %v2744_v28, %v2689_v47  ;;  %v2889_v28 = vld [vmem:[%s4419_s6] ss:$0 sm:$0xff] }
 0x3fe   : > { %785 = vrot.lane.b32.xlu1 %v774_v40, %s4421_s15  ;;  %1301 = vrot.lane.b32.xlu0 %v2889_v28, %s3220_s18 }
 0x3ff   : > { %1286 = vmatpush.bf16.msrb.mxu2 %v2692_v53 }
 0x401   : > { %v1116_v35 = vpop.permute.xlu0 %1115 }
 0x402   : > { %v1124_v39 = vadd.f32 %v1116_v35, %v1108_v19 }
 0x403   : > { %1287 = vmatpush.bf16.msrb.mxu2 %v2684_v51 }
 0x406   : > { %1135 = vrot.lane.b32.xlu1 %v1124_v39, %s3227_s19  ;;  %s4436_s19 = smov 80  }
 0x426   : > { %v955_v43 = vpop.permute.xlu2 %954 }
 0x430   : > { %v780_v37 = vpop.permute.xlu1 %779 }
 0x431   : > { %792 = vst.msk [vmem:[#allocation2] sm:$0xff] %vm791_vm1, %v780_v37 }
 0x432   : > { %967 = vst.msk [vmem:[#allocation2] sm:$0xff] %vm966_vm6, %v955_v43 }
 0x438   : > { %v957_v45 = vpop.permute.xlu1 %956 }
 0x439   : > { %v1132_v41 = vpop.permute.xlu2 %1131 }
 0x446   : > { %v784_v62 = vpop.permute.xlu2 %783 }
 0x447   : > { %794 = vst.msk [vmem:[#allocation2 + $0x10] sm:$0xff] %vm791_vm1, %v784_v62 }
 0x448   : > { %v1130_v42 = vpop.permute.xlu0 %1129 }
 0x449   : > { %1142 = vst.msk [vmem:[#allocation2] sm:$0xff] %vm1141_vm7, %v1130_v42 }
 0x44e   : > { %v961_v1 = vpop.permute.xlu2 %960 }
 0x450   : > { %v782_v23 = vpop.permute.xlu0 %781  ;;  %v959_v12 = vpop.permute.xlu1 %958  ;;  %v1146_v6 = vld [vmem:[#allocation2] sm:$0xff] }
 0x451   : > { %793 = vst.msk [vmem:[#allocation2 + $0x8] sm:$0xff] %vm791_vm1, %v782_v23  ;;  %v1150_v34 = vsel %vm479_vm2, %v1146_v6, 0.0 }
 0x452   : > { %968 = vst.msk [vmem:[#allocation2 + $0x8] sm:$0xff] %vm966_vm6, %v957_v45 }
 0x453   : > { %1143 = vst.msk [vmem:[#allocation2 + $0x8] sm:$0xff] %vm1141_vm7, %v1132_v41 }
 0x454   : > { %969 = vst.msk [vmem:[#allocation2 + $0x10] sm:$0xff] %vm966_vm6, %v959_v12 }
 0x45a   : > { %v1147_v4 = vld [vmem:[#allocation2 + $0x8] sm:$0xff] }
 0x45b   : > { %v1151_v22 = vsel %vm479_vm2, %v1147_v4, 0.0 }
 0x45c   : > { %v1152_v58 = vadd.f32 %v1151_v22, %v1150_v34 }
 0x466   : > { %v1134_v60 = vpop.permute.xlu0 %1133 }
 0x467   : > { %1144 = vst.msk [vmem:[#allocation2 + $0x10] sm:$0xff] %vm1141_vm7, %v1134_v60 }
 0x46e   : > { %v1148_v36 = vld [vmem:[#allocation2 + $0x10] sm:$0xff] }
 0x46f   : > { %v1153_v56 = vsel %vm479_vm2, %v1148_v36, 0.0 }
 0x470   : > { %v786_v44 = vpop.permute.xlu1 %785  ;;  %v1154_v11 = vadd.f32 %v1153_v56, %v1152_v58 }
 0x471   : > { %795 = vst.msk [vmem:[#allocation2 + $0x18] sm:$0xff] %vm791_vm1, %v786_v44 }
 0x472   : > { %970 = vst.msk [vmem:[#allocation2 + $0x18] sm:$0xff] %vm966_vm6, %v961_v1 }
 0x478   : > { %v1136_v16 = vpop.permute.xlu1 %1135 }
 0x479   : > { %1145 = vst.msk [vmem:[#allocation2 + $0x18] sm:$0xff] %vm1141_vm7, %v1136_v16 }
 0x480   : > { %v1149_v8 = vld [vmem:[#allocation2 + $0x18] sm:$0xff] }
 0x481   : > { %v1155_v61 = vsel %vm479_vm2, %v1149_v8, 0.0 }
 0x482   : > { %v1156_v17 = vadd.f32 %v1155_v61, %v1154_v11 }
 0x484   : > { %v1157_v18 = vrot.slane %v1156_v17, 4 }
 0x486   : > { %v1158_v63 = vadd.f32 %v1157_v18, %v1156_v17 }
 0x488   : > { %v1159_v52 = vrot.slane %v1158_v63, 2 }
 0x48a   : > { %v1160_v21 = vadd.f32 %v1159_v52, %v1158_v63  ;;  %v3757_v63 = vpop.permute.xlu0 %1301  ;;  %v3230_v52 = vmov 72  }
 0x48b   : > { %2864 = vset.pattern.permute.xlu2 %v3230_v52 }
 0x48c   : > { %v1161_v9 = vrot.slane %v1160_v21, 1 }
 0x48e   : > { %v1162_v0 = vadd.f32 %v1161_v9, %v1160_v21 }
 0x490   : > { %v1170_v50 = vmul.f32 %v1169_v31, %v1162_v0  ;;  %v3231_v0 = vmov 74  }
 0x492   : > { %v1171_v20 = vsub.f32 %v1146_v6, %v1170_v50  ;;  %v1172_v25 = vsub.f32 %v1147_v4, %v1170_v50  ;;  %v1173_v3 = vsub.f32 %v1148_v36, %v1170_v50  ;;  %v1174_v24 = vsub.f32 %v1149_v8, %v1170_v50 }
 0x494   : > { %v1175_v30 = vmul.f32 %v1171_v20, %v1171_v20  ;;  %v1176_v33 = vmul.f32 %v1172_v25, %v1172_v25  ;;  %v1177_v54 = vmul.f32 %v1173_v3, %v1173_v3  ;;  %v1178_v32 = vmul.f32 %v1174_v24, %v1174_v24 }
 0x496   : > { %v1179_v15 = vsel %vm479_vm2, %v1175_v30, 0.0  ;;  %v1180_v40 = vsel %vm479_vm2, %v1176_v33, 0.0  ;;  %v1182_v19 = vsel %vm479_vm2, %v1177_v54, 0.0  ;;  %v1184_v37 = vsel %vm479_vm2, %v1178_v32, 0.0 }
 0x497   : > { %v1181_v35 = vadd.f32 %v1180_v40, %v1179_v15 }
 0x499   : > { %v1183_v39 = vadd.f32 %v1182_v19, %v1181_v35 }
 0x49b   : > { %v1185_v43 = vadd.f32 %v1184_v37, %v1183_v39 }
 0x49d   : > { %v1186_v41 = vrot.slane %v1185_v43, 4 }
 0x49f   : > { %v1187_v62 = vadd.f32 %v1186_v41, %v1185_v43  ;;  %v3232_v43 = vmov 75  }
 0x4a1   : > { %v1188_v42 = vrot.slane %v1187_v62, 2 }
 0x4a3   : > { %v1189_v45 = vadd.f32 %v1188_v42, %v1187_v62 }
 0x4a5   : > { %v1190_v23 = vrot.slane %v1189_v45, 1 }
 0x4a7   : > { %v1191_v12 = vadd.f32 %v1190_v23, %v1189_v45 }
 0x4a9   : > { %v1192_v46 = vmul.f32 %v1191_v12, %v1169_v31 }
 0x4ab   : > { %v1193_v13 = vadd.f32 1e-05, %v1192_v46 }
 0x4ad   : > { %2956 = vrsqrt.f32 %v1193_v13  ;;  %vm1200_vm10 = vweird.f32 %v1193_v13 }
 0x4b3   : > { %v2957_v38 = vpop.eup %2956 }
 0x4b4   : > { %v1195_v47 = vmul.f32 %v2957_v38, %v1193_v13  ;;  %vm1201_vm9 = vweird.f32 %v2957_v38 }
 0x4b5   : > { %vm1202_vm11 = vmor %vm1200_vm10, %vm1201_vm9 }
 0x4b6   : > { %v1196_v49 = vmul.f32 %v2957_v38, %v1195_v47 }
 0x4b8   : > { %v1197_v59 = vmul.f32 0.5, %v1196_v49 }
 0x4ba   : > { %v1198_v53 = vsub.f32 1.5, %v1197_v59 }
 0x4bc   : > { %v1199_v48 = vmul.f32 %v2957_v38, %v1198_v53 }
 0x4be   : > { %v1203_v29 = vsel %vm1202_vm11, %v2957_v38, %v1199_v48 }
 0x4bf   : > { %v1204_v57 = vmul.f32 %v1203_v29, %v1171_v20  ;;  %v1205_v51 = vmul.f32 %v1203_v29, %v1172_v25  ;;  %v1206_v1 = vmul.f32 %v1203_v29, %v1173_v3  ;;  %v1207_v14 = vmul.f32 %v1203_v29, %v1174_v24 }
 0x4c1   : > { %v1212_v60 = vmul.f32 1.442695, %v1204_v57  ;;  %v1214_v44 = vmul.f32 1.442695, %v1205_v51  ;;  %v1216_v4 = vmul.f32 1.442695, %v1206_v1 }
 0x4c2   : > { %v1218_v36 = vmul.f32 1.442695, %v1207_v14  ;;  %vm1208_vm12 = vcmp.gt.f32.partialorder %v1204_v57, 0.0  ;;  %vm1209_vm13 = vcmp.gt.f32.partialorder %v1205_v51, 0.0  ;;  %vm1210_vm14 = vcmp.gt.f32.partialorder %v1206_v1, 0.0 }
 0x4c3   : > { %2958 = vpow2.f32 %v1212_v60  ;;  %vm1211_vm15 = vcmp.gt.f32.partialorder %v1207_v14, 0.0 }
 0x4c4   : > { %2960 = vpow2.f32 %v1214_v44 }
 0x4c5   : > { %2962 = vpow2.f32 %v1216_v4 }
 0x4c6   : > { %2964 = vpow2.f32 %v1218_v36 }
 0x4c9   : > { %v2959_v16 = vpop.eup %2958 }
 0x4ca   : > { %v2961_v5 = vpop.eup %2960  ;;  %v2673_v6 = vadd.f32 -1.0, %v2959_v16 }
 0x4cb   : > { %v2674_v22 = vadd.f32 -1.0, %v2961_v5  ;;  %v2963_v58 = vpop.eup %2962 }
 0x4cc   : > { %v1224_v34 = vsel %vm1208_vm12, %v1204_v57, %v2673_v6  ;;  %v2965_v8 = vpop.eup %2964  ;;  %v2675_v11 = vadd.f32 -1.0, %v2963_v58 }
 0x4cd   : > { %v1225_v56 = vsel %vm1209_vm13, %v1205_v51, %v2674_v22  ;;  %v2676_v61 = vadd.f32 -1.0, %v2965_v8 }
 0x4ce   : > { %v1233_v55 = vpack.c.bf16 %v1225_v56, %v1224_v34  ;;  %v1226_v10 = vsel %vm1210_vm14, %v1206_v1, %v2675_v11 }
 0x4cf   : > { %v1227_v17 = vsel %vm1211_vm15, %v1207_v14, %v2676_v61 }
 0x4d0   : > { %2693 = vmatmul.msk.bf16.vlgmr.msra.gmra.mxu1 %vm479_vm2, %v1233_v55  ;;  %2695 = vmatmul.msk.bf16.vlgmr.msrb.gmra.mxu2 %vm479_vm2, %v1233_v55  ;;  %v1234_v18 = vpack.c.bf16 %v1227_v17, %v1226_v10 }
 0x4e0   : > { %2694 = vmatmul.msk.bf16.gmra.mxu1 %vm479_vm2, %v1234_v18  ;;  %2696 = vmatmul.msk.bf16.gmra.mxu2 %vm479_vm2, %v1234_v18 }
 0x54d   : > { %v1270_v7 = vpop.f32.mrf.mxu1 }
 0x54e   : > { %v1304_v21 = vadd.f32 %v3757_v63, %v1270_v7  ;;  %v1360_v30 = vpack.c.bf16 %v1270_v7, %v1270_v7 }
 0x550   : > { %1516 = vrot.lane.b32.xlu2 %v1304_v21, %s3211_s13  ;;  %v1443_v35 = vunpack.c.l.b16 %v1360_v30 }
 0x553   : > { %v3762_v9 = vpop.f32.mrf.mxu2 }
 0x554   : > { %1935 = vperm.xlu1 %2865, %v3762_v9   ;;  %1365 = vperm.xlu0 %2862, %v3762_v9  }
 0x555   : > { %v1272_v31 = vpop.f32.mrf.mxu1 }
 0x556   : > { %v1306_v20 = vadd.f32 %v3757_v63, %v1272_v31  ;;  %v1361_v25 = vpack.c.bf16 %v1272_v31, %v1272_v31 }
 0x558   : > { %1694 = vrot.lane.b32.xlu2 %v1304_v21, %s4433_s21  ;;  %v1444_v32 = vunpack.c.l.b16 %v1361_v25 }
 0x55a   : > { %v3784_v39 = vpack.c.b16 %v1444_v32, %v1443_v35 }
 0x55b   : > { %v3774_v3 = vpop.f32.mrf.mxu2 }
 0x55c   : > { %2866 = vset.pattern.permute.xlu1 %v3231_v0  ;;  %2863 = vset.pattern.permute.xlu0 %v3216_v27  ;;  %v1450_v41 = vsel %vm359_vm0, %v3784_v39, 1065369472 }
 0x55d   : > { %2134 = vperm.xlu1 %2866, %v3762_v9   ;;  %1557 = vperm.xlu0 %2863, %v3762_v9   ;;  %v1275_v50 = vpop.f32.mrf.mxu1 }
 0x55e   : > { %v1362_v24 = vpack.c.bf16 %v1275_v50, %v1275_v50  ;;  %v1308_v42 = vadd.f32 %v3757_v63, %v1275_v50 }
 0x560   : > { %1316 = vrot.lane.b32.xlu2 %v3762_v9, %s4434_s22  ;;  %v1445_v15 = vunpack.c.l.b16 %v1362_v24 }
 0x563   : > { %v3798_v62 = vpop.f32.mrf.mxu2 }
 0x565   : > { %1318 = vrot.lane.b32.xlu1 %v3774_v3, %s4434_s22  ;;  %1696 = vrot.lane.b32.xlu0 %v1306_v20, %s4433_s21  ;;  %v1277_v33 = vpop.f32.mrf.mxu1 }
 0x566   : > { %v1363_v54 = vpack.c.bf16 %v1277_v33, %v1277_v33  ;;  %2870 = vset.pattern.permute.xlu1 %v3230_v52  ;;  %2872 = vset.pattern.permute.xlu0 %v3231_v0  ;;  %v1310_v45 = vadd.f32 %v3757_v63, %v1277_v33 }
 0x568   : > { %v1446_v40 = vunpack.c.l.b16 %v1363_v54  ;;  %1752 = vperm.xlu2 %2864, %v3762_v9  }
 0x56a   : > { %v3782_v19 = vpack.c.b16 %v1446_v40, %v1445_v15 }
 0x56b   : > { %v3812_v23 = vpop.f32.mrf.mxu2 }
 0x56c   : > { %v1453_v37 = vsel %vm359_vm0, %v3782_v19, 1065369472 }
 0x56d   : > { %1756 = vperm.xlu1 %2870, %v3774_v3   ;;  %1627 = vrot.lane.b32.xlu0 %v3784_v39, %s4435_s17 }
 0x56e   : > { %1467 = vmatpush.bf16.msrb.mxu3 %v1453_v37 }
 0x570   : > { %2867 = vset.pattern.permute.xlu2 %v3232_v43 }
 0x571   : > { %2329 = vperm.xlu2 %2867, %v3762_v9  }
 0x572   : > { %1468 = vmatpush.bf16.msrb.mxu3 %v1450_v41 }
 0x575   : > { %2873 = vset.pattern.permute.xlu1 %v3232_v43  ;;  %2138 = vperm.xlu0 %2872, %v3774_v3  }
 0x576   : > { %2333 = vperm.xlu1 %2873, %v3774_v3  }
 0x579   : > { %1518 = vrot.lane.b32.xlu2 %v1306_v20, %s3211_s13 }
 0x57a   : > { %2868 = vset.pattern.permute.xlu2 %v3215_v26 }
 0x57d   : > { %2005 = vrot.lane.b32.xlu0 %v3784_v39, %s4436_s19 }
 0x57e   : > { %2337 = vperm.xlu1 %2873, %v3798_v62   ;;  %2876 = vset.pattern.permute.xlu0 %v3230_v52 }
 0x581   : > { %1369 = vperm.xlu2 %2868, %v3774_v3  }
 0x585   : > { %1520 = vrot.lane.b32.xlu0 %v1308_v42, %s3211_s13 }
 0x586   : > { %1700 = vrot.lane.b32.xlu1 %v1310_v45, %s4433_s21 }
 0x587   : > { %2882 = vset.pattern.permute.xlu1 %v3229_v2 }
 0x589   : > { %2869 = vset.pattern.permute.xlu2 %v3216_v27 }
 0x58a   : > { %1561 = vperm.xlu2 %2869, %v3774_v3  }
 0x58d   : > { %1320 = vrot.lane.b32.xlu0 %v3798_v62, %s4434_s22 }
 0x58e   : > { %1947 = vperm.xlu1 %2882, %v3812_v23  }
 0x592   : > { %2871 = vset.pattern.permute.xlu2 %v3229_v2 }
 0x593   : > { %1939 = vperm.xlu2 %2871, %v3774_v3  }
 0x595   : > { %1760 = vperm.xlu0 %2876, %v3798_v62  }
 0x596   : > { %2206 = vrot.lane.b32.xlu1 %v3782_v19, %s4434_s22 }
 0x59b   : > { %2204 = vrot.lane.b32.xlu2 %v3784_v39, %s4434_s22 }
 0x59c   : > { %2874 = vset.pattern.permute.xlu2 %v3215_v26 }
 0x59d   : > { %2878 = vset.pattern.permute.xlu0 %v3231_v0 }
 0x59e   : > { %2142 = vperm.xlu0 %2878, %v3798_v62  }
 0x5a3   : > { %1698 = vrot.lane.b32.xlu2 %v1308_v42, %s4433_s21 }
 0x5a6   : > { %2879 = vset.pattern.permute.xlu0 %v3215_v26 }
 0x5a7   : > { %1377 = vperm.xlu0 %2879, %v3812_v23  }
 0x5aa   : > { %v3830_v12 = vpop.permute.xlu2 %1516 }
 0x5ab   : > { %1373 = vperm.xlu2 %2874, %v3798_v62  }
 0x5af   : > { %2880 = vset.pattern.permute.xlu0 %v3216_v27 }
 0x5b0   : > { %1569 = vperm.xlu0 %2880, %v3812_v23  }
 0x5b2   : > { %v3835_v46 = vpop.permute.xlu2 %1694 }
 0x5b3   : > { %2875 = vset.pattern.permute.xlu2 %v3216_v27 }
 0x5b4   : > { %1565 = vperm.xlu2 %2875, %v3798_v62  }
 0x5b8   : > { %2884 = vset.pattern.permute.xlu0 %v3232_v43 }
 0x5b9   : > { %2341 = vperm.xlu0 %2884, %v3812_v23  }
 0x5ba   : > { %v1317_v26 = vpop.permute.xlu2 %1316 }
 0x5bc   : > { %2877 = vset.pattern.permute.xlu2 %v3229_v2 }
 0x5bd   : > { %1943 = vperm.xlu2 %2877, %v3798_v62  }
 0x5c1   : > { %2007 = vrot.lane.b32.xlu0 %v3782_v19, %s4436_s19 }
 0x5c2   : > { %v3844_v13 = vpop.permute.xlu2 %1752 }
 0x5c5   : > { %1522 = vrot.lane.b32.xlu2 %v1310_v45, %s3211_s13 }
 0x5c6   : > { %v3847_v28 = vpop.permute.xlu1 %1935  ;;  %v3849_v27 = vpop.permute.xlu0 %1365  ;;  %2881 = vset.pattern.permute.xlu2 %v3230_v52 }
 0x5cb   : > { %v3852_v38 = vpop.permute.xlu2 %2329  ;;  %1328 = vxpose.xlu1.b32.start [1/4] (short) (narrow) %v1317_v26, 8 }
 0x5cd   : > { %1322 = vrot.lane.b32.xlu2 %v3812_v23, %s4434_s22 }
 0x5cf   : > { %v3856_v47 = vpop.permute.xlu1 %2134  ;;  %v3858_v49 = vpop.permute.xlu0 %1557 }
 0x5d3   : > { %v3860_v59 = vpop.permute.xlu2 %1518 }
 0x5d5   : > { %1629 = vrot.lane.b32.xlu2 %v3782_v19, %s4435_s17 }
 0x5d7   : > { %v1319_v53 = vpop.permute.xlu1 %1318  ;;  %v3864_v48 = vpop.permute.xlu0 %1696 }
 0x5d8   : > { %1329 = vxpose.xlu1.b32.cont [2/4] (short) (narrow) %v1319_v53, 8 }
 0x5db   : > { %v1370_v29 = vpop.permute.xlu2 %1369 }
 0x5dd   : > { %1764 = vperm.xlu2 %2881, %v3812_v23  }
 0x5df   : > { %v3867_v57 = vpop.permute.xlu1 %1756  ;;  %v1628_v51 = vpop.permute.xlu0 %1627 }
 0x5e0   : > { %v1632_v25 = vsel %vm359_vm0, %v1628_v51, 1065369472 }
 0x5e4   : > { %v3869_v60 = vpop.permute.xlu2 %1561 }
 0x5e5   : > { %2883 = vset.pattern.permute.xlu2 %v3231_v0 }
 0x5e6   : > { %2146 = vperm.xlu2 %2883, %v3812_v23  }
 0x5e7   : > { %v3873_v44 = vpop.permute.xlu0 %2138 }
 0x5e8   : > { %v3875_v1 = vpop.permute.xlu1 %2333 }
 0x5ed   : > { %v1940_v14 = vpop.permute.xlu2 %1939 }
 0x5ee   : > { %1824 = vrot.lane.b32.xlu2 %v3782_v19, %s3220_s18 }
 0x5ef   : > { %v2006_v16 = vpop.permute.xlu0 %2005 }
 0x5f0   : > { %v3879_v4 = vpop.permute.xlu1 %2337  ;;  %v2010_v33 = vsel %vm359_vm0, %v2006_v16, 1065369472 }
 0x5f5   : > { %v2205_v5 = vpop.permute.xlu2 %2204 }
 0x5f6   : > { %2401 = vrot.lane.b32.xlu2 %v3782_v19, %s3233_s23  ;;  %v2209_v61 = vsel %vm359_vm0, %v2205_v5, 1065369472 }
 0x5f7   : > { %v3883_v6 = vpop.permute.xlu0 %1520 }
 0x5f8   : > { %v3885_v36 = vpop.permute.xlu1 %1700 }
 0x5fd   : > { %v3887_v22 = vpop.permute.xlu2 %1698 }
 0x5ff   : > { %v1321_v34 = vpop.permute.xlu0 %1320 }
 0x600   : > { %1330 = vxpose.xlu1.b32.cont [3/4] (short) (narrow) %v1321_v34, 8  ;;  %v3889_v56 = vpop.permute.xlu1 %1947 }
 0x605   : > { %v1374_v55 = vpop.permute.xlu2 %1373 }
 0x607   : > { %v3891_v58 = vpop.permute.xlu0 %1760 }
 0x608   : > { %v2207_v8 = vpop.permute.xlu1 %2206 }
 0x609   : > { %v2212_v11 = vsel %vm359_vm0, %v2207_v8, 1065369472 }
 0x60a   : > { %2226 = vmatpush.bf16.msra.mxu3 %v2212_v11 }
 0x60e   : > { %v1566_v10 = vpop.permute.xlu2 %1565  ;;  %2227 = vmatpush.bf16.msra.mxu3 %v2209_v61 }
 0x610   : > { %v3895_v17 = vpop.permute.xlu0 %2142 }
 0x617   : > { %v3897_v18 = vpop.permute.xlu2 %1943 }
 0x619   : > { %v1378_v2 = vpop.permute.xlu0 %1377 }
 0x61f   : > { %v3899_v52 = vpop.permute.xlu2 %1522 }
 0x622   : > { %v3901_v7 = vpop.permute.xlu0 %1569 }
 0x627   : > { %v1323_v21 = vpop.permute.xlu2 %1322 }
 0x628   : > { %1331 = vxpose.xlu1.b32.end [4/4] (short) (narrow) %v1323_v21, 8 }
 0x62b   : > { %v3903_v31 = vpop.permute.xlu0 %2341 }
 0x62f   : > { %v1630_v0 = vpop.permute.xlu2 %1629 }
 0x630   : > { %v1635_v50 = vsel %vm359_vm0, %v1630_v0, 1065369472 }
 0x631   : > { %1649 = vmatpush.bf16.msra.mxu0 %v1635_v50 }
 0x633   : > { %v2008_v20 = vpop.permute.xlu0 %2007 }
 0x634   : > { %v2013_v24 = vsel %vm359_vm0, %v2008_v20, 1065369472 }
 0x635   : > { %1650 = vmatpush.bf16.msra.mxu0 %v1632_v25  ;;  %2027 = vmatpush.bf16.msra.mxu2 %v2013_v24 }
 0x637   : > { %v3908_v30 = vpop.permute.xlu2 %1764 }
 0x639   : > { %2028 = vmatpush.bf16.msra.mxu2 %v2010_v33 }
 0x640   : > { %v3911_v54 = vpop.permute.xlu2 %2146 }
 0x648   : > { %v1825_v32 = vpop.permute.xlu2 %1824 }
 0x649   : > { %v1830_v15 = vsel %vm359_vm0, %v1825_v32, 1065369472 }
 0x64a   : > { %1844 = vmatpush.bf16.msrb.mxu1 %v1830_v15 }
 0x650   : > { %v2402_v40 = vpop.permute.xlu2 %2401 }
 0x651   : > { %v2407_v35 = vsel %vm359_vm0, %v2402_v40, 1065369472 }
 0x652   : > { %2421 = vmatpush.bf16.msrb.mxu0 %v2407_v35 }
 0x6b4   : > { %v1344_v19 = vpop.trf.xlu1 }
 0x6b5   : > { %v1380_v37 = vperm.slane %v1344_v19, 0  ;;  %v1572_v43 = vperm.slane %v1344_v19, 1  ;;  %v3915_v41 = vperm.slane %v1344_v19, 3  ;;  %v2149_v15 = vperm.slane %v1344_v19, 4 }
 0x6b7   : > { %v1575_v42 = vadd.f32 %v1572_v43, %v1566_v10  ;;  %v1382_v45 = vadd.f32 %v1380_v37, %v1370_v29  ;;  %v1381_v26 = vadd.f32 %v1380_v37, %v3849_v27  ;;  %v1952_v53 = vadd.f32 %v3915_v41, %v1940_v14 }
 0x6b8   : > { %v1384_v51 = vadd.f32 %v1380_v37, %v1378_v2  ;;  %v1383_v8 = vadd.f32 %v1380_v37, %v1374_v55  ;;  %v3929_v14 = vperm.slane %v1344_v19, 2  ;;  %v1574_v24 = vadd.f32 %v1572_v43, %v3869_v60 }
 0x6b9   : > { %vm1579_vm3 = vcmp.ge.f32.partialorder %v1575_v42, 0.0  ;;  %v1583_v16 = vmul.f32 0.2, %v1575_v42  ;;  %vm1386_vm4 = vcmp.ge.f32.partialorder %v1382_v45, 0.0  ;;  %v1390_v5 = vmul.f32 0.2, %v1382_v45 }
 0x6ba   : > { %vm1385_vm5 = vcmp.ge.f32.partialorder %v1381_v26, 0.0  ;;  %v1389_v34 = vmul.f32 0.2, %v1381_v26  ;;  %v1960_v55 = vmul.f32 0.2, %v1952_v53  ;;  %vm1956_vm1 = vcmp.ge.f32.partialorder %v1952_v53, 0.0 }
 0x6bb   : > { %v3919_v11 = vsel %vm1579_vm3, %v1575_v42, %v1583_v16  ;;  %v3921_v61 = vsel %vm1386_vm4, %v1382_v45, %v1390_v5  ;;  %v1392_v21 = vmul.f32 0.2, %v1384_v51  ;;  %vm1388_vm6 = vcmp.ge.f32.partialorder %v1384_v51, 0.0 }
 0x6bc   : > { %v1595_v10 = vsel %vm479_vm2, %v3919_v11, -inf  ;;  %v1400_v27 = vsel %vm479_vm2, %v3921_v61, -inf  ;;  %v3927_v29 = vsel %vm1385_vm5, %v1381_v26, %v1389_v34  ;;  %v1391_v0 = vmul.f32 0.2, %v1383_v8 }
 0x6bd   : > { %1596 = vmax.xlane.f32.xlu1 %v1595_v10  ;;  %1401 = vmax.xlane.f32.xlu0 %v1400_v27  ;;  %v1397_v2 = vsel %vm479_vm2, %v3927_v29, -inf  ;;  %vm1387_vm7 = vcmp.ge.f32.partialorder %v1383_v8, 0.0  ;;  %v3933_v50 = vsel %vm1956_vm1, %v1952_v53, %v1960_v55  ;;  %v3935_v20 = vsel %vm1388_vm6, %v1384_v51, %v1392_v21 }
 0x6be   : > { %1398 = vmax.xlane.f32.xlu2 %v1397_v2  ;;  %v1768_v25 = vadd.f32 %v3929_v14, %v3844_v13  ;;  %v3940_v33 = vsel %vm1387_vm7, %v1383_v8, %v1391_v0  ;;  %v1573_v32 = vadd.f32 %v1572_v43, %v3858_v49  ;;  %v1970_v40 = vsel %vm479_vm2, %v3933_v50, -inf }
 0x6bf   : > { %v1406_v35 = vsel %vm479_vm2, %v3935_v20, -inf  ;;  %v3947_v37 = vperm.slane %v1344_v19, 5  ;;  %v1403_v13 = vsel %vm479_vm2, %v3940_v33, -inf  ;;  %v1582_v60 = vmul.f32 0.2, %v1574_v24 }
 0x6c0   : > { %v1776_v42 = vmul.f32 0.2, %v1768_v25  ;;  %vm1772_vm8 = vcmp.ge.f32.partialorder %v1768_v25, 0.0  ;;  %vm1578_vm9 = vcmp.ge.f32.partialorder %v1574_v24, 0.0  ;;  %v1581_v49 = vmul.f32 0.2, %v1573_v32 }
 0x6c1   : > { %vm1577_vm10 = vcmp.ge.f32.partialorder %v1573_v32, 0.0  ;;  %v3953_v26 = vsel %vm1578_vm9, %v1574_v24, %v1582_v60  ;;  %v2345_v19 = vadd.f32 %v3947_v37, %v3852_v38  ;;  %v2150_v53 = vadd.f32 %v2149_v15, %v3856_v47 }
 0x6c2   : > { %v3951_v45 = vsel %vm1772_vm8, %v1768_v25, %v1776_v42  ;;  %v3958_v51 = vsel %vm1577_vm10, %v1573_v32, %v1581_v49  ;;  %v1576_v16 = vadd.f32 %v1572_v43, %v3901_v7  ;;  %v1592_v34 = vsel %vm479_vm2, %v3953_v26, -inf }
 0x6c3   : > { %v1784_v5 = vsel %vm479_vm2, %v3951_v45, -inf  ;;  %v1589_v8 = vsel %vm479_vm2, %v3958_v51, -inf  ;;  %v2353_v10 = vmul.f32 0.2, %v2345_v19  ;;  %v2158_v27 = vmul.f32 0.2, %v2150_v53 }
 0x6c4   : > { %vm2349_vm11 = vcmp.ge.f32.partialorder %v2345_v19, 0.0  ;;  %vm2154_vm12 = vcmp.ge.f32.partialorder %v2150_v53, 0.0  ;;  %v1584_v38 = vmul.f32 0.2, %v1576_v16  ;;  %vm1580_vm13 = vcmp.ge.f32.partialorder %v1576_v16, 0.0 }
 0x6c5   : > { %1971 = vmax.xlane.f32.xlu1 %v1970_v40  ;;  %1407 = vmax.xlane.f32.xlu0 %v1406_v35  ;;  %v3967_v47 = vsel %vm2349_vm11, %v2345_v19, %v2353_v10  ;;  %v3969_v7 = vsel %vm2154_vm12, %v2150_v53, %v2158_v27  ;;  %v2152_v43 = vadd.f32 %v2149_v15, %v3895_v17 }
 0x6c6   : > { %1404 = vmax.xlane.f32.xlu2 %v1403_v13  ;;  %v2153_v2 = vadd.f32 %v2149_v15, %v3911_v54  ;;  %v3973_v55 = vsel %vm1580_vm13, %v1576_v16, %v1584_v38  ;;  %v1951_v21 = vadd.f32 %v3915_v41, %v3847_v28  ;;  %v2361_v0 = vsel %vm479_vm2, %v3967_v47, -inf }
 0x6c7   : > { %v2166_v25 = vsel %vm479_vm2, %v3969_v7, -inf  ;;  %v1598_v24 = vsel %vm479_vm2, %v3973_v55, -inf  ;;  %v2160_v32 = vmul.f32 0.2, %v2152_v43  ;;  %vm2156_vm14 = vcmp.ge.f32.partialorder %v2152_v43, 0.0 }
 0x6c8   : > { %v2161_v17 = vmul.f32 0.2, %v2153_v2  ;;  %v1959_v54 = vmul.f32 0.2, %v1951_v21  ;;  %vm2157_vm15 = vcmp.ge.f32.partialorder %v2153_v2, 0.0  ;;  %vm1955_vm3 = vcmp.ge.f32.partialorder %v1951_v21, 0.0 }
 0x6c9   : > { %v3983_v40 = vsel %vm2156_vm14, %v2152_v43, %v2160_v32  ;;  %v1771_v35 = vadd.f32 %v3929_v14, %v3908_v30  ;;  %v2151_v42 = vadd.f32 %v2149_v15, %v3873_v44  ;;  %v2347_v44 = vadd.f32 %v3947_v37, %v3879_v4 }
 0x6ca   : > { %v3985_v28 = vsel %vm2157_vm15, %v2153_v2, %v2161_v17  ;;  %v3989_v13 = vsel %vm1955_vm3, %v1951_v21, %v1959_v54  ;;  %v2172_v60 = vsel %vm479_vm2, %v3983_v40, -inf  ;;  %v2348_v4 = vadd.f32 %v3947_v37, %v3903_v31 }
 0x6cb   : > { %v2175_v49 = vsel %vm479_vm2, %v3985_v28, -inf  ;;  %v1967_v19 = vsel %vm479_vm2, %v3989_v13, -inf  ;;  %v1779_v53 = vmul.f32 0.2, %v1771_v35  ;;  %v2159_v16 = vmul.f32 0.2, %v2151_v42 }
 0x6cc   : > { %vm1775_vm4 = vcmp.ge.f32.partialorder %v1771_v35, 0.0  ;;  %vm2155_vm5 = vcmp.ge.f32.partialorder %v2151_v42, 0.0  ;;  %v2355_v10 = vmul.f32 0.2, %v2347_v44  ;;  %vm2351_vm1 = vcmp.ge.f32.partialorder %v2347_v44, 0.0 }
 0x6cd   : > { %1785 = vmax.xlane.f32.xlu1 %v1784_v5  ;;  %1593 = vmax.xlane.f32.xlu0 %v1592_v34  ;;  %v3998_v30 = vsel %vm1775_vm4, %v1771_v35, %v1779_v53  ;;  %v4002_v15 = vsel %vm2155_vm5, %v2151_v42, %v2159_v16  ;;  %v1769_v5 = vadd.f32 %v3929_v14, %v3867_v57  ;;  %vm2352_vm7 = vcmp.ge.f32.partialorder %v2348_v4, 0.0 }
 0x6ce   : > { %1590 = vmax.xlane.f32.xlu2 %v1589_v8  ;;  %v1793_v34 = vsel %vm479_vm2, %v3998_v30, -inf  ;;  %v2169_v8 = vsel %vm479_vm2, %v4002_v15, -inf  ;;  %v4010_v38 = vsel %vm2351_vm1, %v2347_v44, %v2355_v10  ;;  %v2346_v57 = vadd.f32 %v3947_v37, %v3875_v1 }
 0x6cf   : > { %v1777_v27 = vmul.f32 0.2, %v1769_v5  ;;  %vm1773_vm6 = vcmp.ge.f32.partialorder %v1769_v5, 0.0  ;;  %v2367_v2 = vsel %vm479_vm2, %v4010_v38, -inf  ;;  %v1953_v1 = vadd.f32 %v3915_v41, %v3897_v18 }
 0x6d0   : > { %vm2350_vm8 = vcmp.ge.f32.partialorder %v2346_v57, 0.0  ;;  %v1954_v35 = vadd.f32 %v3915_v41, %v3889_v56 }
 0x6d1   : > { %v4014_v43 = vsel %vm1773_vm6, %v1769_v5, %v1777_v27  ;;  %v1961_v17 = vmul.f32 0.2, %v1953_v1  ;;  %vm1957_vm9 = vcmp.ge.f32.partialorder %v1953_v1, 0.0 }
 0x6d2   : > { %v1787_v21 = vsel %vm479_vm2, %v4014_v43, -inf  ;;  %v1962_v42 = vmul.f32 0.2, %v1954_v35  ;;  %vm1958_vm10 = vcmp.ge.f32.partialorder %v1954_v35, 0.0 }
 0x6d3   : > { %v4036_v54 = vsel %vm1957_vm9, %v1953_v1, %v1961_v17 }
 0x6d4   : > { %v1973_v18 = vsel %vm479_vm2, %v4036_v54, -inf }
 0x6d5   : > { %2362 = vmax.xlane.f32.xlu1 %v2361_v0  ;;  %2167 = vmax.xlane.f32.xlu0 %v2166_v25  ;;  %v2356_v0 = vmul.f32 0.2, %v2348_v4  ;;  %v2354_v25 = vmul.f32 0.2, %v2346_v57 }
 0x6d6   : > { %1599 = vmax.xlane.f32.xlu2 %v1598_v24 }
 0x6d7   : > { %v4024_v31 = vsel %vm2352_vm7, %v2348_v4, %v2356_v0  ;;  %v4026_v24 = vsel %vm2350_vm8, %v2346_v57, %v2354_v25 }
 0x6d8   : > { %v2370_v37 = vsel %vm479_vm2, %v4024_v31, -inf  ;;  %v2364_v32 = vsel %vm479_vm2, %v4026_v24, -inf }
 0x6dd   : > { %2173 = vmax.xlane.f32.xlu1 %v2172_v60  ;;  %2176 = vmax.xlane.f32.xlu0 %v2175_v49  ;;  %v4044_v60 = vadd.f32 %v3757_v63, %v3774_v3  ;;  %v4048_v49 = vsel %vm1958_vm10, %v1954_v35, %v1962_v42 }
 0x6de   : > { %1968 = vmax.xlane.f32.xlu2 %v1967_v19  ;;  %v1976_v56 = vsel %vm479_vm2, %v4048_v49, -inf  ;;  %v4056_v19 = vadd.f32 %v3757_v63, %v3798_v62  ;;  %v4070_v62 = vadd.f32 %v3757_v63, %v3762_v9 }
 0x6e5   : > { %1794 = vmax.xlane.f32.xlu1 %v1793_v34 }
 0x6e6   : > { %2170 = vmax.xlane.f32.xlu2 %v2169_v8 }
 0x6ed   : > { %2368 = vmax.xlane.f32.xlu1 %v2367_v2 }
 0x6ee   : > { %1788 = vmax.xlane.f32.xlu2 %v1787_v21 }
 0x6f1   : > { %1822 = vrot.lane.b32.xlu0 %v3784_v39, %s3220_s18 }
 0x6f5   : > { %2371 = vmax.xlane.f32.xlu1 %v2370_v37 }
 0x6f6   : > { %2365 = vmax.xlane.f32.xlu2 %v2364_v32 }
 0x6f9   : > { %2399 = vrot.lane.b32.xlu0 %v3784_v39, %s3233_s23  ;;  %v1770_v39 = vadd.f32 %v3929_v14, %v3891_v58  ;;  %v4076_v58 = vadd.f32 %v3757_v63, %v3812_v23 }
 0x6fb   : > { %v1778_v41 = vmul.f32 0.2, %v1770_v39  ;;  %vm1774_vm11 = vcmp.ge.f32.partialorder %v1770_v39, 0.0 }
 0x6fd   : > { %v4060_v3 = vsel %vm1774_vm11, %v1770_v39, %v1778_v41 }
 0x6fe   : > { %1974 = vmax.xlane.f32.xlu2 %v1973_v18  ;;  %v1790_v53 = vsel %vm479_vm2, %v4060_v3, -inf }
 0x701   : > { %2078 = vrot.lane.b32.xlu0 %v4044_v60, %s4435_s17 }
 0x706   : > { %1977 = vmax.xlane.f32.xlu2 %v1976_v56 }
 0x709   : > { %2275 = vrot.lane.b32.xlu0 %v4056_v19, %s3220_s18 }
 0x70e   : > { %1791 = vmax.xlane.f32.xlu2 %v1790_v53  ;;  %2080 = vrot.lane.b32.xlu1 %v4056_v19, %s4435_s17 }
 0x711   : > { %2468 = vrot.lane.b32.xlu0 %v4044_v60, %s4436_s19 }
 0x716   : > { %2271 = vrot.lane.b32.xlu1 %v4070_v62, %s3220_s18 }
 0x71e   : > { %2277 = vrot.lane.b32.xlu1 %v4076_v58, %s3220_s18 }
 0x726   : > { %2076 = vrot.lane.b32.xlu2 %v4070_v62, %s4435_s17  ;;  %2470 = vrot.lane.b32.xlu1 %v4056_v19, %s4436_s19 }
 0x72e   : > { %2082 = vrot.lane.b32.xlu2 %v4076_v58, %s4435_s17 }
 0x730   : > { %v1597_v9 = vpop.xlane.xlu1 %1596  ;;  %v1402_v14 = vpop.xlane.xlu0 %1401 }
 0x731   : > { %v1410_v16 = vsub.f32 %v3921_v61, %v1402_v14  ;;  %v1399_v44 = vpop.xlane.xlu2 %1398 }
 0x732   : > { %v1409_v63 = vsub.f32 %v3927_v29, %v1399_v44  ;;  %v2756_v29 = vld [vmem:[%s4095_s9] sm:$0xff]  }
 0x733   : > { %v1415_v23 = vmul.f32 1.442695, %v1410_v16  ;;  %v4100_v0 = vunpack.c.h.bf16 %v2756_v29  ;;  %v4102_v1 = vunpack.c.l.bf16 %v2756_v29  ;;  %v2764_v29 = vld [vmem:[%s4095_s9 + $0x8] sm:$0xff]   ;;  %s3160_s9 = scalar_lea.hbm %s4420_s7, 64 }
 0x734   : > { %v1413_v5 = vmul.f32 1.442695, %v1409_v63  ;;  %v1603_v63 = vsub.f32 %v3919_v11, %v1597_v9 }
 0x735   : > { %2966 = vpow2.f32 %v1415_v23 }
 0x736   : > { %2273 = vrot.lane.b32.xlu2 %v4044_v60, %s3220_s18  ;;  %2968 = vpow2.f32 %v1413_v5 }
 0x738   : > { %v1972_v34 = vpop.xlane.xlu1 %1971  ;;  %v1408_v8 = vpop.xlane.xlu0 %1407 }
 0x739   : > { %v1412_v61 = vsub.f32 %v3935_v20, %v1408_v8  ;;  %v1405_v10 = vpop.xlane.xlu2 %1404  ;;  %v1980_v8 = vsub.f32 %v3933_v50, %v1972_v34 }
 0x73a   : > { %v1411_v27 = vsub.f32 %v3940_v33, %v1405_v10 }
 0x73b   : > { %v1419_v4 = vmul.f32 1.442695, %v1412_v61  ;;  %v2967_v57 = vpop.eup %2966 }
 0x73c   : > { %v1417_v2 = vmul.f32 1.442695, %v1411_v27  ;;  %v2969_v21 = vpop.eup %2968  ;;  %v1422_v25 = vpack.c.bf16 %v2967_v57, %v2967_v57 }
 0x73d   : > { %v1421_v37 = vpack.c.bf16 %v2969_v21, %v2969_v21  ;;  %2970 = vpow2.f32 %v1419_v4  ;;  %v4119_v4 = vunpack.c.h.bf16 %v2764_v29  ;;  %v1985_v21 = vmul.f32 1.442695, %v1980_v8 }
 0x73e   : > { %2466 = vrot.lane.b32.xlu2 %v4070_v62, %s4436_s19  ;;  %v1426_v32 = vunpack.c.l.bf16 %v1422_v25  ;;  %2972 = vpow2.f32 %v1417_v2 }
 0x73f   : > { %v1425_v20 = vunpack.c.l.bf16 %v1421_v37 }
 0x740   : > { %v4106_v17 = vpop.xlane.xlu1 %1785  ;;  %v1594_v33 = vpop.xlane.xlu0 %1593  ;;  %v1434_v35 = vmul.f32 %v4100_v0, %v1426_v32  ;;  %v4121_v32 = vunpack.c.l.bf16 %v2764_v29 }
 0x741   : > { %v1602_v18 = vsub.f32 %v3953_v26, %v1594_v33  ;;  %v1591_v42 = vpop.xlane.xlu2 %1590  ;;  %v1433_v39 = vmul.f32 %v4102_v1, %v1425_v20 }
 0x742   : > { %v1601_v56 = vsub.f32 %v3958_v51, %v1591_v42  ;;  %v1609_v51 = vmul.f32 1.442695, %v1603_v63 }
 0x743   : > { %v1607_v41 = vmul.f32 1.442695, %v1602_v18  ;;  %v2971_v53 = vpop.eup %2970  ;;  %v1437_v16 = vpack.c.bf16 %v1434_v35, %v1433_v39 }
 0x744   : > { %v1605_v14 = vmul.f32 1.442695, %v1601_v56  ;;  %v2973_v44 = vpop.eup %2972  ;;  %v1424_v23 = vpack.c.bf16 %v2971_v53, %v2971_v53 }
 0x745   : > { %2974 = vpow2.f32 %v1607_v41  ;;  %2697 = vmatmul.msk.bf16.vlgmr.msrb.gmra.mxu3 %vm479_vm2, %v1437_v16  ;;  %v1423_v5 = vpack.c.bf16 %v2973_v44, %v2973_v44 }
 0x746   : > { %2976 = vpow2.f32 %v1605_v14  ;;  %v1428_v57 = vunpack.c.l.bf16 %v1424_v23 }
 0x747   : > { %v1427_v11 = vunpack.c.l.bf16 %v1423_v5  ;;  %2978 = vpow2.f32 %v1609_v51  ;;  %v1796_v5 = vsub.f32 %v3951_v45, %v4106_v17 }
 0x748   : > { %v4114_v26 = vpop.xlane.xlu1 %2362  ;;  %v2168_v37 = vpop.xlane.xlu0 %2167  ;;  %v1436_v34 = vmul.f32 %v4119_v4, %v1428_v57 }
 0x749   : > { %v1600_v61 = vpop.xlane.xlu2 %1599  ;;  %v2178_v35 = vsub.f32 %v3969_v7, %v2168_v37 }
 0x74a   : > { %v1604_v10 = vsub.f32 %v3973_v55, %v1600_v61  ;;  %v1435_v55 = vmul.f32 %v4121_v32, %v1427_v11  ;;  %v1800_v11 = vmul.f32 1.442695, %v1796_v5 }
 0x74b   : > { %v2975_v27 = vpop.eup %2974  ;;  %v2182_v16 = vmul.f32 1.442695, %v2178_v35 }
 0x74c   : > { %v1611_v9 = vmul.f32 1.442695, %v1604_v10  ;;  %v2977_v2 = vpop.eup %2976  ;;  %v1614_v25 = vpack.c.bf16 %v2975_v27, %v2975_v27  ;;  %v1438_v63 = vpack.c.bf16 %v1436_v34, %v1435_v55 }
 0x74d   : > { %v1613_v20 = vpack.c.bf16 %v2977_v2, %v2977_v2  ;;  %v2979_v53 = vpop.eup %2978 }
 0x74e   : > { %v1618_v50 = vunpack.c.l.bf16 %v1614_v25  ;;  %2980 = vpow2.f32 %v1611_v9  ;;  %v1615_v51 = vpack.c.bf16 %v2979_v53, %v2979_v53 }
 0x74f   : > { %v1617_v33 = vunpack.c.l.bf16 %v1613_v20  ;;  %2982 = vpow2.f32 %v1985_v21 }
 0x750   : > { %v2174_v18 = vpop.xlane.xlu1 %2173  ;;  %v1622_v42 = vmul.f32 %v4100_v0, %v1618_v50  ;;  %v2177_v29 = vpop.xlane.xlu0 %2176  ;;  %v1619_v45 = vunpack.c.l.bf16 %v1615_v51  ;;  %v2373_v50 = vsub.f32 %v3967_v47, %v4114_v26 }
 0x751   : > { %v1969_v39 = vpop.xlane.xlu2 %1968  ;;  %v1621_v56 = vmul.f32 %v4102_v1, %v1617_v33  ;;  %v2180_v57 = vsub.f32 %v3983_v40, %v2174_v18  ;;  %v2181_v25 = vsub.f32 %v3985_v28, %v2177_v29 }
 0x752   : > { %v1979_v41 = vsub.f32 %v3989_v13, %v1969_v39 }
 0x753   : > { %v1625_v14 = vpack.c.bf16 %v1622_v42, %v1621_v56  ;;  %v2186_v34 = vmul.f32 1.442695, %v2180_v57  ;;  %v2188_v33 = vmul.f32 1.442695, %v2181_v25  ;;  %v1623_v42 = vmul.f32 %v4121_v32, %v1619_v45 }
 0x754   : > { %v1983_v44 = vmul.f32 1.442695, %v1979_v41  ;;  %v2981_v23 = vpop.eup %2980  ;;  %v2377_v41 = vmul.f32 1.442695, %v2373_v50 }
 0x755   : > { %2698 = vmatmul.msk.bf16.gmra.mxu3 %vm479_vm2, %v1438_v63  ;;  %2703 = vmatmul.msk.bf16.vlgmr.msra.gmra.mxu0 %vm479_vm2, %v1625_v14  ;;  %v2983_v7 = vpop.eup %2982  ;;  %v1616_v8 = vpack.c.bf16 %v2981_v23, %v2981_v23 }
 0x756   : > { %2984 = vpow2.f32 %v1983_v44  ;;  %v1992_v10 = vpack.c.bf16 %v2983_v7, %v2983_v7 }
 0x757   : > { %2986 = vpow2.f32 %v2182_v16  ;;  %v1620_v9 = vunpack.c.l.bf16 %v1616_v8 }
 0x758   : > { %v4133_v61 = vpop.xlane.xlu1 %1794  ;;  %v1996_v17 = vunpack.c.l.bf16 %v1992_v10 }
 0x759   : > { %v2171_v13 = vpop.xlane.xlu2 %2170 }
 0x75a   : > { %v2179_v27 = vsub.f32 %v4002_v15, %v2171_v13  ;;  %v1624_v15 = vmul.f32 %v4119_v4, %v1620_v9  ;;  %v2000_v28 = vmul.f32 %v4100_v0, %v1996_v17 }
 0x75c   : > { %v2184_v2 = vmul.f32 1.442695, %v2179_v27  ;;  %v2985_v21 = vpop.eup %2984  ;;  %v1626_v44 = vpack.c.bf16 %v1624_v15, %v1623_v42 }
 0x75d   : > { %v2987_v37 = vpop.eup %2986  ;;  %v1991_v20 = vpack.c.bf16 %v2985_v21, %v2985_v21 }
 0x75e   : > { %2988 = vpow2.f32 %v2184_v2  ;;  %v2190_v40 = vpack.c.bf16 %v2987_v37, %v2987_v37 }
 0x75f   : > { %2990 = vpow2.f32 %v1800_v11  ;;  %v1995_v55 = vunpack.c.l.bf16 %v1991_v20 }
 0x760   : > { %v2369_v35 = vpop.xlane.xlu1 %2368  ;;  %2992 = vpow2.f32 %v2186_v34  ;;  %v2194_v63 = vunpack.c.l.bf16 %v2190_v40 }
 0x761   : > { %v1789_v18 = vpop.xlane.xlu2 %1788  ;;  %v1999_v39 = vmul.f32 %v4102_v1, %v1995_v55  ;;  %2994 = vpow2.f32 %v2188_v33 }
 0x762   : > { %v1797_v56 = vsub.f32 %v4014_v43, %v1789_v18  ;;  %v2198_v13 = vmul.f32 %v4102_v1, %v2194_v63 }
 0x763   : > { %v1823_v47 = vpop.permute.xlu0 %1822  ;;  %v2003_v53 = vpack.c.bf16 %v2000_v28, %v1999_v39 }
 0x764   : > { %v2989_v26 = vpop.eup %2988  ;;  %v1802_v14 = vmul.f32 1.442695, %v1797_v56  ;;  %v1827_v16 = vsel %vm359_vm0, %v1823_v47, 1065369472 }
 0x765   : > { %v2191_v23 = vpack.c.bf16 %v2989_v26, %v2989_v26  ;;  %1845 = vmatpush.bf16.msrb.mxu1 %v1827_v16  ;;  %v2991_v7 = vpop.eup %2990  ;;  %2704 = vmatmul.msk.bf16.gmra.mxu0 %vm479_vm2, %v1626_v44 }
 0x766   : > { %2996 = vpow2.f32 %v1802_v14  ;;  %2715 = vmatmul.msk.bf16.vlgmr.msra.gmra.mxu2 %vm479_vm2, %v2003_v53  ;;  %v2993_v5 = vpop.eup %2992  ;;  %v1808_v8 = vpack.c.bf16 %v2991_v7, %v2991_v7 }
 0x767   : > { %v2195_v43 = vunpack.c.l.bf16 %v2191_v23  ;;  %2998 = vpow2.f32 %v2377_v41  ;;  %v2995_v27 = vpop.eup %2994  ;;  %v2192_v50 = vpack.c.bf16 %v2993_v5, %v2993_v5 }
 0x768   : > { %v2372_v11 = vpop.xlane.xlu1 %2371  ;;  %v1812_v37 = vunpack.c.l.bf16 %v1808_v8  ;;  %v2193_v34 = vpack.c.bf16 %v2995_v27, %v2995_v27 }
 0x769   : > { %v2199_v51 = vmul.f32 %v4100_v0, %v2195_v43  ;;  %v2366_v10 = vpop.xlane.xlu2 %2365  ;;  %v2376_v20 = vsub.f32 %v4024_v31, %v2372_v11  ;;  %v2196_v39 = vunpack.c.l.bf16 %v2192_v50 }
 0x76a   : > { %v2374_v29 = vsub.f32 %v4026_v24, %v2366_v10  ;;  %v2375_v24 = vsub.f32 %v4010_v38, %v2369_v35  ;;  %v1816_v55 = vmul.f32 %v4102_v1, %v1812_v37  ;;  %v2197_v56 = vunpack.c.l.bf16 %v2193_v34 }
 0x76b   : > { %v2202_v57 = vpack.c.bf16 %v2199_v51, %v2198_v13  ;;  %v2400_v9 = vpop.permute.xlu0 %2399  ;;  %v2383_v42 = vmul.f32 1.442695, %v2376_v20  ;;  %v2200_v38 = vmul.f32 %v4121_v32, %v2196_v39  ;;  %v3234_v39 = vmov 16  }
 0x76c   : > { %v2997_v2 = vpop.eup %2996  ;;  %v2379_v21 = vmul.f32 1.442695, %v2374_v29  ;;  %v2404_v25 = vsel %vm359_vm0, %v2400_v9, 1065369472  ;;  %v2381_v41 = vmul.f32 1.442695, %v2375_v24  ;;  %v2201_v35 = vmul.f32 %v4119_v4, %v2197_v56  ;;  %2887 = vset.pattern.permute.xlu2 %v3234_v39  ;;  %2885 = vset.pattern.permute.xlu0 %v3234_v39 }
 0x76d   : > { %v1809_v45 = vpack.c.bf16 %v2997_v2, %v2997_v2  ;;  %2721 = vmatmul.msk.bf16.vlgmr.msra.gmra.mxu3 %vm479_vm2, %v2202_v57  ;;  %2422 = vmatpush.bf16.msrb.mxu0 %v2404_v25  ;;  %v2999_v17 = vpop.eup %2998 }
 0x76e   : > { %3000 = vpow2.f32 %v2379_v21  ;;  %v2385_v40 = vpack.c.bf16 %v2999_v17, %v2999_v17  ;;  %v2203_v5 = vpack.c.bf16 %v2201_v35, %v2200_v38  ;;  %2886 = vset.pattern.permute.xlu1 %v3234_v39 }
 0x76f   : > { %v1813_v15 = vunpack.c.l.bf16 %v1809_v45  ;;  %3002 = vpow2.f32 %v2383_v42 }
 0x770   : > { %v2389_v53 = vunpack.c.l.bf16 %v2385_v40  ;;  %3004 = vpow2.f32 %v2381_v41 }
 0x771   : > { %v1817_v33 = vmul.f32 %v4100_v0, %v1813_v15  ;;  %v1975_v18 = vpop.xlane.xlu2 %1974 }
 0x772   : > { %v1981_v28 = vsub.f32 %v4036_v54, %v1975_v18  ;;  %v1799_v54 = vsub.f32 %v3998_v30, %v4133_v61  ;;  %v2393_v44 = vmul.f32 %v4102_v1, %v2389_v53 }
 0x773   : > { %v1820_v47 = vpack.c.bf16 %v1817_v33, %v1816_v55 }
 0x774   : > { %v3001_v31 = vpop.eup %3000  ;;  %v1987_v26 = vmul.f32 1.442695, %v1981_v28  ;;  %v1806_v13 = vmul.f32 1.442695, %v1799_v54 }
 0x775   : > { %v2386_v14 = vpack.c.bf16 %v3001_v31, %v3001_v31  ;;  %2709 = vmatmul.msk.bf16.vlgmr.msrb.gmra.mxu1 %vm479_vm2, %v1820_v47  ;;  %v3003_v8 = vpop.eup %3002 }
 0x776   : > { %3006 = vpow2.f32 %v1987_v26  ;;  %v3005_v10 = vpop.eup %3004  ;;  %v2388_v30 = vpack.c.bf16 %v3003_v8, %v3003_v8 }
 0x777   : > { %v2390_v16 = vunpack.c.l.bf16 %v2386_v14  ;;  %v2387_v1 = vpack.c.bf16 %v3005_v10, %v3005_v10 }
 0x779   : > { %v2394_v63 = vmul.f32 %v4100_v0, %v2390_v16  ;;  %v1978_v23 = vpop.xlane.xlu2 %1977  ;;  %v2391_v9 = vunpack.c.l.bf16 %v2387_v1 }
 0x77a   : > { %v1982_v7 = vsub.f32 %v4048_v49, %v1978_v23  ;;  %v2392_v49 = vunpack.c.l.bf16 %v2388_v30 }
 0x77b   : > { %v2397_v43 = vpack.c.bf16 %v2394_v63, %v2393_v44  ;;  %v2395_v20 = vmul.f32 %v4121_v32, %v2391_v9 }
 0x77c   : > { %v1989_v51 = vmul.f32 1.442695, %v1982_v7  ;;  %v3007_v29 = vpop.eup %3006  ;;  %v2396_v37 = vmul.f32 %v4119_v4, %v2392_v49 }
 0x77d   : > { %2722 = vmatmul.msk.bf16.gmra.mxu3 %vm479_vm2, %v2203_v5  ;;  %2727 = vmatmul.msk.bf16.vlgmr.msrb.gmra.mxu0 %vm479_vm2, %v2397_v43  ;;  %v1993_v61 = vpack.c.bf16 %v3007_v29, %v3007_v29 }
 0x77e   : > { %3008 = vpow2.f32 %v1989_v51 }
 0x77f   : > { %3010 = vpow2.f32 %v1806_v13  ;;  %v1997_v2 = vunpack.c.l.bf16 %v1993_v61 }
 0x781   : > { %v1792_v0 = vpop.xlane.xlu2 %1791  ;;  %v2001_v50 = vmul.f32 %v4121_v32, %v1997_v2 }
 0x782   : > { %v1798_v27 = vsub.f32 %v4060_v3, %v1792_v0  ;;  %v2398_v3 = vpack.c.bf16 %v2396_v37, %v2395_v20 }
 0x784   : > { %v3009_v57 = vpop.eup %3008  ;;  %v1804_v11 = vmul.f32 1.442695, %v1798_v27 }
 0x785   : > { %v1994_v21 = vpack.c.bf16 %v3009_v57, %v3009_v57  ;;  %v3011_v25 = vpop.eup %3010 }
 0x786   : > { %3012 = vpow2.f32 %v1804_v11  ;;  %v1811_v17 = vpack.c.bf16 %v3011_v25, %v3011_v25 }
 0x787   : > { %v1998_v45 = vunpack.c.l.bf16 %v1994_v21 }
 0x788   : > { %v1815_v55 = vunpack.c.l.bf16 %v1811_v17 }
 0x789   : > { %v2002_v34 = vmul.f32 %v4119_v4, %v1998_v45  ;;  %v4213_v49 = vpop.permute.xlu2 %2076 }
 0x78a   : > { %v1819_v18 = vmul.f32 %v4119_v4, %v1815_v55 }
 0x78b   : > { %v2004_v24 = vpack.c.bf16 %v2002_v34, %v2001_v50 }
 0x78c   : > { %v3013_v15 = vpop.eup %3012 }
 0x78d   : > { %v1810_v40 = vpack.c.bf16 %v3013_v15, %v3013_v15  ;;  %2716 = vmatmul.msk.bf16.gmra.mxu2 %vm479_vm2, %v2004_v24  ;;  %2728 = vmatmul.msk.bf16.gmra.mxu0 %vm479_vm2, %v2398_v3 }
 0x78f   : > { %v1814_v33 = vunpack.c.l.bf16 %v1810_v40 }
 0x791   : > { %v1818_v42 = vmul.f32 %v4121_v32, %v1814_v33  ;;  %v4222_v45 = vpop.permute.xlu2 %2082 }
 0x793   : > { %v1821_v28 = vpack.c.bf16 %v1819_v18, %v1818_v42 }
 0x795   : > { %2710 = vmatmul.msk.bf16.gmra.mxu1 %vm479_vm2, %v1821_v28 }
 0x799   : > { %v4237_v28 = vpop.permute.xlu2 %2273 }
 0x7c8   : > { %v4178_v56 = vpop.f32.mrf.mxu3 }
 0x7c9   : > { %v1480_v41 = vmax.f32 %v4178_v56, 1e-20 }
 0x7cb   : > { %3014 = vrcp.f32 %v1480_v41 }
 0x7d0   : > { %v4188_v14 = vpop.f32.mrf.mxu3 }
 0x7d1   : > { %v3015_v47 = vpop.eup %3014  ;;  %v1481_v29 = vmax.f32 %v4188_v14, 1e-20 }
 0x7d2   : > { %1490 = vperm.xlu2 %2887, %v3015_v47   ;;  %v4181_v31 = vpop.f32.mrf.mxu0 }
 0x7d3   : > { %v1662_v4 = vmax.f32 %v4181_v31, 1e-20 }
 0x7d5   : > { %3016 = vrcp.f32 %v1662_v4 }
 0x7d8   : > { %v4194_v44 = vpop.f32.mrf.mxu3 }
 0x7d9   : > { %v1482_v57 = vmax.f32 %v4194_v44, 1e-20 }
 0x7da   : > { %v4184_v32 = vpop.f32.mrf.mxu0 }
 0x7db   : > { %v3017_v26 = vpop.eup %3016  ;;  %v1663_v43 = vmax.f32 %v4184_v32, 1e-20 }
 0x7dc   : > { %1672 = vperm.xlu0 %2885, %v3017_v26  }
 0x7e0   : > { %v4200_v5 = vpop.f32.mrf.mxu3 }
 0x7e1   : > { %v1483_v4 = vmax.f32 %v4200_v5, 1e-20 }
 0x7e2   : > { %v4186_v53 = vpop.f32.mrf.mxu0 }
 0x7e3   : > { %v1664_v38 = vmax.f32 %v4186_v53, 1e-20 }
 0x7e5   : > { %3018 = vrcp.f32 %v1664_v38 }
 0x7e9   : > { %v4191_v35 = vpop.f32.mrf.mxu2 }
 0x7ea   : > { %v2040_v16 = vmax.f32 %v4191_v35, 1e-20  ;;  %v4211_v0 = vpop.f32.mrf.mxu0 }
 0x7eb   : > { %v3019_v54 = vpop.eup %3018  ;;  %v1665_v11 = vmax.f32 %v4211_v0, 1e-20 }
 0x7ec   : > { %3020 = vrcp.f32 %v2040_v16  ;;  %1682 = vperm.xlu2 %2887, %v3019_v54  }
 0x7f0   : > { %v4208_v30 = vpop.f32.mrf.mxu3 }
 0x7f1   : > { %v4205_v10 = vpop.f32.mrf.mxu2  ;;  %v2239_v37 = vmax.f32 %v4208_v30, 1e-20 }
 0x7f2   : > { %v3021_v63 = vpop.eup %3020  ;;  %v4196_v23 = vpop.f32.mrf.mxu1  ;;  %v2041_v1 = vmax.f32 %v4205_v10, 1e-20 }
 0x7f3   : > { %2050 = vperm.xlu0 %2885, %v3021_v63   ;;  %v1857_v7 = vmax.f32 %v4196_v23, 1e-20 }
 0x7f5   : > { %3022 = vrcp.f32 %v1857_v7  ;;  %v4247_v7 = vpop.permute.xlu2 %2466 }
 0x7f6   : > { %3024 = vrcp.f32 %v1663_v43 }
 0x7f8   : > { %v4217_v2 = vpop.f32.mrf.mxu3 }
 0x7f9   : > { %v2240_v43 = vmax.f32 %v4217_v2, 1e-20 }
 0x7fa   : > { %v4202_v8 = vpop.f32.mrf.mxu1  ;;  %v4219_v21 = vpop.f32.mrf.mxu0 }
 0x7fb   : > { %v3023_v13 = vpop.eup %3022  ;;  %v1858_v51 = vmax.f32 %v4202_v8, 1e-20 }
 0x7fc   : > { %1867 = vperm.xlu1 %2886, %v3023_v13   ;;  %v3025_v61 = vpop.eup %3024 }
 0x7fd   : > { %3026 = vrcp.f32 %v1858_v51  ;;  %v2434_v51 = vmax.f32 %v4219_v21, 1e-20 }
 0x7fe   : > { %3028 = vrcp.f32 %v1481_v29 }
 0x7ff   : > { %3030 = vrcp.f32 %v2041_v1 }
 0x800   : > { %3032 = vrcp.f32 %v1482_v57  ;;  %v4227_v24 = vpop.f32.mrf.mxu3 }
 0x801   : > { %3034 = vrcp.f32 %v1665_v11 }
 0x802   : > { %3036 = vrcp.f32 %v2239_v37  ;;  %v4229_v3 = vpop.f32.mrf.mxu0 }
 0x803   : > { %v3027_v27 = vpop.eup %3026  ;;  %v2435_v55 = vmax.f32 %v4229_v3, 1e-20 }
 0x804   : > { %1677 = vperm.xlu1 %2886, %v3025_v61   ;;  %1872 = vperm.xlu0 %2885, %v3027_v27   ;;  %v3029_v9 = vpop.eup %3028 }
 0x805   : > { %v3031_v25 = vpop.eup %3030 }
 0x806   : > { %v3033_v17 = vpop.eup %3032 }
 0x807   : > { %v3035_v50 = vpop.eup %3034 }
 0x808   : > { %v3037_v33 = vpop.eup %3036  ;;  %v4240_v41 = vpop.f32.mrf.mxu3 }
 0x809   : > { %v2242_v38 = vmax.f32 %v4240_v41, 1e-20 }
 0x80a   : > { %v4251_v61 = vpop.f32.mrf.mxu0 }
 0x80c   : > { %2055 = vperm.xlu1 %2886, %v3031_v25   ;;  %1495 = vperm.xlu0 %2885, %v3029_v9   ;;  %v2436_v9 = vmax.f32 %v4251_v61, 1e-20  ;;  %v2241_v25 = vmax.f32 %v4227_v24, 1e-20 }
 0x810   : > { %v4231_v15 = vpop.f32.mrf.mxu2 }
 0x811   : > { %v2042_v40 = vmax.f32 %v4231_v15, 1e-20 }
 0x812   : > { %v4224_v20 = vpop.f32.mrf.mxu1 }
 0x813   : > { %v1859_v34 = vmax.f32 %v4224_v20, 1e-20 }
 0x814   : > { %1500 = vperm.xlu1 %2886, %v3033_v17   ;;  %1687 = vperm.xlu0 %2885, %v3035_v50   ;;  %v4257_v50 = vpop.permute.xlu0 %2078 }
 0x815   : > { %3038 = vrcp.f32 %v1859_v34 }
 0x816   : > { %3040 = vrcp.f32 %v2435_v55  ;;  %v4259_v55 = vpop.f32.mrf.mxu0 }
 0x817   : > { %3042 = vrcp.f32 %v2042_v40 }
 0x818   : > { %v4242_v47 = vpop.f32.mrf.mxu2 }
 0x819   : > { %v2043_v54 = vmax.f32 %v4242_v47, 1e-20 }
 0x81a   : > { %v4235_v18 = vpop.f32.mrf.mxu1 }
 0x81b   : > { %v3039_v42 = vpop.eup %3038  ;;  %v1860_v39 = vmax.f32 %v4235_v18, 1e-20 }
 0x81c   : > { %2249 = vperm.xlu1 %2886, %v3037_v33   ;;  %1877 = vperm.xlu2 %2887, %v3039_v42   ;;  %v3041_v26 = vpop.eup %3040 }
 0x81d   : > { %3044 = vrcp.f32 %v1860_v39  ;;  %v3043_v16 = vpop.eup %3042  ;;  %v4262_v39 = vpop.permute.xlu0 %2275 }
 0x81e   : > { %3046 = vrcp.f32 %v1483_v4 }
 0x81f   : > { %3048 = vrcp.f32 %v2242_v38 }
 0x820   : > { %3050 = vrcp.f32 %v2043_v54 }
 0x821   : > { %3052 = vrcp.f32 %v2240_v43 }
 0x822   : > { %3054 = vrcp.f32 %v2434_v51 }
 0x823   : > { %v3045_v63 = vpop.eup %3044 }
 0x824   : > { %2449 = vperm.xlu1 %2886, %v3041_v26   ;;  %2060 = vperm.xlu2 %2887, %v3043_v16   ;;  %v3047_v13 = vpop.eup %3046  ;;  %v2081_v16 = vpop.permute.xlu1 %2080 }
 0x825   : > { %1882 = vperm.xlu0 %2885, %v3045_v63   ;;  %v3049_v29 = vpop.eup %3048  ;;  %v4267_v38 = vpop.permute.xlu0 %2468 }
 0x826   : > { %v3051_v1 = vpop.eup %3050 }
 0x827   : > { %v3053_v17 = vpop.eup %3052 }
 0x828   : > { %v3055_v34 = vpop.eup %3054 }
 0x82c   : > { %2264 = vperm.xlu1 %2886, %v3049_v29   ;;  %1505 = vperm.xlu2 %2887, %v3047_v13   ;;  %v1491_v27 = vpop.permute.xlu2 %1490  ;;  %v4270_v43 = vpop.permute.xlu1 %2271 }
 0x82d   : > { %2065 = vperm.xlu0 %2885, %v3051_v1   ;;  %v1508_v57 = vmul.f32 %v1491_v27, %v4178_v56  ;;  %v2437_v56 = vmax.f32 %v4259_v55, 1e-20 }
 0x82f   : > { %v1528_v11 = vadd.f32 %v3830_v12, %v1508_v57 }
 0x831   : > { %v1536_v37 = vmul.f32 1.442695, %v1528_v11  ;;  %vm1532_vm2 = vcmp.gt.f32.partialorder %v1528_v11, 0.0 }
 0x833   : > { %3056 = vpow2.f32 %v1536_v37 }
 0x834   : > { %2254 = vperm.xlu2 %2887, %v3053_v17   ;;  %3058 = vrcp.f32 %v2436_v9  ;;  %v4273_v1 = vpop.permute.xlu1 %2277 }
 0x835   : > { %2444 = vperm.xlu0 %2885, %v3055_v34   ;;  %3060 = vrcp.f32 %v2241_v25 }
 0x836   : > { %3062 = vrcp.f32 %v2437_v56 }
 0x839   : > { %v3057_v40 = vpop.eup %3056 }
 0x83a   : > { %v3059_v12 = vpop.eup %3058  ;;  %v2699_v33 = vadd.f32 -1.0, %v3057_v40 }
 0x83b   : > { %v3061_v42 = vpop.eup %3060 }
 0x83c   : > { %2454 = vperm.xlu2 %2887, %v3059_v12   ;;  %v1548_v4 = vsel %vm1532_vm2, %v1528_v11, %v2699_v33  ;;  %v3063_v26 = vpop.eup %3062  ;;  %v4276_v9 = vpop.permute.xlu1 %2470 }
 0x83d   : > { %2259 = vperm.xlu0 %2885, %v3061_v42   ;;  %1552 = vst.msk [vmem:[#allocation3] sm:$0xff] %vm359_vm0, %v1548_v4 }
 0x844   : > { %2472 = vrot.lane.b32.xlu2 %v4076_v58, %s4436_s19 }
 0x845   : > { %2459 = vperm.xlu0 %2885, %v3063_v26  }
 0x846   : > { %v1683_v17 = vpop.permute.xlu2 %1682 }
 0x84e   : > { %v1673_v54 = vpop.permute.xlu0 %1672 }
 0x84f   : > { %v1690_v63 = vmul.f32 %v1673_v54, %v4181_v31 }
 0x851   : > { %v1706_v13 = vadd.f32 %v3835_v46, %v1690_v63 }
 0x853   : > { %v1714_v51 = vmul.f32 1.442695, %v1706_v13  ;;  %vm1710_vm12 = vcmp.gt.f32.partialorder %v1706_v13, 0.0 }
 0x855   : > { %3064 = vpow2.f32 %v1714_v51 }
 0x85b   : > { %v3065_v29 = vpop.eup %3064 }
 0x85c   : > { %v2705_v27 = vadd.f32 -1.0, %v3065_v29  ;;  %v1692_v29 = vmul.f32 %v1683_v17, %v4186_v53 }
 0x85e   : > { %v1726_v57 = vsel %vm1710_vm12, %v1706_v13, %v2705_v27 }
 0x85f   : > { %1734 = vrot.lane.b32.xlu0 %v1726_v57, %s4433_s21 }
 0x865   : > { %v2051_v11 = vpop.permute.xlu0 %2050 }
 0x866   : > { %v2068_v25 = vmul.f32 %v2051_v11, %v4191_v35 }
 0x868   : > { %v2088_v31 = vadd.f32 %v4213_v49, %v2068_v25 }
 0x86a   : > { %v2096_v37 = vmul.f32 1.442695, %v2088_v31  ;;  %vm2092_vm13 = vcmp.gt.f32.partialorder %v2088_v31, 0.0 }
 0x86c   : > { %3066 = vpow2.f32 %v2096_v37 }
 0x86e   : > { %v1868_v46 = vpop.permute.xlu1 %1867 }
 0x86f   : > { %v1885_v34 = vmul.f32 %v1868_v46, %v4196_v23 }
 0x871   : > { %v1889_v40 = vadd.f32 %v1885_v34, %v4070_v62 }
 0x872   : > { %v3067_v56 = vpop.eup %3066 }
 0x873   : > { %v1897_v12 = vmul.f32 1.442695, %v1889_v40  ;;  %v2717_v33 = vadd.f32 -1.0, %v3067_v56  ;;  %vm1893_vm14 = vcmp.gt.f32.partialorder %v1889_v40, 0.0 }
 0x875   : > { %3068 = vpow2.f32 %v1897_v12  ;;  %v2108_v42 = vsel %vm2092_vm13, %v2088_v31, %v2717_v33 }
 0x876   : > { %2116 = vrot.lane.b32.xlu0 %v2108_v42, %s3233_s23  ;;  %v1678_v4 = vpop.permute.xlu1 %1677  ;;  %v1873_v35 = vpop.permute.xlu0 %1872 }
 0x877   : > { %v1691_v49 = vmul.f32 %v1678_v4, %v4184_v32  ;;  %v1886_v26 = vmul.f32 %v1873_v35, %v4202_v8  ;;  %v1878_v54 = vpop.permute.xlu2 %1877 }
 0x878   : > { %v1887_v33 = vmul.f32 %v1878_v54, %v4224_v20 }
 0x879   : > { %v1707_v63 = vadd.f32 %v3864_v48, %v1691_v49  ;;  %v1890_v23 = vadd.f32 %v1886_v26, %v4044_v60  ;;  %v4292_v48 = vadd.f32 %v3887_v22, %v1692_v29 }
 0x87a   : > { %v4305_v20 = vadd.f32 %v1887_v33, %v4056_v19 }
 0x87b   : > { %v3069_v62 = vpop.eup %3068  ;;  %v1716_v13 = vmul.f32 1.442695, %v1707_v63  ;;  %v1899_v51 = vmul.f32 1.442695, %v1890_v23  ;;  %vm1711_vm15 = vcmp.gt.f32.partialorder %v1707_v63, 0.0  ;;  %vm1894_vm3 = vcmp.gt.f32.partialorder %v1890_v23, 0.0 }
 0x87c   : > { %v2711_v27 = vadd.f32 -1.0, %v3069_v62  ;;  %vm1712_vm7 = vcmp.gt.f32.partialorder %v4292_v48, 0.0  ;;  %vm1895_vm10 = vcmp.gt.f32.partialorder %v4305_v20, 0.0 }
 0x87d   : > { %3070 = vpow2.f32 %v1716_v13 }
 0x87e   : > { %3072 = vpow2.f32 %v1899_v51  ;;  %v2056_v57 = vpop.permute.xlu1 %2055  ;;  %v1496_v11 = vpop.permute.xlu0 %1495  ;;  %v1909_v25 = vsel %vm1893_vm14, %v1889_v40, %v2711_v27 }
 0x87f   : > { %v2069_v32 = vmul.f32 %v2056_v57, %v4205_v10  ;;  %v1509_v8 = vmul.f32 %v1496_v11, %v4188_v14  ;;  %v2061_v31 = vpop.permute.xlu2 %2060  ;;  %1917 = vrot.lane.b32.xlu1 %v1909_v25, %s3211_s13  ;;  %v1718_v10 = vmul.f32 1.442695, %v4292_v48 }
 0x880   : > { %v2070_v60 = vmul.f32 %v2061_v31, %v4231_v15 }
 0x881   : > { %v2089_v53 = vadd.f32 %v4257_v50, %v2069_v32  ;;  %v1529_v37 = vadd.f32 %v3860_v59, %v1509_v8 }
 0x882   : > { %v2090_v46 = vadd.f32 %v2081_v16, %v2070_v60 }
 0x883   : > { %v3071_v17 = vpop.eup %3070  ;;  %v2098_v34 = vmul.f32 1.442695, %v2089_v53  ;;  %v1538_v40 = vmul.f32 1.442695, %v1529_v37  ;;  %vm2093_vm4 = vcmp.gt.f32.partialorder %v2089_v53, 0.0  ;;  %vm1533_vm5 = vcmp.gt.f32.partialorder %v1529_v37, 0.0 }
 0x884   : > { %v3073_v56 = vpop.eup %3072  ;;  %v2100_v14 = vmul.f32 1.442695, %v2090_v46  ;;  %v2706_v12 = vadd.f32 -1.0, %v3071_v17  ;;  %vm2094_vm1 = vcmp.gt.f32.partialorder %v2090_v46, 0.0 }
 0x885   : > { %3074 = vpow2.f32 %v2098_v34  ;;  %v2712_v22 = vadd.f32 -1.0, %v3073_v56 }
 0x886   : > { %3076 = vpow2.f32 %v1538_v40  ;;  %v1501_v15 = vpop.permute.xlu1 %1500  ;;  %v1688_v42 = vpop.permute.xlu0 %1687  ;;  %v1727_v50 = vsel %vm1711_vm15, %v1707_v63, %v2706_v12 }
 0x887   : > { %3078 = vpow2.f32 %v2100_v14  ;;  %v1510_v59 = vmul.f32 %v1501_v15, %v4194_v44  ;;  %v1693_v16 = vmul.f32 %v1688_v42, %v4211_v0  ;;  %v1506_v4 = vpop.permute.xlu2 %1505  ;;  %1736 = vrot.lane.b32.xlu2 %v1727_v50, %s4433_s21  ;;  %v1910_v35 = vsel %vm1894_vm3, %v1890_v23, %v2712_v22 }
 0x888   : > { %v1511_v49 = vmul.f32 %v1506_v4, %v4200_v5  ;;  %1919 = vrot.lane.b32.xlu0 %v1910_v35, %s3211_s13  ;;  %3080 = vpow2.f32 %v1718_v10  ;;  %v1901_v5 = vmul.f32 1.442695, %v4305_v20 }
 0x889   : > { %v1530_v26 = vadd.f32 %v3883_v6, %v1510_v59  ;;  %v1709_v54 = vadd.f32 %v3885_v36, %v1693_v16 }
 0x88a   : > { %v1531_v44 = vadd.f32 %v3899_v52, %v1511_v49 }
 0x88b   : > { %v3075_v63 = vpop.eup %3074  ;;  %v1540_v0 = vmul.f32 1.442695, %v1530_v26  ;;  %v1720_v62 = vmul.f32 1.442695, %v1709_v54  ;;  %vm1534_vm6 = vcmp.gt.f32.partialorder %v1530_v26, 0.0  ;;  %vm1713_vm8 = vcmp.gt.f32.partialorder %v1709_v54, 0.0 }
 0x88c   : > { %v3077_v13 = vpop.eup %3076  ;;  %v1542_v51 = vmul.f32 1.442695, %v1531_v44  ;;  %v2718_v23 = vadd.f32 -1.0, %v3075_v63  ;;  %vm1535_vm9 = vcmp.gt.f32.partialorder %v1531_v44, 0.0 }
 0x88d   : > { %v3079_v29 = vpop.eup %3078  ;;  %v2700_v27 = vadd.f32 -1.0, %v3077_v13  ;;  %3082 = vpow2.f32 %v1540_v0 }
 0x88e   : > { %3084 = vpow2.f32 %v1720_v62  ;;  %v2250_v19 = vpop.permute.xlu1 %2249  ;;  %v2109_v6 = vsel %vm2093_vm4, %v2089_v53, %v2718_v23  ;;  %v2719_v57 = vadd.f32 -1.0, %v3079_v29  ;;  %v3081_v36 = vpop.eup %3080 }
 0x88f   : > { %v1549_v11 = vsel %vm1533_vm5, %v1529_v37, %v2700_v27  ;;  %3086 = vpow2.f32 %v1542_v51  ;;  %v2267_v52 = vmul.f32 %v2250_v19, %v4208_v30  ;;  %2118 = vrot.lane.b32.xlu1 %v2109_v6, %s3233_s23  ;;  %v2255_v25 = vpop.permute.xlu2 %2254  ;;  %v2707_v31 = vadd.f32 -1.0, %v3081_v36 }
 0x890   : > { %1553 = vst.msk [vmem:[#allocation3 + $0x8] sm:$0xff] %vm359_vm0, %v1549_v11  ;;  %v2110_v32 = vsel %vm2094_vm1, %v2090_v46, %v2719_v57  ;;  %3088 = vpow2.f32 %v1901_v5  ;;  %v2268_v62 = vmul.f32 %v2255_v25, %v4217_v2  ;;  %vm1746_vm1 = vcmask 261248  }
 0x891   : > { %v2283_v8 = vadd.f32 %v4270_v43, %v2267_v52  ;;  %2120 = vrot.lane.b32.xlu2 %v2110_v32, %s3233_s23  ;;  %v1728_v46 = vsel %vm1712_vm7, %v4292_v48, %v2707_v31  ;;  %vm2128_vm7 = vcmask 523648  }
 0x893   : > { %v3083_v60 = vpop.eup %3082  ;;  %v2291_v34 = vmul.f32 1.442695, %v2283_v8 }
 0x894   : > { %v3085_v53 = vpop.eup %3084  ;;  %v2701_v17 = vadd.f32 -1.0, %v3083_v60 }
 0x895   : > { %v3087_v37 = vpop.eup %3086  ;;  %v2708_v30 = vadd.f32 -1.0, %v3085_v53  ;;  %3090 = vpow2.f32 %v2291_v34 }
 0x896   : > { %v1550_v40 = vsel %vm1534_vm6, %v1530_v26, %v2701_v17  ;;  %v2702_v56 = vadd.f32 -1.0, %v3087_v37  ;;  %v2450_v10 = vpop.permute.xlu1 %2449  ;;  %v3089_v14 = vpop.eup %3088  ;;  %vm1929_vm6 = vcmask 392448  }
 0x897   : > { %1554 = vst.msk [vmem:[#allocation3 + $0x10] sm:$0xff] %vm359_vm0, %v1550_v40  ;;  %v1883_v43 = vpop.permute.xlu0 %1882  ;;  %v1729_v12 = vsel %vm1713_vm8, %v1709_v54, %v2708_v30  ;;  %1738 = vrot.lane.b32.xlu1 %v1728_v46, %s4433_s21  ;;  %v2455_v42 = vpop.permute.xlu2 %2454  ;;  %v2713_v48 = vadd.f32 -1.0, %v3089_v14  ;;  %v2463_v57 = vmul.f32 %v2450_v10, %v4229_v3  ;;  %vm2323_vm8 = vcmask 654848  }
 0x898   : > { %v1551_v33 = vsel %vm1535_vm9, %v1531_v44, %v2702_v56  ;;  %v1888_v22 = vmul.f32 %v1883_v43, %v4235_v18  ;;  %1740 = vrot.lane.b32.xlu0 %v1729_v12, %s4433_s21  ;;  %v2464_v59 = vmul.f32 %v2455_v42, %v4251_v61  ;;  %vm2518_vm9 = vcmask 786048  }
 0x899   : > { %1555 = vst.msk [vmem:[#allocation3 + $0x18] sm:$0xff] %vm359_vm0, %v1551_v33  ;;  %v1911_v4 = vsel %vm1895_vm10, %v4305_v20, %v2713_v48  ;;  %vm2287_vm0 = vcmp.gt.f32.partialorder %v2283_v8, 0.0  ;;  %vm2527_vm10 = vcmask 785408  }
 0x89a   : > { %v1892_v15 = vadd.f32 %v1888_v22, %v4076_v58  ;;  %v2480_v58 = vadd.f32 %v4276_v9, %v2464_v59 }
 0x89b   : > { %v3091_v35 = vpop.eup %3090 }
 0x89c   : > { %v1903_v50 = vmul.f32 1.442695, %v1892_v15  ;;  %v2723_v44 = vadd.f32 -1.0, %v3091_v35  ;;  %v2490_v13 = vmul.f32 1.442695, %v2480_v58  ;;  %vm1896_vm11 = vcmp.gt.f32.partialorder %v1892_v15, 0.0 }
 0x89d   : > { %vm2484_vm13 = vcmp.gt.f32.partialorder %v2480_v58, 0.0 }
 0x89e   : > { %3092 = vpow2.f32 %v1903_v50  ;;  %v2265_v16 = vpop.permute.xlu1 %2264  ;;  %v2303_v51 = vsel %vm2287_vm0, %v2283_v8, %v2723_v44 }
 0x89f   : > { %v2270_v18 = vmul.f32 %v2265_v16, %v4240_v41  ;;  %v2066_v49 = vpop.permute.xlu0 %2065  ;;  %1921 = vrot.lane.b32.xlu1 %v1911_v4, %s3211_s13 }
 0x8a0   : > { %v2071_v26 = vmul.f32 %v2066_v49, %v4242_v47 }
 0x8a1   : > { %v2286_v54 = vadd.f32 %v4273_v1, %v2270_v18 }
 0x8a2   : > { %v2091_v61 = vadd.f32 %v4222_v45, %v2071_v26  ;;  %v2284_v45 = vadd.f32 %v4237_v28, %v2268_v62 }
 0x8a3   : > { %v2297_v63 = vmul.f32 1.442695, %v2286_v54  ;;  %vm2290_vm2 = vcmp.gt.f32.partialorder %v2286_v54, 0.0 }
 0x8a4   : > { %v3093_v0 = vpop.eup %3092  ;;  %v2102_v20 = vmul.f32 1.442695, %v2091_v61  ;;  %v2293_v19 = vmul.f32 1.442695, %v2284_v45  ;;  %vm2095_vm12 = vcmp.gt.f32.partialorder %v2091_v61, 0.0  ;;  %vm2288_vm3 = vcmp.gt.f32.partialorder %v2284_v45, 0.0 }
 0x8a5   : > { %3094 = vpow2.f32 %v2297_v63  ;;  %v2714_v41 = vadd.f32 -1.0, %v3093_v0 }
 0x8a6   : > { %3096 = vpow2.f32 %v2102_v20 }
 0x8a7   : > { %v2445_v47 = vpop.permute.xlu0 %2444  ;;  %2311 = vrot.lane.b32.xlu1 %v2303_v51, %s4434_s22  ;;  %v1912_v9 = vsel %vm1896_vm11, %v1892_v15, %v2714_v41  ;;  %3098 = vpow2.f32 %v2490_v13 }
 0x8a8   : > { %v2462_v1 = vmul.f32 %v2445_v47, %v4219_v21  ;;  %1923 = vrot.lane.b32.xlu2 %v1912_v9, %s3211_s13  ;;  %s2652_s13 = sshll.u32 %s316_s20, 5 }
 0x8a9   : > { %s318_s18 = scalar_lea.vmem [#allocation7], %s2652_s13 }
 0x8aa   : > { %v2478_v2 = vadd.f32 %v4247_v7, %v2462_v1  ;;  %v2479_v7 = vadd.f32 %v4267_v38, %v2463_v57  ;;  %v2473_v38 = vpop.permute.xlu2 %2472  ;;  %s2545_s17 = sshll.u32 %s318_s18, 4  ;;  %s2546_s17 = int_to_ptr.vmem [resolvable:$true] %s2545_s17 }
 0x8ab   : > { %v3095_v23 = vpop.eup %3094 }
 0x8ac   : > { %v3097_v29 = vpop.eup %3096  ;;  %v2486_v5 = vmul.f32 1.442695, %v2478_v2  ;;  %v2726_v27 = vadd.f32 -1.0, %v3095_v23  ;;  %v2488_v60 = vmul.f32 1.442695, %v2479_v7  ;;  %vm2482_vm14 = vcmp.gt.f32.partialorder %v2478_v2, 0.0 }
 0x8ad   : > { %v2720_v6 = vadd.f32 -1.0, %v3097_v29  ;;  %v3099_v21 = vpop.eup %3098  ;;  %vm2483_vm4 = vcmp.gt.f32.partialorder %v2479_v7, 0.0 }
 0x8ae   : > { %3100 = vpow2.f32 %v2486_v5  ;;  %v2306_v36 = vsel %vm2290_vm2, %v2286_v54, %v2726_v27  ;;  %v2731_v32 = vadd.f32 -1.0, %v3099_v21 }
 0x8af   : > { %v2260_v11 = vpop.permute.xlu0 %2259  ;;  %v2111_v52 = vsel %vm2095_vm12, %v2091_v61, %v2720_v6  ;;  %2317 = vrot.lane.b32.xlu1 %v2306_v36, %s4434_s22  ;;  %3102 = vpow2.f32 %v2293_v19 }
 0x8b0   : > { %v2269_v28 = vmul.f32 %v2260_v11, %v4227_v24  ;;  %2122 = vrot.lane.b32.xlu0 %v2111_v52, %s3233_s23  ;;  %v2500_v53 = vsel %vm2484_vm13, %v2480_v58, %v2731_v32 }
 0x8b2   : > { %v2285_v25 = vadd.f32 %v4262_v39, %v2269_v28 }
 0x8b4   : > { %v3101_v8 = vpop.eup %3100  ;;  %v2295_v3 = vmul.f32 1.442695, %v2285_v25  ;;  %vm2289_vm15 = vcmp.gt.f32.partialorder %v2285_v25, 0.0 }
 0x8b5   : > { %v2729_v31 = vadd.f32 -1.0, %v3101_v8  ;;  %v3103_v24 = vpop.eup %3102 }
 0x8b6   : > { %3104 = vpow2.f32 %v2295_v3  ;;  %v2724_v30 = vadd.f32 -1.0, %v3103_v24 }
 0x8b7   : > { %v2460_v17 = vpop.permute.xlu0 %2459  ;;  %v2498_v37 = vsel %vm2482_vm14, %v2478_v2, %v2729_v31  ;;  %2510 = vrot.lane.b32.xlu1 %v2500_v53, %s4436_s19  ;;  %3106 = vpow2.f32 %v2488_v60 }
 0x8b8   : > { %v2465_v34 = vmul.f32 %v2460_v17, %v4259_v55  ;;  %2506 = vrot.lane.b32.xlu2 %v2498_v37, %s4436_s19  ;;  %v2304_v14 = vsel %vm2288_vm3, %v2284_v45, %v2724_v30 }
 0x8ba   : > { %v2481_v39 = vadd.f32 %v2473_v38, %v2465_v34 }
 0x8bc   : > { %v3105_v40 = vpop.eup %3104  ;;  %v2492_v56 = vmul.f32 1.442695, %v2481_v39  ;;  %vm2485_vm5 = vcmp.gt.f32.partialorder %v2481_v39, 0.0 }
 0x8bd   : > { %v2725_v10 = vadd.f32 -1.0, %v3105_v40  ;;  %v3107_v43 = vpop.eup %3106 }
 0x8be   : > { %3108 = vpow2.f32 %v2492_v56  ;;  %v2730_v55 = vadd.f32 -1.0, %v3107_v43 }
 0x8bf   : > { %v2305_v46 = vsel %vm2289_vm15, %v2285_v25, %v2725_v10 }
 0x8c0   : > { %2315 = vrot.lane.b32.xlu0 %v2305_v46, %s4434_s22  ;;  %2313 = vrot.lane.b32.xlu2 %v2304_v14, %s4434_s22  ;;  %v2499_v22 = vsel %vm2483_vm4, %v2479_v7, %v2730_v55  ;;  %s2544_s22 = scalar_lea.hbm %s4420_s7, %s2746_s14 }
 0x8c4   : > { %v3109_v12 = vpop.eup %3108 }
 0x8c5   : > { %v2732_v33 = vadd.f32 -1.0, %v3109_v12 }
 0x8c7   : > { %v2501_v15 = vsel %vm2485_vm5, %v2481_v39, %v2732_v33 }
 0x8c8   : > { %2508 = vrot.lane.b32.xlu0 %v2499_v22, %s4436_s19  ;;  %2512 = vrot.lane.b32.xlu2 %v2501_v15, %s4436_s19  ;;  %s2547_s19 = sshll.u32 %s2544_s22, 4  ;;  %s2548_s19 = int_to_ptr.hbm [resolvable:$true] %s2547_s19 }
 0x8c9   : > { %s3154_s23 = sshra.s32 %s2548_s19, 4  ;;  %s3155_s23 = int_to_ptr.hbm [resolvable:$true] %s3154_s23 }
 0x8ca   : > { %s3156_s29 = scalar_lea.hbm %s3155_s23, 32  ;;  %p3161_p3 = scmp.lt.s32.totalorder %s3155_s23, %s4420_s7 }
 0x8cb   : > { %p3157_p0 = scmp.ne.s32.totalorder %s3155_s23, %s3156_s29  ;;  %p3162_p4 = scmp.lt.s32.totalorder %s3160_s9, %s3156_s29 }
 0x8cd   : > { %p3158_p1 = pnand %p3157_p0, %p3314_p5  ;;  %p3163_p7 = por %p3162_p4, %p3161_p3 }
 0x8cf   : > { %p3159_p2 = pneg %p3158_p1 }
 0x8d1   : > { %v1735_v42 = vpop.permute.xlu0 %1734  ;;  %p3164_p8 = pnand %p3163_p7, %p3159_p2 }
 0x8d2   : > { %1747 = vst.msk [vmem:[#allocation3] sm:$0xff] %vm1746_vm1, %v1735_v42 }
 0x8e1   : > { %v1737_v48 = vpop.permute.xlu2 %1736 }
 0x8e2   : > { %1748 = vst.msk [vmem:[#allocation3 + $0x8] sm:$0xff] %vm1746_vm1, %v1737_v48 }
 0x8e8   : > { %v2117_v59 = vpop.permute.xlu0 %2116 }
 0x8eb   : > { %v2121_v35 = vpop.permute.xlu2 %2120 }
 0x8f1   : > { %v1918_v50 = vpop.permute.xlu1 %1917 }
 0x8f2   : > { %1930 = vst.msk [vmem:[#allocation3] sm:$0xff] %vm1929_vm6, %v1918_v50 }
 0x8f3   : > { %2129 = vst.msk [vmem:[#allocation3] sm:$0xff] %vm2128_vm7, %v2117_v59 }
 0x8fa   : > { %v1920_v16 = vpop.permute.xlu0 %1919 }
 0x8fb   : > { %1931 = vst.msk [vmem:[#allocation3 + $0x8] sm:$0xff] %vm1929_vm6, %v1920_v16 }
 0x901   : > { %v2119_v4 = vpop.permute.xlu1 %2118 }
 0x902   : > { %2130 = vst.msk [vmem:[#allocation3 + $0x8] sm:$0xff] %vm2128_vm7, %v2119_v4  ;;  %v1924_v49 = vpop.permute.xlu2 %1923 }
 0x909   : > { %v1739_v18 = vpop.permute.xlu1 %1738 }
 0x90a   : > { %v1741_v26 = vpop.permute.xlu0 %1740  ;;  %1749 = vst.msk [vmem:[#allocation3 + $0x10] sm:$0xff] %vm1746_vm1, %v1739_v18 }
 0x90b   : > { %1750 = vst.msk [vmem:[#allocation3 + $0x18] sm:$0xff] %vm1746_vm1, %v1741_v26 }
 0x90c   : > { %1933 = vst.msk [vmem:[#allocation3 + $0x18] sm:$0xff] %vm1929_vm6, %v1924_v49 }
 0x911   : > { %v1922_v58 = vpop.permute.xlu1 %1921 }
 0x912   : > { %1932 = vst.msk [vmem:[#allocation3 + $0x10] sm:$0xff] %vm1929_vm6, %v1922_v58  ;;  %v2507_v54 = vpop.permute.xlu2 %2506 }
 0x913   : > { %2131 = vst.msk [vmem:[#allocation3 + $0x10] sm:$0xff] %vm2128_vm7, %v2121_v35 }
 0x919   : > { %v2312_v61 = vpop.permute.xlu1 %2311 }
 0x91a   : > { %2324 = vst.msk [vmem:[#allocation3] sm:$0xff] %vm2323_vm8, %v2312_v61  ;;  %v2314_v44 = vpop.permute.xlu2 %2313 }
 0x91b   : > { %2519 = vst.msk [vmem:[#allocation3] sm:$0xff] %vm2518_vm9, %v2507_v54 }
 0x91c   : > { %2325 = vst.msk [vmem:[#allocation3 + $0x8] sm:$0xff] %vm2323_vm8, %v2314_v44 }
 0x921   : > { %v2318_v63 = vpop.permute.xlu1 %2317 }
 0x922   : > { %v2123_v0 = vpop.permute.xlu0 %2122  ;;  %v2523_v62 = vld [vmem:[#allocation3] sm:$0xff]  ;;  %v2513_v20 = vpop.permute.xlu2 %2512 }
 0x923   : > { %2132 = vst.msk [vmem:[#allocation3 + $0x18] sm:$0xff] %vm2128_vm7, %v2123_v0 }
 0x924   : > { %2327 = vst.msk [vmem:[#allocation3 + $0x18] sm:$0xff] %vm2323_vm8, %v2318_v63 }
 0x925   : > { %2522 = vst.msk [vmem:[#allocation3 + $0x18] sm:$0xff] %vm2518_vm9, %v2513_v20 }
 0x926   : > { %2528 = vst.msk [vmem:[%s318_s18] sm:$0xff] %vm2527_vm10, %v2523_v62 }
 0x929   : > { %v2511_v51 = vpop.permute.xlu1 %2510 }
 0x92c   : > { %v2526_v13 = vld [vmem:[#allocation3 + $0x18] sm:$0xff] }
 0x92d   : > { %2531 = vst.msk [vmem:[%s318_s18 + $0x18] sm:$0xff] %vm2527_vm10, %v2526_v13 }
 0x932   : > { %v2316_v41 = vpop.permute.xlu0 %2315 }
 0x933   : > { %2326 = vst.msk [vmem:[#allocation3 + $0x10] sm:$0xff] %vm2323_vm8, %v2316_v41 }
 0x934   : > { %2521 = vst.msk [vmem:[#allocation3 + $0x10] sm:$0xff] %vm2518_vm9, %v2511_v51 }
 0x93a   : > { %v2509_v47 = vpop.permute.xlu0 %2508 }
 0x93b   : > { %2520 = vst.msk [vmem:[#allocation3 + $0x8] sm:$0xff] %vm2518_vm9, %v2509_v47  ;;  %v2525_v9 = vld [vmem:[#allocation3 + $0x10] sm:$0xff] }
 0x93c   : > { %2530 = vst.msk [vmem:[%s318_s18 + $0x10] sm:$0xff] %vm2527_vm10, %v2525_v9 }
 0x942   : > { %v2524_v1 = vld [vmem:[#allocation3 + $0x8] sm:$0xff] }
 0x943   : > { %2529 = vst.msk [vmem:[%s318_s18 + $0x8] sm:$0xff] %vm2527_vm10, %v2524_v1 }
 0x944   : > { %3167 = shalt.err (!%p3164_p8)
}
 0x945   : > { %s3235_s20 = smov 128   ;;  %s4438_s18 = smov 8  }
 0x946   : > { %2770 = dma.vmem_to_hbm [thread:$0]  (%p3314_p5), %s2546_s17, 512, %s2548_s19, %s2533_s28, %s3235_s20, %s3235_s20, %s4438_s18  }
 0x947 PF: > { %p2782_p9 = scmp.ge.s32.totalorder %s3206_s27, 2  ;;  %s2562_s16 = sand.u32 1, %s3194_s24  }
 0x948   : > { %s2563_s21 = scalar_lea.sflag [#allocation6], %s2562_s16 }
 0x949   : > { %p2777_p10 = pnand %p2782_p9, %p3318_p6 }
 0x94b   : > { %p2778_p11 = pneg %p2777_p10 }
 0x94d   : > { %3189 = dma.done.wait (%p2778_p11), %s2563_s21, 512  }
 0x94e   : > { %3191 = vsyncadd (%p2778_p11), %s2563_s21, 4294966784  ;;  %p18_p12 = scmp.ge.s32.totalorder %s3301_s30, 4   ;;  %s4439_s24 = smov %s3198_s25 }
 0x94f   : > { %s4440_s25 = smov %s3202_s26  ;;  %s4441_s26 = smov %s3312_s10 }
 0x950   : > { %s4442_s27 = smov %s3301_s30  ;;  %20 = sbr.rel (!%p18_p12) target bundleno = 4 (0x4), region = 94 }
 0x955   :  { %2569 = vsyncpa [#allocation5], 1 }
 0x956   :  { %2571 = vsyncpa [#allocation5 + $0x1], 1 }
 0x957   :  { %2572 = vsyncpa [#allocation6], 1 }
 0x958   :  { %2574 = vsyncpa [#allocation6 + $0x1], 1 }

</bundles_post_ra>
